<compile_context>
chip_gen: v5e
topology: v5e:2x2
jax: 0.10.0
libtpu: 0.0.40
codegen_flags: <defaults>
</compile_context>

<pallas_src>
import functools

import numpy as np
import jax
import jax.numpy as jnp
from jax import lax
from jax.experimental import pallas as pl
from jax.experimental.pallas import tpu as pltpu


# ------------------------------ fused kernel -------------------------------

def _up_block_kernel(hid_ref, skip_ref,
                     gn1_g_ref, gn1_b_ref, p1_ref, w1_ref, c1b_ref,
                     gn2_g_ref, gn2_b_ref, p2_ref, w2_ref, c2b_ref,
                     wr_ref, rb_ref, wu_ref, ub_ref,
                     o_ref, xpad_ref, *, H, W, eps, mxu_dtype):
    f32 = jnp.float32
    HW = H * W
    ch = hid_ref.shape[-1]
    cs = skip_ref.shape[-1]
    cin = ch + cs
    cmid = w1_ref.shape[-1]

    # Zero the padded conv scratch once per grid step; each conv overwrites the
    # interior and the 1-pixel border stays zero => implicit "same" padding in
    # VMEM (no HBM jnp.pad, no (H+2, W+2) blocks through the pipeline).
    xpad_ref[...] = jnp.zeros_like(xpad_ref)

    def gn_silu(x, g_ref, b_ref, p_ref):
        # GroupNorm(groups, eps) + SiLU. Statistics in f32; group aggregation
        # via a tiny constant projector (p[c, c'] = 1/group_size if same group).
        n_inv = 1.0 / HW
        m1 = jnp.sum(x, axis=0, keepdims=True) * n_inv            # E[x]   per channel
        m2 = jnp.sum(x * x, axis=0, keepdims=True) * n_inv        # E[x^2] per channel
        gmean = jnp.dot(m1, p_ref[...], preferred_element_type=f32)
        gvar = jnp.dot(m2, p_ref[...], preferred_element_type=f32) - gmean * gmean
        scale = g_ref[...].astype(f32) * lax.rsqrt(gvar + eps)
        shift = b_ref[...].astype(f32) - gmean * scale
        y = x * scale + shift
        return y * jax.nn.sigmoid(y)                               # SiLU

    def conv3x3(act, w_ref, b_ref, c):
        # Stage the activation (cast to the MXU dtype) into the zero-padded VMEM
        # scratch, read the 9 taps straight from the ref, and do ONE im2col
        # matmul (HW, 9*c) x (9*c, cout) with f32 accumulation.
        xpad_ref[1:H + 1, 1:W + 1, 0:c] = act.reshape(H, W, c).astype(mxu_dtype)
        taps = [xpad_ref[dy:dy + H, dx:dx + W, 0:c]
                for dy in range(3) for dx in range(3)]
        patches = jnp.concatenate(taps, axis=-1).reshape(HW, 9 * c)
        out = jnp.dot(patches, w_ref[...], preferred_element_type=f32)
        return out + b_ref[...].astype(f32)

    # torch.cat([hidden, skip], dim=1) -> channel concat, done once, in VMEM.
    x = jnp.concatenate([hid_ref[0].astype(f32), skip_ref[0].astype(f32)], axis=-1)

    # Residual 1x1 conv: a single MXU matmul over the concatenated channels.
    res = jnp.dot(x.astype(mxu_dtype), wr_ref[...], preferred_element_type=f32)
    res = res + rb_ref[...].astype(f32)

    # ResnetBlock (nn.Dropout(p=0.0) is an identity at inference).
    h = gn_silu(x, gn1_g_ref, gn1_b_ref, p1_ref)
    h = conv3x3(h, w1_ref, c1b_ref, cin)
    h = gn_silu(h, gn2_g_ref, gn2_b_ref, p2_ref)
    h = conv3x3(h, w2_ref, c2b_ref, cmid) + res

    # UpSampler folded into a 3x3 conv on the original grid (weights pre-folded).
    out = conv3x3(h, wu_ref, ub_ref, cmid)
    o_ref[0] = out.astype(o_ref.dtype)


# ------------------------------ wrappers ------------------------------------

def upsampler_effective_weight(w):
    """Fold (nearest x2 upsample -> 3x3 conv, stride 2, pad 1) into an equivalent
    conv on the ORIGINAL grid with taps at offsets {-1,0}x{-1,0}, embedded in a
    3x3 kernel (zeros at the +1 offsets) so the standard conv3x3 path is reused."""
    w_eff = jnp.zeros_like(w)
    w_eff = w_eff.at[0, 0].set(w[0, 0])
    w_eff = w_eff.at[0, 1].set(w[0, 1] + w[0, 2])
    w_eff = w_eff.at[1, 0].set(w[1, 0] + w[2, 0])
    w_eff = w_eff.at[1, 1].set(w[1, 1] + w[1, 2] + w[2, 1] + w[2, 2])
    return w_eff


def _group_projector(c, groups):
    gs = c // groups
    return jnp.kron(jnp.eye(groups, dtype=jnp.float32),
                    jnp.full((gs, gs), 1.0 / gs, dtype=jnp.float32))


def up_block_forward(hidden_states, res_hidden_states_tuple, params, *,
                     groups=32, eps=1e-6, mxu_dtype=jnp.bfloat16):
    """UpBlock.forward (num_layers=1), NHWC inputs, one fused Pallas kernel."""
    skip = res_hidden_states_tuple[-1]
    b, h, w, ch = hidden_states.shape
    cs = skip.shape[-1]
    cin = ch + cs
    cmid = params['conv1_w'].shape[-1]
    cout = params['up_w'].shape[-1]
    hw = h * w
    cmax = max(cin, cmid)
    assert cin % groups == 0 and cmid % groups == 0

    f32 = jnp.float32
    hid2 = hidden_states.reshape(b, hw, ch)
    skp2 = skip.reshape(b, hw, cs)

    # Conv weights in im2col layout (9*Cin, Cout) and MXU dtype; GN / bias f32.
    w1 = params['conv1_w'].reshape(9 * cin, cmid).astype(mxu_dtype)
    w2 = params['conv2_w'].reshape(9 * cmid, cmid).astype(mxu_dtype)
    wu = upsampler_effective_weight(params['up_w']).reshape(9 * cmid, cout).astype(mxu_dtype)
    wr = params['res_w'].astype(mxu_dtype)
    c1b = params['conv1_b'].reshape(1, cmid).astype(f32)
    c2b = params['conv2_b'].reshape(1, cmid).astype(f32)
    ub = params['up_b'].reshape(1, cout).astype(f32)
    rb = params['res_b'].reshape(1, cmid).astype(f32)
    g1 = params['gn1_g'].reshape(1, cin).astype(f32)
    b1 = params['gn1_b'].reshape(1, cin).astype(f32)
    g2 = params['gn2_g'].reshape(1, cmid).astype(f32)
    b2 = params['gn2_b'].reshape(1, cmid).astype(f32)
    p1 = _group_projector(cin, groups)
    p2 = _group_projector(cmid, groups)

    def const_spec(shape):
        zeros = (0,) * len(shape)
        return pl.BlockSpec(shape, lambda i, _z=zeros: _z)

    def batch_spec(shape):
        zeros = (0,) * len(shape)
        return pl.BlockSpec((1,) + tuple(shape), lambda i, _z=zeros: (i,) + _z)

    # Explicit VMEM budget: double-buffered I/O blocks + weights + pad scratch
    # + in-kernel temporaries (im2col patches dominate), with 2x headroom.
    msize = np.dtype(mxu_dtype).itemsize
    est = (2 * 4 * hw * (ch + cs + cout)
           + msize * (9 * cin * cmid + 9 * cmid * cmid + 9 * cmid * cout + cin * cmid)
           + 4 * (cin * cin + cmid * cmid + 4 * (cin + cmid) + 2 * cmid + cout)
           + msize * (h + 2) * (w + 2) * cmax
           + 4 * hw * (2 * cin + 9 * cmax + 3 * cmid + cout))
    vmem_limit = int(min(max(2 * est, 16 * 1024 * 1024), 40 * 1024 * 1024))

    out = pl.pallas_call(
        functools.partial(_up_block_kernel, H=h, W=w, eps=eps, mxu_dtype=mxu_dtype),
        out_shape=jax.ShapeDtypeStruct((b, hw, cout), hidden_states.dtype),
        grid=(b,),
        in_specs=[
            batch_spec((hw, ch)),          # hidden_states
            batch_spec((hw, cs)),          # skip (res_hidden_states)
            const_spec((1, cin)),          # GN1 gamma
            const_spec((1, cin)),          # GN1 beta
            const_spec((cin, cin)),        # GN1 group projector
            const_spec((9 * cin, cmid)),   # conv1 weight (im2col layout)
            const_spec((1, cmid)),         # conv1 bias
            const_spec((1, cmid)),         # GN2 gamma
            const_spec((1, cmid)),         # GN2 beta
            const_spec((cmid, cmid)),      # GN2 group projector
            const_spec((9 * cmid, cmid)),  # conv2 weight (im2col layout)
            const_spec((1, cmid)),         # conv2 bias
            const_spec((cin, cmid)),       # residual 1x1 weight
            const_spec((1, cmid)),         # residual bias
            const_spec((9 * cmid, cout)),  # folded upsampler weight (im2col)
            const_spec((1, cout)),         # upsampler bias
        ],
        out_specs=batch_spec((hw, cout)),
        scratch_shapes=[pltpu.VMEM((h + 2, w + 2, cmax), mxu_dtype)],
        compiler_params=pltpu.CompilerParams(
            dimension_semantics=("parallel",),
            vmem_limit_bytes=vmem_limit),
    )(hid2, skp2, g1, b1, p1, w1, c1b, g2, b2, p2, w2, c2b, wr, rb, wu, ub)
    return out.reshape(b, h, w, cout)


# ----------------------------- pure-JAX reference ---------------------------

def _gn_ref(x, gamma, beta, groups=32, eps=1e-6):
    b, h, w, c = x.shape
    gs = c // groups
    xr = x.reshape(b, h, w, groups, gs)
    mean = xr.mean(axis=(1, 2, 4), keepdims=True)
    var = ((xr - mean) ** 2).mean(axis=(1, 2, 4), keepdims=True)
    xn = ((xr - mean) / jnp.sqrt(var + eps)).reshape(b, h, w, c)
    return xn * gamma + beta


def _conv_ref(x, w, b, stride=1, padding=((1, 1), (1, 1))):
    out = lax.conv_general_dilated(x, w, (stride, stride), padding,
                                   dimension_numbers=('NHWC', 'HWIO', 'NHWC'))
    return out + b


def ref_forward(hidden, res_tuple, p):
    x = jnp.concatenate([hidden, res_tuple[-1]], axis=-1)
    res_w = p['res_w'].reshape(1, 1, *p['res_w'].shape)
    residual = _conv_ref(x, res_w, p['res_b'], 1, ((0, 0), (0, 0)))
    h = jax.nn.silu(_gn_ref(x, p['gn1_g'], p['gn1_b']))
    h = _conv_ref(h, p['conv1_w'], p['conv1_b'])
    h = jax.nn.silu(_gn_ref(h, p['gn2_g'], p['gn2_b']))
    h = _conv_ref(h, p['conv2_w'], p['conv2_b'])
    h = h + residual
    up = jnp.repeat(jnp.repeat(h, 2, axis=1), 2, axis=2)   # nearest x2 upsample
    return _conv_ref(up, p['up_w'], p['up_b'], stride=2)   # 3x3 stride-2, pad 1


# ----------------------------- params / main --------------------------------

def init_params(key, in_channels, prev_output_channel, out_channels):
    c_in = prev_output_channel + in_channels
    ks = jax.random.split(key, 12)

    def rnd(k, shape, scale=0.1):
        return scale * jax.random.normal(k, shape, jnp.float32)

    return dict(
        gn1_g=1.0 + rnd(ks[0], (c_in,)),
        gn1_b=rnd(ks[1], (c_in,)),
        conv1_w=rnd(ks[2], (3, 3, c_in, out_channels)),
        conv1_b=rnd(ks[3], (out_channels,)),
        gn2_g=1.0 + rnd(ks[4], (out_channels,)),
        gn2_b=rnd(ks[5], (out_channels,)),
        conv2_w=rnd(ks[6], (3, 3, out_channels, out_channels)),
        conv2_b=rnd(ks[7], (out_channels,)),
        res_w=rnd(ks[8], (c_in, out_channels)),
        res_b=rnd(ks[9], (out_channels,)),
        up_w=rnd(ks[10], (3, 3, out_channels, out_channels)),
        up_b=rnd(ks[11], (out_channels,)),
    )


if __name__ == "__main__":
    B, H, W = 2, 8, 8
    in_channels = 32           # skip (res_hidden_states) channels
    prev_output_channel = 32   # hidden_states channels
    out_channels = 32          # GroupNorm(32) needs channel counts divisible by 32

    key = jax.random.PRNGKey(0)
    k1, k2, k3 = jax.random.split(key, 3)
    hidden = jax.random.normal(k1, (B, H, W, prev_output_channel), jnp.float32)
    skip = jax.random.normal(k2, (B, H, W, in_channels), jnp.float32)
    params = init_params(k3, in_channels, prev_output_channel, out_channels)

    ref = jax.block_until_ready(ref_forward(hidden, (skip,), params))

    # Exact-math path (f32 MXU operands): tight check of the fused algebra.
    fwd_f32 = jax.jit(functools.partial(up_block_forward, mxu_dtype=jnp.float32))
    out_f32 = jax.block_until_ready(fwd_f32(hidden, (skip,), params))
    assert out_f32.shape == (B, H, W, out_channels), out_f32.shape
    err = float(jnp.max(jnp.abs(out_f32 - ref)))
    assert err < 2e-3, f"f32 kernel mismatch vs reference: max abs err = {err}"

    # Fast path (bf16 MXU operands, f32 accumulation, f32 GroupNorm statistics).
    fwd_bf16 = jax.jit(functools.partial(up_block_forward, mxu_dtype=jnp.bfloat16))
    out_bf16 = jax.block_until_ready(fwd_bf16(hidden, (skip,), params))
    rel = float(jnp.max(jnp.abs(out_bf16 - ref)) / jnp.max(jnp.abs(ref)))
    assert rel < 3e-2, f"bf16 kernel mismatch vs reference: rel err = {rel}"

    print("KERNEL_OK")
</pallas_src>

<mosaic_0001>
module attributes {stable_mosaic.version = 11 : i64} {
  func.func @_up_block_kernel(%arg0: i32, %arg1: memref<1x64x32xf32, #tpu.memory_space<vmem>>, %arg2: memref<1x64x32xf32, #tpu.memory_space<vmem>>, %arg3: memref<1x64xf32, #tpu.memory_space<vmem>>, %arg4: memref<1x64xf32, #tpu.memory_space<vmem>>, %arg5: memref<64x64xf32, #tpu.memory_space<vmem>>, %arg6: memref<576x32xf32, #tpu.memory_space<vmem>>, %arg7: memref<1x32xf32, #tpu.memory_space<vmem>>, %arg8: memref<1x32xf32, #tpu.memory_space<vmem>>, %arg9: memref<1x32xf32, #tpu.memory_space<vmem>>, %arg10: memref<32x32xf32, #tpu.memory_space<vmem>>, %arg11: memref<288x32xf32, #tpu.memory_space<vmem>>, %arg12: memref<1x32xf32, #tpu.memory_space<vmem>>, %arg13: memref<64x32xf32, #tpu.memory_space<vmem>>, %arg14: memref<1x32xf32, #tpu.memory_space<vmem>>, %arg15: memref<288x32xf32, #tpu.memory_space<vmem>>, %arg16: memref<1x32xf32, #tpu.memory_space<vmem>>, %arg17: memref<1x64x32xf32, #tpu.memory_space<vmem>>, %arg18: memref<10x10x64xf32, #tpu.memory_space<vmem>>) attributes {dimension_semantics = [#tpu.dimension_semantics<parallel>], iteration_bounds = array<i64: 2>, scalar_prefetch = 0 : i64, scratch_operands = 1 : i64, tpu.core_type = #tpu.core_type<tc>, window_params = [{transform_indices = @transform_0, window_bounds = array<i64: 1, 64, 32>}, {transform_indices = @transform_1, window_bounds = array<i64: 1, 64, 32>}, {pipeline_mode = #tpu.pipeline_mode<synchronous>, transform_indices = @transform_2, window_bounds = array<i64: 1, 64>}, {pipeline_mode = #tpu.pipeline_mode<synchronous>, transform_indices = @transform_3, window_bounds = array<i64: 1, 64>}, {pipeline_mode = #tpu.pipeline_mode<synchronous>, transform_indices = @transform_4, window_bounds = array<i64: 64, 64>}, {pipeline_mode = #tpu.pipeline_mode<synchronous>, transform_indices = @transform_5, window_bounds = array<i64: 576, 32>}, {pipeline_mode = #tpu.pipeline_mode<synchronous>, transform_indices = @transform_6, window_bounds = array<i64: 1, 32>}, {pipeline_mode = #tpu.pipeline_mode<synchronous>, transform_indices = @transform_7, window_bounds = array<i64: 1, 32>}, {pipeline_mode = #tpu.pipeline_mode<synchronous>, transform_indices = @transform_8, window_bounds = array<i64: 1, 32>}, {pipeline_mode = #tpu.pipeline_mode<synchronous>, transform_indices = @transform_9, window_bounds = array<i64: 32, 32>}, {pipeline_mode = #tpu.pipeline_mode<synchronous>, transform_indices = @transform_10, window_bounds = array<i64: 288, 32>}, {pipeline_mode = #tpu.pipeline_mode<synchronous>, transform_indices = @transform_11, window_bounds = array<i64: 1, 32>}, {pipeline_mode = #tpu.pipeline_mode<synchronous>, transform_indices = @transform_12, window_bounds = array<i64: 64, 32>}, {pipeline_mode = #tpu.pipeline_mode<synchronous>, transform_indices = @transform_13, window_bounds = array<i64: 1, 32>}, {pipeline_mode = #tpu.pipeline_mode<synchronous>, transform_indices = @transform_14, window_bounds = array<i64: 288, 32>}, {pipeline_mode = #tpu.pipeline_mode<synchronous>, transform_indices = @transform_15, window_bounds = array<i64: 1, 32>}, {transform_indices = @transform_16, window_bounds = array<i64: 1, 64, 32>}]} {
    %cst = arith.constant 0.000000e+00 : f32
    %0 = vector.broadcast %cst : f32 to vector<10x10x64xf32>
    %c0 = arith.constant 0 : index
    %c0_0 = arith.constant 0 : index
    %c0_1 = arith.constant 0 : index
    %1 = vector.load %arg18[%c0, %c0_0, %c0_1] : memref<10x10x64xf32, #tpu.memory_space<vmem>>, vector<10x10x64xf32>
    tpu.vector_store %arg18[%c0, %c0_0, %c0_1], %0 {strides = array<i32>} : memref<10x10x64xf32, #tpu.memory_space<vmem>>, vector<10x10x64xf32>,
    %c0_2 = arith.constant 0 : index
    %c0_3 = arith.constant 0 : index
    %c0_4 = arith.constant 0 : index
    %2 = vector.load %arg1[%c0_2, %c0_3, %c0_4] : memref<1x64x32xf32, #tpu.memory_space<vmem>>, vector<1x64x32xf32>
    %3 = vector.shape_cast %2 : vector<1x64x32xf32> to vector<64x32xf32>
    %c0_5 = arith.constant 0 : index
    %c0_6 = arith.constant 0 : index
    %c0_7 = arith.constant 0 : index
    %4 = vector.load %arg2[%c0_5, %c0_6, %c0_7] : memref<1x64x32xf32, #tpu.memory_space<vmem>>, vector<1x64x32xf32>
    %5 = vector.shape_cast %4 : vector<1x64x32xf32> to vector<64x32xf32>
    %6 = tpu.concatenate %3, %5 in 1 : vector<64x32xf32>, vector<64x32xf32> -> vector<64x64xf32>
    %c0_8 = arith.constant 0 : index
    %c0_9 = arith.constant 0 : index
    %7 = vector.load %arg13[%c0_8, %c0_9] : memref<64x32xf32, #tpu.memory_space<vmem>>, vector<64x32xf32>
    %cst_10 = arith.constant dense<0.000000e+00> : vector<64x32xf32>
    %8 = tpu.matmul %6, %7, %cst_10 {dimension_numbers = #tpu.dot_dimension_numbers<[1], [0], [0], [1], [0, 0, 1, 1], [], []>} : vector<64x64xf32>, vector<64x32xf32>, vector<64x32xf32> -> vector<64x32xf32>
    %c0_11 = arith.constant 0 : index
    %c0_12 = arith.constant 0 : index
    %9 = vector.load %arg14[%c0_11, %c0_12] : memref<1x32xf32, #tpu.memory_space<vmem>>, vector<1x32xf32>
    %10 = vector.broadcast %9 : vector<1x32xf32> to vector<64x32xf32>
    %11 = arith.addf %8, %10 : vector<64x32xf32>
    %cst_13 = arith.constant dense<0.000000e+00> : vector<64xf32>
    %12 = vector.multi_reduction <add>, %6, %cst_13 [0] : vector<64x64xf32> to vector<64xf32>
    %13 = vector.shape_cast %12 : vector<64xf32> to vector<1x64xf32>
    %cst_14 = arith.constant 1.562500e-02 : f32
    %14 = vector.broadcast %cst_14 : f32 to vector<1x64xf32>
    %15 = arith.mulf %13, %14 : vector<1x64xf32>
    %16 = arith.mulf %6, %6 : vector<64x64xf32>
    %cst_15 = arith.constant dense<0.000000e+00> : vector<64xf32>
    %17 = vector.multi_reduction <add>, %16, %cst_15 [0] : vector<64x64xf32> to vector<64xf32>
    %18 = vector.shape_cast %17 : vector<64xf32> to vector<1x64xf32>
    %cst_16 = arith.constant 1.562500e-02 : f32
    %19 = vector.broadcast %cst_16 : f32 to vector<1x64xf32>
    %20 = arith.mulf %18, %19 : vector<1x64xf32>
    %c0_17 = arith.constant 0 : index
    %c0_18 = arith.constant 0 : index
    %21 = vector.load %arg5[%c0_17, %c0_18] : memref<64x64xf32, #tpu.memory_space<vmem>>, vector<64x64xf32>
    %cst_19 = arith.constant dense<0.000000e+00> : vector<1x64xf32>
    %22 = tpu.matmul %15, %21, %cst_19 {dimension_numbers = #tpu.dot_dimension_numbers<[1], [0], [0], [1], [0, 0, 1, 1], [], []>} : vector<1x64xf32>, vector<64x64xf32>, vector<1x64xf32> -> vector<1x64xf32>
    %c0_20 = arith.constant 0 : index
    %c0_21 = arith.constant 0 : index
    %23 = vector.load %arg5[%c0_20, %c0_21] : memref<64x64xf32, #tpu.memory_space<vmem>>, vector<64x64xf32>
    %cst_22 = arith.constant dense<0.000000e+00> : vector<1x64xf32>
    %24 = tpu.matmul %20, %23, %cst_22 {dimension_numbers = #tpu.dot_dimension_numbers<[1], [0], [0], [1], [0, 0, 1, 1], [], []>} : vector<1x64xf32>, vector<64x64xf32>, vector<1x64xf32> -> vector<1x64xf32>
    %25 = arith.mulf %22, %22 : vector<1x64xf32>
    %26 = arith.subf %24, %25 : vector<1x64xf32>
    %c0_23 = arith.constant 0 : index
    %c0_24 = arith.constant 0 : index
    %27 = vector.load %arg3[%c0_23, %c0_24] : memref<1x64xf32, #tpu.memory_space<vmem>>, vector<1x64xf32>
    %cst_25 = arith.constant 9.99999997E-7 : f32
    %28 = vector.broadcast %cst_25 : f32 to vector<1x64xf32>
    %29 = arith.addf %26, %28 : vector<1x64xf32>
    %30 = math.rsqrt %29 : vector<1x64xf32>
    %31 = arith.mulf %27, %30 : vector<1x64xf32>
    %c0_26 = arith.constant 0 : index
    %c0_27 = arith.constant 0 : index
    %32 = vector.load %arg4[%c0_26, %c0_27] : memref<1x64xf32, #tpu.memory_space<vmem>>, vector<1x64xf32>
    %33 = arith.mulf %22, %31 : vector<1x64xf32>
    %34 = arith.subf %32, %33 : vector<1x64xf32>
    %35 = vector.broadcast %31 : vector<1x64xf32> to vector<64x64xf32>
    %36 = arith.mulf %6, %35 : vector<64x64xf32>
    %37 = vector.broadcast %34 : vector<1x64xf32> to vector<64x64xf32>
    %38 = arith.addf %36, %37 : vector<64x64xf32>
    %39 = arith.negf %38 : vector<64x64xf32>
    %40 = math.exp %39 : vector<64x64xf32>
    %cst_28 = arith.constant 1.000000e+00 : f32
    %41 = vector.broadcast %cst_28 : f32 to vector<64x64xf32>
    %42 = arith.addf %41, %40 : vector<64x64xf32>
    %43 = arith.divf %41, %42 : vector<64x64xf32>
    %44 = arith.mulf %38, %43 : vector<64x64xf32>
    %45 = vector.shape_cast %44 : vector<64x64xf32> to vector<8x8x64xf32>
    %c1 = arith.constant 1 : index
    %c1_29 = arith.constant 1 : index
    %c0_30 = arith.constant 0 : index
    %46 = vector.load %arg18[%c1, %c1_29, %c0_30] : memref<10x10x64xf32, #tpu.memory_space<vmem>>, vector<8x8x64xf32>
    tpu.vector_store %arg18[%c1, %c1_29, %c0_30], %45 {strides = array<i32>} : memref<10x10x64xf32, #tpu.memory_space<vmem>>, vector<8x8x64xf32>,
    %c0_31 = arith.constant 0 : index
    %c0_32 = arith.constant 0 : index
    %c0_33 = arith.constant 0 : index
    %47 = vector.load %arg18[%c0_31, %c0_32, %c0_33] : memref<10x10x64xf32, #tpu.memory_space<vmem>>, vector<8x8x64xf32>
    %c0_34 = arith.constant 0 : index
    %c1_35 = arith.constant 1 : index
    %c0_36 = arith.constant 0 : index
    %48 = vector.load %arg18[%c0_34, %c1_35, %c0_36] : memref<10x10x64xf32, #tpu.memory_space<vmem>>, vector<8x8x64xf32>
    %c0_37 = arith.constant 0 : index
    %c2 = arith.constant 2 : index
    %c0_38 = arith.constant 0 : index
    %49 = vector.load %arg18[%c0_37, %c2, %c0_38] : memref<10x10x64xf32, #tpu.memory_space<vmem>>, vector<8x8x64xf32>
    %c1_39 = arith.constant 1 : index
    %c0_40 = arith.constant 0 : index
    %c0_41 = arith.constant 0 : index
    %50 = vector.load %arg18[%c1_39, %c0_40, %c0_41] : memref<10x10x64xf32, #tpu.memory_space<vmem>>, vector<8x8x64xf32>
    %c1_42 = arith.constant 1 : index
    %c1_43 = arith.constant 1 : index
    %c0_44 = arith.constant 0 : index
    %51 = vector.load %arg18[%c1_42, %c1_43, %c0_44] : memref<10x10x64xf32, #tpu.memory_space<vmem>>, vector<8x8x64xf32>
    %c1_45 = arith.constant 1 : index
    %c2_46 = arith.constant 2 : index
    %c0_47 = arith.constant 0 : index
    %52 = vector.load %arg18[%c1_45, %c2_46, %c0_47] : memref<10x10x64xf32, #tpu.memory_space<vmem>>, vector<8x8x64xf32>
    %c2_48 = arith.constant 2 : index
    %c0_49 = arith.constant 0 : index
    %c0_50 = arith.constant 0 : index
    %53 = vector.load %arg18[%c2_48, %c0_49, %c0_50] : memref<10x10x64xf32, #tpu.memory_space<vmem>>, vector<8x8x64xf32>
    %c2_51 = arith.constant 2 : index
    %c1_52 = arith.constant 1 : index
    %c0_53 = arith.constant 0 : index
    %54 = vector.load %arg18[%c2_51, %c1_52, %c0_53] : memref<10x10x64xf32, #tpu.memory_space<vmem>>, vector<8x8x64xf32>
    %c2_54 = arith.constant 2 : index
    %c2_55 = arith.constant 2 : index
    %c0_56 = arith.constant 0 : index
    %55 = vector.load %arg18[%c2_54, %c2_55, %c0_56] : memref<10x10x64xf32, #tpu.memory_space<vmem>>, vector<8x8x64xf32>
    %56 = tpu.concatenate %47, %48, %49, %50, %51, %52, %53, %54, %55 in 2 : vector<8x8x64xf32>, vector<8x8x64xf32>, vector<8x8x64xf32>, vector<8x8x64xf32>, vector<8x8x64xf32>, vector<8x8x64xf32>, vector<8x8x64xf32>, vector<8x8x64xf32>, vector<8x8x64xf32> -> vector<8x8x576xf32>
    %57 = vector.shape_cast %56 : vector<8x8x576xf32> to vector<64x576xf32>
    %c0_57 = arith.constant 0 : index
    %c0_58 = arith.constant 0 : index
    %58 = vector.load %arg6[%c0_57, %c0_58] : memref<576x32xf32, #tpu.memory_space<vmem>>, vector<576x32xf32>
    %cst_59 = arith.constant dense<0.000000e+00> : vector<64x32xf32>
    %59 = tpu.matmul %57, %58, %cst_59 {dimension_numbers = #tpu.dot_dimension_numbers<[1], [0], [0], [1], [0, 0, 1, 1], [], []>} : vector<64x576xf32>, vector<576x32xf32>, vector<64x32xf32> -> vector<64x32xf32>
    %c0_60 = arith.constant 0 : index
    %c0_61 = arith.constant 0 : index
    %60 = vector.load %arg7[%c0_60, %c0_61] : memref<1x32xf32, #tpu.memory_space<vmem>>, vector<1x32xf32>
    %61 = vector.broadcast %60 : vector<1x32xf32> to vector<64x32xf32>
    %62 = arith.addf %59, %61 : vector<64x32xf32>
    %cst_62 = arith.constant dense<0.000000e+00> : vector<32xf32>
    %63 = vector.multi_reduction <add>, %62, %cst_62 [0] : vector<64x32xf32> to vector<32xf32>
    %64 = vector.shape_cast %63 : vector<32xf32> to vector<1x32xf32>
    %cst_63 = arith.constant 1.562500e-02 : f32
    %65 = vector.broadcast %cst_63 : f32 to vector<1x32xf32>
    %66 = arith.mulf %64, %65 : vector<1x32xf32>
    %67 = arith.mulf %62, %62 : vector<64x32xf32>
    %cst_64 = arith.constant dense<0.000000e+00> : vector<32xf32>
    %68 = vector.multi_reduction <add>, %67, %cst_64 [0] : vector<64x32xf32> to vector<32xf32>
    %69 = vector.shape_cast %68 : vector<32xf32> to vector<1x32xf32>
    %cst_65 = arith.constant 1.562500e-02 : f32
    %70 = vector.broadcast %cst_65 : f32 to vector<1x32xf32>
    %71 = arith.mulf %69, %70 : vector<1x32xf32>
    %c0_66 = arith.constant 0 : index
    %c0_67 = arith.constant 0 : index
    %72 = vector.load %arg10[%c0_66, %c0_67] : memref<32x32xf32, #tpu.memory_space<vmem>>, vector<32x32xf32>
    %cst_68 = arith.constant dense<0.000000e+00> : vector<1x32xf32>
    %73 = tpu.matmul %66, %72, %cst_68 {dimension_numbers = #tpu.dot_dimension_numbers<[1], [0], [0], [1], [0, 0, 1, 1], [], []>} : vector<1x32xf32>, vector<32x32xf32>, vector<1x32xf32> -> vector<1x32xf32>
    %c0_69 = arith.constant 0 : index
    %c0_70 = arith.constant 0 : index
    %74 = vector.load %arg10[%c0_69, %c0_70] : memref<32x32xf32, #tpu.memory_space<vmem>>, vector<32x32xf32>
    %cst_71 = arith.constant dense<0.000000e+00> : vector<1x32xf32>
    %75 = tpu.matmul %71, %74, %cst_71 {dimension_numbers = #tpu.dot_dimension_numbers<[1], [0], [0], [1], [0, 0, 1, 1], [], []>} : vector<1x32xf32>, vector<32x32xf32>, vector<1x32xf32> -> vector<1x32xf32>
    %76 = arith.mulf %73, %73 : vector<1x32xf32>
    %77 = arith.subf %75, %76 : vector<1x32xf32>
    %c0_72 = arith.constant 0 : index
    %c0_73 = arith.constant 0 : index
    %78 = vector.load %arg8[%c0_72, %c0_73] : memref<1x32xf32, #tpu.memory_space<vmem>>, vector<1x32xf32>
    %cst_74 = arith.constant 9.99999997E-7 : f32
    %79 = vector.broadcast %cst_74 : f32 to vector<1x32xf32>
    %80 = arith.addf %77, %79 : vector<1x32xf32>
    %81 = math.rsqrt %80 : vector<1x32xf32>
    %82 = arith.mulf %78, %81 : vector<1x32xf32>
    %c0_75 = arith.constant 0 : index
    %c0_76 = arith.constant 0 : index
    %83 = vector.load %arg9[%c0_75, %c0_76] : memref<1x32xf32, #tpu.memory_space<vmem>>, vector<1x32xf32>
    %84 = arith.mulf %73, %82 : vector<1x32xf32>
    %85 = arith.subf %83, %84 : vector<1x32xf32>
    %86 = vector.broadcast %82 : vector<1x32xf32> to vector<64x32xf32>
    %87 = arith.mulf %62, %86 : vector<64x32xf32>
    %88 = vector.broadcast %85 : vector<1x32xf32> to vector<64x32xf32>
    %89 = arith.addf %87, %88 : vector<64x32xf32>
    %90 = arith.negf %89 : vector<64x32xf32>
    %91 = math.exp %90 : vector<64x32xf32>
    %cst_77 = arith.constant 1.000000e+00 : f32
    %92 = vector.broadcast %cst_77 : f32 to vector<64x32xf32>
    %93 = arith.addf %92, %91 : vector<64x32xf32>
    %94 = arith.divf %92, %93 : vector<64x32xf32>
    %95 = arith.mulf %89, %94 : vector<64x32xf32>
    %96 = vector.shape_cast %95 : vector<64x32xf32> to vector<8x8x32xf32>
    %c1_78 = arith.constant 1 : index
    %c1_79 = arith.constant 1 : index
    %c0_80 = arith.constant 0 : index
    %97 = vector.load %arg18[%c1_78, %c1_79, %c0_80] : memref<10x10x64xf32, #tpu.memory_space<vmem>>, vector<8x8x32xf32>
    tpu.vector_store %arg18[%c1_78, %c1_79, %c0_80], %96 {strides = array<i32>} : memref<10x10x64xf32, #tpu.memory_space<vmem>>, vector<8x8x32xf32>,
    %c0_81 = arith.constant 0 : index
    %c0_82 = arith.constant 0 : index
    %c0_83 = arith.constant 0 : index
    %98 = vector.load %arg18[%c0_81, %c0_82, %c0_83] : memref<10x10x64xf32, #tpu.memory_space<vmem>>, vector<8x8x32xf32>
    %c0_84 = arith.constant 0 : index
    %c1_85 = arith.constant 1 : index
    %c0_86 = arith.constant 0 : index
    %99 = vector.load %arg18[%c0_84, %c1_85, %c0_86] : memref<10x10x64xf32, #tpu.memory_space<vmem>>, vector<8x8x32xf32>
    %c0_87 = arith.constant 0 : index
    %c2_88 = arith.constant 2 : index
    %c0_89 = arith.constant 0 : index
    %100 = vector.load %arg18[%c0_87, %c2_88, %c0_89] : memref<10x10x64xf32, #tpu.memory_space<vmem>>, vector<8x8x32xf32>
    %c1_90 = arith.constant 1 : index
    %c0_91 = arith.constant 0 : index
    %c0_92 = arith.constant 0 : index
    %101 = vector.load %arg18[%c1_90, %c0_91, %c0_92] : memref<10x10x64xf32, #tpu.memory_space<vmem>>, vector<8x8x32xf32>
    %c1_93 = arith.constant 1 : index
    %c1_94 = arith.constant 1 : index
    %c0_95 = arith.constant 0 : index
    %102 = vector.load %arg18[%c1_93, %c1_94, %c0_95] : memref<10x10x64xf32, #tpu.memory_space<vmem>>, vector<8x8x32xf32>
    %c1_96 = arith.constant 1 : index
    %c2_97 = arith.constant 2 : index
    %c0_98 = arith.constant 0 : index
    %103 = vector.load %arg18[%c1_96, %c2_97, %c0_98] : memref<10x10x64xf32, #tpu.memory_space<vmem>>, vector<8x8x32xf32>
    %c2_99 = arith.constant 2 : index
    %c0_100 = arith.constant 0 : index
    %c0_101 = arith.constant 0 : index
    %104 = vector.load %arg18[%c2_99, %c0_100, %c0_101] : memref<10x10x64xf32, #tpu.memory_space<vmem>>, vector<8x8x32xf32>
    %c2_102 = arith.constant 2 : index
    %c1_103 = arith.constant 1 : index
    %c0_104 = arith.constant 0 : index
    %105 = vector.load %arg18[%c2_102, %c1_103, %c0_104] : memref<10x10x64xf32, #tpu.memory_space<vmem>>, vector<8x8x32xf32>
    %c2_105 = arith.constant 2 : index
    %c2_106 = arith.constant 2 : index
    %c0_107 = arith.constant 0 : index
    %106 = vector.load %arg18[%c2_105, %c2_106, %c0_107] : memref<10x10x64xf32, #tpu.memory_space<vmem>>, vector<8x8x32xf32>
    %107 = tpu.concatenate %98, %99, %100, %101, %102, %103, %104, %105, %106 in 2 : vector<8x8x32xf32>, vector<8x8x32xf32>, vector<8x8x32xf32>, vector<8x8x32xf32>, vector<8x8x32xf32>, vector<8x8x32xf32>, vector<8x8x32xf32>, vector<8x8x32xf32>, vector<8x8x32xf32> -> vector<8x8x288xf32>
    %108 = vector.shape_cast %107 : vector<8x8x288xf32> to vector<64x288xf32>
    %c0_108 = arith.constant 0 : index
    %c0_109 = arith.constant 0 : index
    %109 = vector.load %arg11[%c0_108, %c0_109] : memref<288x32xf32, #tpu.memory_space<vmem>>, vector<288x32xf32>
    %cst_110 = arith.constant dense<0.000000e+00> : vector<64x32xf32>
    %110 = tpu.matmul %108, %109, %cst_110 {dimension_numbers = #tpu.dot_dimension_numbers<[1], [0], [0], [1], [0, 0, 1, 1], [], []>} : vector<64x288xf32>, vector<288x32xf32>, vector<64x32xf32> -> vector<64x32xf32>
    %c0_111 = arith.constant 0 : index
    %c0_112 = arith.constant 0 : index
    %111 = vector.load %arg12[%c0_111, %c0_112] : memref<1x32xf32, #tpu.memory_space<vmem>>, vector<1x32xf32>
    %112 = vector.broadcast %111 : vector<1x32xf32> to vector<64x32xf32>
    %113 = arith.addf %110, %112 : vector<64x32xf32>
    %114 = arith.addf %113, %11 : vector<64x32xf32>
    %115 = vector.shape_cast %114 : vector<64x32xf32> to vector<8x8x32xf32>
    %c1_113 = arith.constant 1 : index
    %c1_114 = arith.constant 1 : index
    %c0_115 = arith.constant 0 : index
    %116 = vector.load %arg18[%c1_113, %c1_114, %c0_115] : memref<10x10x64xf32, #tpu.memory_space<vmem>>, vector<8x8x32xf32>
    tpu.vector_store %arg18[%c1_113, %c1_114, %c0_115], %115 {strides = array<i32>} : memref<10x10x64xf32, #tpu.memory_space<vmem>>, vector<8x8x32xf32>,
    %c0_116 = arith.constant 0 : index
    %c0_117 = arith.constant 0 : index
    %c0_118 = arith.constant 0 : index
    %117 = vector.load %arg18[%c0_116, %c0_117, %c0_118] : memref<10x10x64xf32, #tpu.memory_space<vmem>>, vector<8x8x32xf32>
    %c0_119 = arith.constant 0 : index
    %c1_120 = arith.constant 1 : index
    %c0_121 = arith.constant 0 : index
    %118 = vector.load %arg18[%c0_119, %c1_120, %c0_121] : memref<10x10x64xf32, #tpu.memory_space<vmem>>, vector<8x8x32xf32>
    %c0_122 = arith.constant 0 : index
    %c2_123 = arith.constant 2 : index
    %c0_124 = arith.constant 0 : index
    %119 = vector.load %arg18[%c0_122, %c2_123, %c0_124] : memref<10x10x64xf32, #tpu.memory_space<vmem>>, vector<8x8x32xf32>
    %c1_125 = arith.constant 1 : index
    %c0_126 = arith.constant 0 : index
    %c0_127 = arith.constant 0 : index
    %120 = vector.load %arg18[%c1_125, %c0_126, %c0_127] : memref<10x10x64xf32, #tpu.memory_space<vmem>>, vector<8x8x32xf32>
    %c1_128 = arith.constant 1 : index
    %c1_129 = arith.constant 1 : index
    %c0_130 = arith.constant 0 : index
    %121 = vector.load %arg18[%c1_128, %c1_129, %c0_130] : memref<10x10x64xf32, #tpu.memory_space<vmem>>, vector<8x8x32xf32>
    %c1_131 = arith.constant 1 : index
    %c2_132 = arith.constant 2 : index
    %c0_133 = arith.constant 0 : index
    %122 = vector.load %arg18[%c1_131, %c2_132, %c0_133] : memref<10x10x64xf32, #tpu.memory_space<vmem>>, vector<8x8x32xf32>
    %c2_134 = arith.constant 2 : index
    %c0_135 = arith.constant 0 : index
    %c0_136 = arith.constant 0 : index
    %123 = vector.load %arg18[%c2_134, %c0_135, %c0_136] : memref<10x10x64xf32, #tpu.memory_space<vmem>>, vector<8x8x32xf32>
    %c2_137 = arith.constant 2 : index
    %c1_138 = arith.constant 1 : index
    %c0_139 = arith.constant 0 : index
    %124 = vector.load %arg18[%c2_137, %c1_138, %c0_139] : memref<10x10x64xf32, #tpu.memory_space<vmem>>, vector<8x8x32xf32>
    %c2_140 = arith.constant 2 : index
    %c2_141 = arith.constant 2 : index
    %c0_142 = arith.constant 0 : index
    %125 = vector.load %arg18[%c2_140, %c2_141, %c0_142] : memref<10x10x64xf32, #tpu.memory_space<vmem>>, vector<8x8x32xf32>
    %126 = tpu.concatenate %117, %118, %119, %120, %121, %122, %123, %124, %125 in 2 : vector<8x8x32xf32>, vector<8x8x32xf32>, vector<8x8x32xf32>, vector<8x8x32xf32>, vector<8x8x32xf32>, vector<8x8x32xf32>, vector<8x8x32xf32>, vector<8x8x32xf32>, vector<8x8x32xf32> -> vector<8x8x288xf32>
    %127 = vector.shape_cast %126 : vector<8x8x288xf32> to vector<64x288xf32>
    %c0_143 = arith.constant 0 : index
    %c0_144 = arith.constant 0 : index
    %128 = vector.load %arg15[%c0_143, %c0_144] : memref<288x32xf32, #tpu.memory_space<vmem>>, vector<288x32xf32>
    %cst_145 = arith.constant dense<0.000000e+00> : vector<64x32xf32>
    %129 = tpu.matmul %127, %128, %cst_145 {dimension_numbers = #tpu.dot_dimension_numbers<[1], [0], [0], [1], [0, 0, 1, 1], [], []>} : vector<64x288xf32>, vector<288x32xf32>, vector<64x32xf32> -> vector<64x32xf32>
    %c0_146 = arith.constant 0 : index
    %c0_147 = arith.constant 0 : index
    %130 = vector.load %arg16[%c0_146, %c0_147] : memref<1x32xf32, #tpu.memory_space<vmem>>, vector<1x32xf32>
    %131 = vector.broadcast %130 : vector<1x32xf32> to vector<64x32xf32>
    %132 = arith.addf %129, %131 : vector<64x32xf32>
    %c0_148 = arith.constant 0 : index
    %c0_149 = arith.constant 0 : index
    %c0_150 = arith.constant 0 : index
    %133 = vector.load %arg17[%c0_148, %c0_149, %c0_150] : memref<1x64x32xf32, #tpu.memory_space<vmem>>, vector<1x64x32xf32>
    %134 = vector.shape_cast %133 : vector<1x64x32xf32> to vector<64x32xf32>
    %135 = vector.shape_cast %132 : vector<64x32xf32> to vector<1x64x32xf32>
    tpu.vector_store %arg17[%c0_148, %c0_149, %c0_150], %135 {strides = array<i32>} : memref<1x64x32xf32, #tpu.memory_space<vmem>>, vector<1x64x32xf32>,
    return
  }
  func.func @transform_0(%arg0: i32) -> (i32, i32, i32) {
    %c0_i32 = arith.constant 0 : i32
    %c0_i32_0 = arith.constant 0 : i32
    %c0_i32_1 = arith.constant 0 : i32
    return %arg0, %c0_i32, %c0_i32_0 : i32, i32, i32
  }
  func.func @transform_1(%arg0: i32) -> (i32, i32, i32) {
    %c0_i32 = arith.constant 0 : i32
    %c0_i32_0 = arith.constant 0 : i32
    %c0_i32_1 = arith.constant 0 : i32
    return %arg0, %c0_i32, %c0_i32_0 : i32, i32, i32
  }
  func.func @transform_2(%arg0: i32) -> (i32, i32) {
    %c0_i32 = arith.constant 0 : i32
    %c0_i32_0 = arith.constant 0 : i32
    %c0_i32_1 = arith.constant 0 : i32
    return %c0_i32, %c0_i32_0 : i32, i32
  }
  func.func @transform_3(%arg0: i32) -> (i32, i32) {
    %c0_i32 = arith.constant 0 : i32
    %c0_i32_0 = arith.constant 0 : i32
    %c0_i32_1 = arith.constant 0 : i32
    return %c0_i32, %c0_i32_0 : i32, i32
  }
  func.func @transform_4(%arg0: i32) -> (i32, i32) {
    %c0_i32 = arith.constant 0 : i32
    %c0_i32_0 = arith.constant 0 : i32
    %c0_i32_1 = arith.constant 0 : i32
    return %c0_i32, %c0_i32_0 : i32, i32
  }
  func.func @transform_5(%arg0: i32) -> (i32, i32) {
    %c0_i32 = arith.constant 0 : i32
    %c0_i32_0 = arith.constant 0 : i32
    %c0_i32_1 = arith.constant 0 : i32
    return %c0_i32, %c0_i32_0 : i32, i32
  }
  func.func @transform_6(%arg0: i32) -> (i32, i32) {
    %c0_i32 = arith.constant 0 : i32
    %c0_i32_0 = arith.constant 0 : i32
    %c0_i32_1 = arith.constant 0 : i32
    return %c0_i32, %c0_i32_0 : i32, i32
  }
  func.func @transform_7(%arg0: i32) -> (i32, i32) {
    %c0_i32 = arith.constant 0 : i32
    %c0_i32_0 = arith.constant 0 : i32
    %c0_i32_1 = arith.constant 0 : i32
    return %c0_i32, %c0_i32_0 : i32, i32
  }
  func.func @transform_8(%arg0: i32) -> (i32, i32) {
    %c0_i32 = arith.constant 0 : i32
    %c0_i32_0 = arith.constant 0 : i32
    %c0_i32_1 = arith.constant 0 : i32
    return %c0_i32, %c0_i32_0 : i32, i32
  }
  func.func @transform_9(%arg0: i32) -> (i32, i32) {
    %c0_i32 = arith.constant 0 : i32
    %c0_i32_0 = arith.constant 0 : i32
    %c0_i32_1 = arith.constant 0 : i32
    return %c0_i32, %c0_i32_0 : i32, i32
  }
  func.func @transform_10(%arg0: i32) -> (i32, i32) {
    %c0_i32 = arith.constant 0 : i32
    %c0_i32_0 = arith.constant 0 : i32
    %c0_i32_1 = arith.constant 0 : i32
    return %c0_i32, %c0_i32_0 : i32, i32
  }
  func.func @transform_11(%arg0: i32) -> (i32, i32) {
    %c0_i32 = arith.constant 0 : i32
    %c0_i32_0 = arith.constant 0 : i32
    %c0_i32_1 = arith.constant 0 : i32
    return %c0_i32, %c0_i32_0 : i32, i32
  }
  func.func @transform_12(%arg0: i32) -> (i32, i32) {
    %c0_i32 = arith.constant 0 : i32
    %c0_i32_0 = arith.constant 0 : i32
    %c0_i32_1 = arith.constant 0 : i32
    return %c0_i32, %c0_i32_0 : i32, i32
  }
  func.func @transform_13(%arg0: i32) -> (i32, i32) {
    %c0_i32 = arith.constant 0 : i32
    %c0_i32_0 = arith.constant 0 : i32
    %c0_i32_1 = arith.constant 0 : i32
    return %c0_i32, %c0_i32_0 : i32, i32
  }
  func.func @transform_14(%arg0: i32) -> (i32, i32) {
    %c0_i32 = arith.constant 0 : i32
    %c0_i32_0 = arith.constant 0 : i32
    %c0_i32_1 = arith.constant 0 : i32
    return %c0_i32, %c0_i32_0 : i32, i32
  }
  func.func @transform_15(%arg0: i32) -> (i32, i32) {
    %c0_i32 = arith.constant 0 : i32
    %c0_i32_0 = arith.constant 0 : i32
    %c0_i32_1 = arith.constant 0 : i32
    return %c0_i32, %c0_i32_0 : i32, i32
  }
  func.func @transform_16(%arg0: i32) -> (i32, i32, i32) {
    %c0_i32 = arith.constant 0 : i32
    %c0_i32_0 = arith.constant 0 : i32
    %c0_i32_1 = arith.constant 0 : i32
    return %arg0, %c0_i32, %c0_i32_0 : i32, i32, i32
  }
}

</mosaic_0001>

<bundles_post_ra>
// kernel: up_block_forward.1
= control target key start
LH: loop header
LB: loop body
LE: loop exit
PB: predicated region body
PF: predicated region fallthrough
CT: control target
= control target key end

     0   :  { %s5332_s0 = inlined_call_operand.vmem [shape: f32[2,64,32], index: 0, kind: input, shape index: {}]   ;;  %s5333_s1 = inlined_call_operand.vmem [shape: f32[2,64,32], index: 1, kind: input, shape index: {}]   ;;  %s5334_s2 = inlined_call_operand.vmem [shape: f32[1,64], index: 2, kind: input, shape index: {}]   ;;  %s5335_s3 = inlined_call_operand.vmem [shape: f32[1,64], index: 3, kind: input, shape index: {}]   ;;  %s5336_s4 = inlined_call_operand.vmem [shape: f32[64,64], index: 4, kind: input, shape index: {}]   ;;  %s5337_s5 = inlined_call_operand.vmem [shape: f32[576,32], index: 5, kind: input, shape index: {}]   ;;  %s5338_s6 = inlined_call_operand.vmem [shape: f32[1,32], index: 6, kind: input, shape index: {}]   ;;  %s5339_s7 = inlined_call_operand.vmem [shape: f32[1,32], index: 7, kind: input, shape index: {}]   ;;  %s5340_s8 = inlined_call_operand.vmem [shape: f32[1,32], index: 8, kind: input, shape index: {}]   ;;  %s5341_s9 = inlined_call_operand.vmem [shape: f32[32,32], index: 9, kind: input, shape index: {}]   ;;  %s5342_s10 = inlined_call_operand.vmem [shape: f32[288,32], index: 10, kind: input, shape index: {}]   ;;  %s5343_s11 = inlined_call_operand.vmem [shape: f32[1,32], index: 11, kind: input, shape index: {}]   ;;  %s5344_s12 = inlined_call_operand.vmem [shape: f32[64,32], index: 12, kind: input, shape index: {}]   ;;  %s5345_s13 = inlined_call_operand.vmem [shape: f32[1,32], index: 13, kind: input, shape index: {}]   ;;  %s5346_s14 = inlined_call_operand.vmem [shape: f32[288,32], index: 14, kind: input, shape index: {}]   ;;  %s5347_s15 = inlined_call_operand.vmem [shape: f32[1,32], index: 15, kind: input, shape index: {}]   ;;  %s5348_s16 = inlined_call_operand.hbm [shape: f32[2,64,32], index: 16, kind: output, shape index: {}]  }
   0x1   :  { %5358 = sst [smem:[#allocation10_spill]] %s5332_s0 }
   0x2   :  { %5359 = sst [smem:[#allocation11_spill]] %s5333_s1 }
   0x3   :  { %5360 = sst [smem:[#allocation12_spill]] %s5344_s12 }
   0x4   :  { %21 = vsyncpa [#allocation4], 0 }
   0x5   :  { %23 = vsyncpa [#allocation4 + $0x1], 0  ;;  %s3621_s21 = smov 0   ;;  %s3623_s22 = smov 0  }
   0x6   :  { %s3625_s23 = smov 0   ;;  %s3627_s24 = smov 0  }
   0x7 LB: > { %5361 = sst [smem:[#allocation6_spill]] %s3524_s23  ;;  %s3642_s25 = sadd.s32 4294967295, %s3528_s24   ;;  %s3528_s24 = sphi %s3627_s24, %s5483_s24   ;;  %s3524_s23 = sphi %s3625_s23, %s5485_s23   ;;  %s3520_s22 = sphi %s3623_s22, %s5487_s22   ;;  %s3516_s21 = sphi %s3621_s21, %s5486_s21  }
   0x8   : > { %s2972_s26 = sadd.s32 4294967294, %s3528_s24   ;;  %s3646_s27 = sadd.s32 1, %s3528_s24  }
   0x9   : > { %5362 = sst [smem:[#allocation7_spill]] %s3646_s27  ;;  %s382_s28 = sadd.s32 1, %s3524_s23 }
   0xa   : > { %s379_s29 = ssub.s32 %s3528_s24, %s3646_s27  ;;  %p392_p0 = scmp.ne.s32.totalorder %s3524_s23, %s3520_s22 }
   0xb   : > { %p380_p1 = scmp.eq.s32.totalorder %s379_s29, 0  ;;  %p393_p2 = scmp.eq.s32.totalorder %s3642_s25, 1 }
   0xc   : > { %p398_p3 = scmp.ne.s32.totalorder %s3520_s22, %s3516_s21  ;;  %p399_p4 = scmp.eq.s32.totalorder %s2972_s26, 1 }
   0xd   : > { %s3657_s30 = scalar_select %p380_p1, %s3524_s23, %s382_s28  }
   0xe   : > { %p3659_p5 = por %p393_p2, %p392_p0  ;;  %p3663_p6 = por %p399_p4, %p398_p3 }
   0xf   : > { %5363 = sst [smem:[#allocation8_spill]] %s3657_s30  ;;  %p2975_p7 = scmp.ge.s32.totalorder %s3528_s24, 1 }
  0x10   : > { %s5365_s17 = scalar_select %p3663_p6, 1, 0 }
  0x11   : > { %p475_p8 = scmp.lt.s32.totalorder %s3528_s24, 3 }
  0x12   : > { %5366 = sst [smem:[#allocation9_spill]] %s5365_s17 }
  0x13   : > { %p476_p9 = pnand %p2975_p7, %p475_p8 }
  0x14   : > { %p530_p10 = scmp.lt.s32.totalorder (!%p476_p9), %s3642_s25, 1  ;;  %s5367_s12 = sld [smem:[#allocation12_spill]] (!%p476_p9) }
  0x15   : > { %479 = sbr.rel (%p476_p9) target bundleno = 1574 (0x626), region = 84  ;;  %s5368_s1 = sld [smem:[#allocation11_spill]] (!%p476_p9) }
  0x16   : > { %s5353_s30 = smov (!%p476_p9), 32  }
  0x1a   : > { %v626_v0 = vld [vmem:[%s5367_s12 + $0x38] sm:$0xff]  ;;  %v625_v1 = vld [vmem:[%s5367_s12 + $0x30] sm:$0xff]  ;;  %s3677_s28 = scalar_select %p530_p10, %s3642_s25, 1  ;;  %v624_v2 = vld [vmem:[%s5367_s12 + $0x28] sm:$0xff]  ;;  %vm5355_vm0 = vcmask 261120   ;;  %vm540_vm1 = vcmask 523264  }
  0x1b   : > { %663 = vmatpush.msra.mxu0 %v626_v0  ;;  %3041 = vmatpush.msra.mxu1 %v626_v0  ;;  %v623_v3 = vld [vmem:[%s5367_s12 + $0x20] sm:$0xff]  ;;  %v622_v6 = vld [vmem:[%s5367_s12 + $0x18] sm:$0xff]  ;;  %v621_v8 = vld [vmem:[%s5367_s12 + $0x10] sm:$0xff]  ;;  %vm542_vm2 = vcmask 517120  }
  0x1c   : > { %s3038_s23 = sshll.u32 %s3677_s28, 6  ;;  %v620_v9 = vld [vmem:[%s5367_s12 + $0x8] sm:$0xff]  ;;  %v619_v15 = vld [vmem:[%s5367_s12] sm:$0xff]  ;;  %v755_v16 = vld [vmem:[%s5336_s4 + $0x38] sm:$0xff]  ;;  %s5421_s12 = smov 32  }
  0x1d   : > { %664 = vmatpush.msra.mxu0 %v625_v1  ;;  %3042 = vmatpush.msra.mxu1 %v625_v1  ;;  %s539_s27 = scalar_lea.vmem %s5368_s1, %s3038_s23  ;;  %v754_v17 = vld [vmem:[%s5336_s4 + $0x30] sm:$0xff]  ;;  %s5369_s1 = sld [smem:[#allocation10_spill]]  ;;  %v753_v19 = vld [vmem:[%s5336_s4 + $0x28] sm:$0xff]  ;;  %v752_v20 = vld [vmem:[%s5336_s4 + $0x20] sm:$0xff] }
  0x1e   : > { %v572_v4 = vld [vmem:[%s539_s27 + $0x10] sm:$0xff]  ;;  %v570_v5 = vld [vmem:[%s539_s27] sm:$0xff]  ;;  %v573_v7 = vld [vmem:[%s539_s27 + $0x18] sm:$0xff]  ;;  %790 = vmatpush.msra.mxu3 %v755_v16  ;;  %s3040_s28 = sshll.u32 %s3642_s25, 6 }
  0x1f   : > { %665 = vmatpush.msra.mxu0 %v624_v2  ;;  %3043 = vmatpush.msra.mxu1 %v624_v2  ;;  %v574_v10 = vld [vmem:[%s539_s27 + $0x20] sm:$0xff]  ;;  %v571_v11 = vld [vmem:[%s539_s27 + $0x8] sm:$0xff]  ;;  %v576_v13 = vld [vmem:[%s539_s27 + $0x30] sm:$0xff] }
  0x20   : > { %590 = vrot.lane.b32.xlu1 %v572_v4, %s5353_s30  ;;  %586 = vrot.lane.b32.xlu0 %v570_v5, %s5353_s30  ;;  %v575_v12 = vld [vmem:[%s539_s27 + $0x28] sm:$0xff]  ;;  %v577_v14 = vld [vmem:[%s539_s27 + $0x38] sm:$0xff] }
  0x21   : > { %666 = vmatpush.msra.mxu0 %v623_v3  ;;  %3044 = vmatpush.msra.mxu1 %v623_v3  ;;  %v751_v22 = vld [vmem:[%s5336_s4 + $0x18] sm:$0xff]  ;;  %v750_v26 = vld [vmem:[%s5336_s4 + $0x10] sm:$0xff]  ;;  %v749_v27 = vld [vmem:[%s5336_s4 + $0x8] sm:$0xff] }
  0x22   : > { %592 = vrot.lane.b32.xlu2 %v573_v7, %s5353_s30  ;;  %791 = vmatpush.msra.mxu3 %v754_v17  ;;  %v748_v30 = vld [vmem:[%s5336_s4] sm:$0xff] }
  0x23   : > { %667 = vmatpush.msra.mxu0 %v622_v6  ;;  %3045 = vmatpush.msra.mxu1 %v622_v6  ;;  %s3722_s17 = scalar_lea.vmem %s5369_s1, %s3038_s23  ;;  %s5356_s23 = smov 96  }
  0x24   : > { %v562_v21 = vld [vmem:[%s3722_s17] sm:$0xff]  ;;  %792 = vmatpush.msra.mxu3 %v753_v19  ;;  %v564_v28 = vld [vmem:[%s3722_s17 + $0x10] sm:$0xff]  ;;  %v565_v29 = vld [vmem:[%s3722_s17 + $0x18] sm:$0xff]  ;;  %s5448_s1 = smov 96  }
  0x25   : > { %668 = vmatpush.msra.mxu0 %v621_v8  ;;  %3046 = vmatpush.msra.mxu1 %v621_v8  ;;  %v566_v31 = vld [vmem:[%s3722_s17 + $0x20] sm:$0xff]  ;;  %v563_v32 = vld [vmem:[%s3722_s17 + $0x8] sm:$0xff]  ;;  %v568_v58 = vld [vmem:[%s3722_s17 + $0x30] sm:$0xff] }
  0x26   : > { %793 = vmatpush.msra.mxu3 %v752_v20  ;;  %v567_v34 = vld [vmem:[%s3722_s17 + $0x28] sm:$0xff]  ;;  %v569_v59 = vld [vmem:[%s3722_s17 + $0x38] sm:$0xff]  ;;  %s3532_s17 = smov 64  }
  0x27   : > { %669 = vmatpush.msra.mxu0 %v620_v9  ;;  %3047 = vmatpush.msra.mxu1 %v620_v9 }
  0x28   : > { %594 = vrot.lane.b32.xlu1 %v574_v10, %s5353_s30  ;;  %588 = vrot.lane.b32.xlu0 %v571_v11, %s5353_s30 }
  0x29   : > { %670 = vmatpush.msra.mxu0 %v619_v15  ;;  %3048 = vmatpush.msra.mxu1 %v619_v15 }
  0x2a   : > { %596 = vrot.lane.b32.xlu2 %v575_v12, %s5353_s30  ;;  %794 = vmatpush.msra.mxu3 %v751_v22 }
  0x2b   : > { %767 = vmatpush.msrb.mxu1 %v755_v16 }
  0x2c   : > { %795 = vmatpush.msra.mxu3 %v750_v26 }
  0x2d   : > { %768 = vmatpush.msrb.mxu1 %v754_v17 }
  0x2e   : > { %796 = vmatpush.msra.mxu3 %v749_v27 }
  0x2f   : > { %769 = vmatpush.msrb.mxu1 %v753_v19 }
  0x30   : > { %598 = vrot.lane.b32.xlu0 %v576_v13, %s5353_s30  ;;  %600 = vrot.lane.b32.xlu1 %v577_v14, %s5353_s30  ;;  %s2894_s30 = scalar_lea.hbm %s5348_s16, %s3040_s28  ;;  %s3486_s28 = scalar_lea.hbm %s5348_s16, 128 }
  0x31   : > { %770 = vmatpush.msrb.mxu1 %v752_v20  ;;  %797 = vmatpush.msra.mxu3 %v748_v30  ;;  %s2897_s20 = sshll.u32 %s2894_s30, 4  ;;  %s2898_s20 = int_to_ptr.hbm [resolvable:$true] %s2897_s20 }
  0x32   : > { %s3480_s26 = sshra.s32 %s2898_s20, 4  ;;  %s3481_s26 = int_to_ptr.hbm [resolvable:$true] %s3480_s26 }
  0x33   : > { %771 = vmatpush.msrb.mxu1 %v751_v22  ;;  %s3482_s27 = scalar_lea.hbm %s3481_s26, 64  ;;  %p3487_p0 = scmp.lt.s32.totalorder %s3481_s26, %s5348_s16 }
  0x34   : > { %p3483_p11 = scmp.ne.s32.totalorder %s3481_s26, %s3482_s27  ;;  %p3488_p1 = scmp.lt.s32.totalorder %s3486_s28, %s3482_s27 }
  0x35   : > { %772 = vmatpush.msrb.mxu1 %v750_v26 }
  0x36   : > { %p3484_p12 = pnand %p3483_p11, %p3659_p5  ;;  %p3489_p2 = por %p3488_p1, %p3487_p0 }
  0x37   : > { %773 = vmatpush.msrb.mxu1 %v749_v27 }
  0x38   : > { %p3485_p13 = pneg %p3484_p12 }
  0x39   : > { %774 = vmatpush.msrb.mxu1 %v748_v30 }
  0x3a   : > { %p3490_p3 = pnand %p3489_p2, %p3485_p13 }
  0x7c   : > { %v593_v18 = vpop.permute.xlu2 %592 }
  0x7d   : > { %v3759_v37 = vsel %vm5355_vm0, %v565_v29, %v593_v18 }
  0x7e   : > { %v721_v47 = vmul.f32 %v3759_v37, %v3759_v37  ;;  %v701_v56 = vsel %vm540_vm1, %v3759_v37, 0.0 }
  0x80   : > { %v731_v62 = vsel %vm540_vm1, %v721_v47, 0.0  ;;  %v3531_v47 = vmov 0.0  }
  0x81   : > { %541 = vst.msk [vmem:[#allocation2] sm:$0xff] %vm540_vm1, %v3531_v47 }
  0x82   : > { %543 = vst.msk [vmem:[#allocation2 + $0x8] sm:$0x3] %vm542_vm2, %v3531_v47 }
  0x83   : > { %544 = vst.msk [vmem:[#allocation2 + $0x10] sm:$0xff] %vm540_vm1, %v3531_v47 }
  0x84   : > { %v597_v33 = vpop.permute.xlu2 %596  ;;  %545 = vst.msk [vmem:[#allocation2 + $0x18] sm:$0x3] %vm542_vm2, %v3531_v47 }
  0x85   : > { %v3768_v42 = vsel %vm5355_vm0, %v567_v34, %v597_v33  ;;  %546 = vst.msk [vmem:[#allocation2 + $0x20] sm:$0xff] %vm540_vm1, %v3531_v47 }
  0x86   : > { %v723_v52 = vmul.f32 %v3768_v42, %v3768_v42  ;;  %v705_v0 = vsel %vm540_vm1, %v3768_v42, 0.0  ;;  %547 = vst.msk [vmem:[#allocation2 + $0x28] sm:$0x3] %vm542_vm2, %v3531_v47 }
  0x87   : > { %548 = vst.msk [vmem:[#allocation2 + $0x30] sm:$0xff] %vm540_vm1, %v3531_v47 }
  0x88   : > { %v735_v1 = vsel %vm540_vm1, %v723_v52, 0.0  ;;  %549 = vst.msk [vmem:[#allocation2 + $0x38] sm:$0x3] %vm542_vm2, %v3531_v47 }
  0x89   : > { %v1019_v52 = vld [vmem:[#allocation2 + $0x1] sm:$0xff]  ;;  %550 = vst.msk [vmem:[#allocation2 + $0x40] sm:$0xff] %vm540_vm1, %v3531_v47 }
  0x8a   : > { %1092 = vrot.lane.b32.xlu2 %v1019_v52, %s3532_s17  ;;  %551 = vst.msk [vmem:[#allocation2 + $0x48] sm:$0x3] %vm542_vm2, %v3531_v47 }
  0x8b   : > { %552 = vst.msk [vmem:[#allocation2 + $0x50] sm:$0xff] %vm540_vm1, %v3531_v47 }
  0x8c   : > { %553 = vst.msk [vmem:[#allocation2 + $0x58] sm:$0x3] %vm542_vm2, %v3531_v47 }
  0x8d   : > { %554 = vst.msk [vmem:[#allocation2 + $0x60] sm:$0xff] %vm540_vm1, %v3531_v47 }
  0x8e   : > { %555 = vst.msk [vmem:[#allocation2 + $0x68] sm:$0x3] %vm542_vm2, %v3531_v47 }
  0x8f   : > { %556 = vst.msk [vmem:[#allocation2 + $0x70] sm:$0xff] %vm540_vm1, %v3531_v47 }
  0x90   : > { %557 = vst.msk [vmem:[#allocation2 + $0x78] sm:$0x3] %vm542_vm2, %v3531_v47 }
  0x91   : > { %558 = vst.msk [vmem:[#allocation2 + $0x80] sm:$0xff] %vm540_vm1, %v3531_v47 }
  0x92   : > { %v591_v23 = vpop.permute.xlu1 %590  ;;  %v587_v24 = vpop.permute.xlu0 %586  ;;  %559 = vst.msk [vmem:[#allocation2 + $0x88] sm:$0x3] %vm542_vm2, %v3531_v47 }
  0x93   : > { %v3735_v25 = vsel %vm5355_vm0, %v562_v21, %v587_v24  ;;  %v3754_v35 = vsel %vm5355_vm0, %v564_v28, %v591_v23  ;;  %560 = vst.msk [vmem:[#allocation2 + $0x90] sm:$0xff] %vm540_vm1, %v3531_v47 }
  0x94   : > { %2981 = vmatmul.msk.f32.vlgmr.msra.gmra.mxu0 %vm540_vm1, %v3735_v25  ;;  %v718_v36 = vmul.f32 %v3735_v25, %v3735_v25  ;;  %v720_v43 = vmul.f32 %v3754_v35, %v3754_v35  ;;  %v696_v44 = vsel %vm540_vm1, %v3735_v25, 0.0  ;;  %v699_v49 = vsel %vm540_vm1, %v3754_v35, 0.0  ;;  %561 = vst.msk [vmem:[#allocation2 + $0x98] sm:$0x3] %vm542_vm2, %v3531_v47 }
  0x96   : > { %v726_v50 = vsel %vm540_vm1, %v718_v36, 0.0  ;;  %v729_v55 = vsel %vm540_vm1, %v720_v43, 0.0 }
  0x9a   : > { %v595_v38 = vpop.permute.xlu1 %594  ;;  %v589_v39 = vpop.permute.xlu0 %588 }
  0x9b   : > { %v3762_v40 = vsel %vm5355_vm0, %v566_v31, %v595_v38  ;;  %v3765_v41 = vsel %vm5355_vm0, %v563_v32, %v589_v39 }
  0x9c   : > { %v697_v45 = vsel %vm540_vm1, %v3765_v41, 0.0  ;;  %v719_v46 = vmul.f32 %v3765_v41, %v3765_v41  ;;  %2982 = vmatmul.msk.f32.gmra.mxu0 %vm540_vm1, %v3765_v41  ;;  %2985 = vmatmul.msk.f32.vlgmr.msra.gmra.mxu1 %vm540_vm1, %v3762_v40  ;;  %v722_v57 = vmul.f32 %v3762_v40, %v3762_v40  ;;  %v703_v63 = vsel %vm540_vm1, %v3762_v40, 0.0 }
  0x9d   : > { %v698_v48 = vadd.f32 %v697_v45, %v696_v44 }
  0x9e   : > { %v727_v51 = vsel %vm540_vm1, %v719_v46, 0.0  ;;  %v733_v8 = vsel %vm540_vm1, %v722_v57, 0.0 }
  0x9f   : > { %v700_v53 = vadd.f32 %v699_v49, %v698_v48  ;;  %v728_v54 = vadd.f32 %v727_v51, %v726_v50 }
  0xa1   : > { %v730_v60 = vadd.f32 %v729_v55, %v728_v54  ;;  %v702_v61 = vadd.f32 %v701_v56, %v700_v53 }
  0xa2   : > { %v599_v2 = vpop.permute.xlu0 %598  ;;  %v601_v3 = vpop.permute.xlu1 %600 }
  0xa3   : > { %v704_v4 = vadd.f32 %v703_v63, %v702_v61  ;;  %v732_v5 = vadd.f32 %v731_v62, %v730_v60  ;;  %v3804_v6 = vsel %vm5355_vm0, %v568_v58, %v599_v2  ;;  %v3807_v7 = vsel %vm5355_vm0, %v569_v59, %v601_v3  ;;  %v804_v58 = vld [vmem:[%s5334_s2] sm:$0x1] }
  0xa4   : > { %v707_v9 = vsel %vm540_vm1, %v3804_v6, 0.0  ;;  %v724_v10 = vmul.f32 %v3804_v6, %v3804_v6  ;;  %2983 = vmatmul.msk.f32.gmra.mxu0 %vm540_vm1, %v3754_v35  ;;  %2986 = vmatmul.msk.f32.gmra.mxu1 %vm540_vm1, %v3768_v42  ;;  %v725_v11 = vmul.f32 %v3807_v7, %v3807_v7  ;;  %v709_v15 = vsel %vm540_vm1, %v3807_v7, 0.0  ;;  %v817_v62 = vld [vmem:[%s5335_s3] sm:$0x1] }
  0xa5   : > { %v706_v12 = vadd.f32 %v705_v0, %v704_v4  ;;  %v734_v13 = vadd.f32 %v733_v8, %v732_v5 }
  0xa6   : > { %v737_v14 = vsel %vm540_vm1, %v724_v10, 0.0  ;;  %v739_v18 = vsel %vm540_vm1, %v725_v11, 0.0 }
  0xa7   : > { %v736_v16 = vadd.f32 %v735_v1, %v734_v13  ;;  %v708_v17 = vadd.f32 %v707_v9, %v706_v12 }
  0xa9   : > { %v738_v19 = vadd.f32 %v737_v14, %v736_v16  ;;  %v710_v20 = vadd.f32 %v709_v15, %v708_v17 }
  0xab   : > { %v711_v21 = vrot.slane %v710_v20, 4  ;;  %v740_v22 = vadd.f32 %v739_v18, %v738_v19 }
  0xac   : > { %2984 = vmatmul.msk.f32.gmra.mxu0 %vm540_vm1, %v3759_v37  ;;  %2987 = vmatmul.msk.f32.gmra.mxu1 %vm540_vm1, %v3804_v6 }
  0xad   : > { %v712_v23 = vadd.f32 %v711_v21, %v710_v20  ;;  %v741_v24 = vrot.slane %v740_v22, 4 }
  0xaf   : > { %v713_v26 = vrot.slane %v712_v23, 2  ;;  %v742_v27 = vadd.f32 %v741_v24, %v740_v22 }
  0xb1   : > { %v743_v28 = vrot.slane %v742_v27, 2  ;;  %v714_v29 = vadd.f32 %v713_v26, %v712_v23 }
  0xb3   : > { %v744_v30 = vadd.f32 %v743_v28, %v742_v27  ;;  %v715_v31 = vrot.slane %v714_v29, 1 }
  0xb4   : > { %2988 = vmatmul.msk.f32.gmra.mxu1 %vm540_vm1, %v3807_v7 }
  0xb5   : > { %v745_v32 = vrot.slane %v744_v30, 1  ;;  %v716_v33 = vadd.f32 %v715_v31, %v714_v29 }
  0xb7   : > { %v746_v34 = vadd.f32 %v745_v32, %v744_v30  ;;  %v717_v38 = vmul.f32 0.015625, %v716_v33 }
  0xb9   : > { %v747_v36 = vmul.f32 0.015625, %v746_v34 }
  0xbb   : > { %2990 = vmatmul.msk.f32.vlgmr.msra.gmra.mxu3 %vm540_vm1, %v747_v36 }
  0xbc   : > { %2989 = vmatmul.msk.f32.vlgmr.msrb.gmra.mxu1 %vm540_vm1, %v717_v38 }
 0x119   : > { %v3832_v39 = vpop.f32.mrf.mxu1 }
 0x121   : > { %v3834_v43 = vpop.f32.mrf.mxu1 }
 0x129   : > { %v3836_v44 = vpop.f32.mrf.mxu1 }
 0x131   : > { %v3838_v45 = vpop.f32.mrf.mxu1 }
 0x139   : > { %v776_v46 = vpop.f32.mrf.mxu1 }
 0x13a   : > { %v802_v48 = vmul.f32 %v776_v46, %v776_v46 }
 0x13e   : > { %v799_v49 = vpop.f32.mrf.mxu3 }
 0x13f   : > { %v803_v50 = vsub.f32 %v799_v49, %v802_v48 }
 0x141   : > { %v805_v51 = vadd.f32 1e-06, %v803_v50 }
 0x143   : > { %3398 = vrsqrt.f32 %v805_v51  ;;  %vm812_vm4 = vweird.f32 %v805_v51 }
 0x149   : > { %v3399_v53 = vpop.eup %3398 }
 0x14a   : > { %v807_v54 = vmul.f32 %v3399_v53, %v805_v51  ;;  %vm813_vm3 = vweird.f32 %v3399_v53 }
 0x14b   : > { %vm814_vm5 = vmor %vm812_vm4, %vm813_vm3 }
 0x14c   : > { %v808_v55 = vmul.f32 %v3399_v53, %v807_v54 }
 0x14e   : > { %v809_v56 = vmul.f32 0.5, %v808_v55 }
 0x150   : > { %v810_v57 = vsub.f32 1.5, %v809_v56 }
 0x152   : > { %v811_v59 = vmul.f32 %v3399_v53, %v810_v57 }
 0x154   : > { %v815_v60 = vsel %vm814_vm5, %v3399_v53, %v811_v59 }
 0x155   : > { %v816_v61 = vmul.f32 %v815_v60, %v804_v58 }
 0x157   : > { %v818_v63 = vmul.f32 %v816_v61, %v776_v46  ;;  %v821_v0 = vperm.slane %v816_v61, 0 }
 0x159   : > { %v819_v1 = vsub.f32 %v817_v62, %v818_v63  ;;  %v823_v2 = vmul.f32 %v821_v0, %v3735_v25  ;;  %v824_v3 = vmul.f32 %v821_v0, %v3765_v41  ;;  %v825_v4 = vmul.f32 %v821_v0, %v3754_v35 }
 0x15a   : > { %v828_v5 = vmul.f32 %v821_v0, %v3768_v42  ;;  %v827_v9 = vmul.f32 %v821_v0, %v3762_v40  ;;  %v829_v10 = vmul.f32 %v821_v0, %v3804_v6  ;;  %v826_v16 = vmul.f32 %v821_v0, %v3759_v37 }
 0x15b   : > { %v832_v8 = vperm.slane %v819_v1, 0  ;;  %v830_v18 = vmul.f32 %v821_v0, %v3807_v7 }
 0x15d   : > { %v3873_v11 = vadd.f32 %v832_v8, %v825_v4  ;;  %v3875_v12 = vadd.f32 %v832_v8, %v824_v3  ;;  %v3877_v13 = vadd.f32 %v832_v8, %v823_v2  ;;  %v3879_v14 = vadd.f32 %v832_v8, %v828_v5 }
 0x15e   : > { %v3881_v25 = vadd.f32 %v832_v8, %v829_v10  ;;  %v3883_v41 = vadd.f32 %v832_v8, %v827_v9  ;;  %v3893_v19 = vadd.f32 %v832_v8, %v826_v16  ;;  %v3895_v20 = vadd.f32 %v832_v8, %v830_v18 }
 0x15f   : > { %v2993_v35 = vmul.f32 -1.442695, %v3873_v11  ;;  %v2992_v42 = vmul.f32 -1.442695, %v3875_v12  ;;  %v2991_v40 = vmul.f32 -1.442695, %v3877_v13 }
 0x160   : > { %v2996_v6 = vmul.f32 -1.442695, %v3879_v14  ;;  %v2997_v15 = vmul.f32 -1.442695, %v3881_v25  ;;  %v2995_v17 = vmul.f32 -1.442695, %v3883_v41 }
 0x161   : > { %3400 = vpow2.f32 %v2993_v35  ;;  %v2994_v24 = vmul.f32 -1.442695, %v3893_v19  ;;  %v2998_v27 = vmul.f32 -1.442695, %v3895_v20 }
 0x162   : > { %3402 = vpow2.f32 %v2992_v42 }
 0x163   : > { %3404 = vpow2.f32 %v2991_v40 }
 0x164   : > { %3406 = vpow2.f32 %v2996_v6 }
 0x165   : > { %3408 = vpow2.f32 %v2997_v15 }
 0x166   : > { %3410 = vpow2.f32 %v2995_v17 }
 0x167   : > { %v3401_v21 = vpop.eup %3400 }
 0x168   : > { %v3403_v22 = vpop.eup %3402  ;;  %v3897_v23 = vadd.f32 1.0, %v3401_v21 }
 0x169   : > { %v3405_v37 = vpop.eup %3404  ;;  %v3900_v26 = vadd.f32 1.0, %v3403_v22 }
 0x16a   : > { %v3407_v7 = vpop.eup %3406  ;;  %3412 = vrcp.f32 %v3897_v23  ;;  %v3905_v30 = vadd.f32 1.0, %v3405_v37  ;;  %v913_v32 = vand.u32 2147483647, %v3897_v23  ;;  %v915_v33 = vand.u32 2147483648, %v3897_v23 }
 0x16b   : > { %v3409_v28 = vpop.eup %3408  ;;  %3414 = vrcp.f32 %v3900_v26  ;;  %v3907_v31 = vadd.f32 1.0, %v3407_v7  ;;  %v898_v36 = vand.u32 2147483647, %v3900_v26  ;;  %vm909_vm6 = vweird.f32 %v3897_v23 }
 0x16c   : > { %v3411_v29 = vpop.eup %3410  ;;  %3416 = vpow2.f32 %v2994_v24  ;;  %v3911_v34 = vadd.f32 1.0, %v3409_v28  ;;  %v900_v38 = vand.u32 2147483648, %v3900_v26  ;;  %vm894_vm7 = vweird.f32 %v3900_v26 }
 0x16d   : > { %3418 = vpow2.f32 %v2998_v27  ;;  %v3918_v46 = vadd.f32 1.0, %v3411_v29  ;;  %v885_v48 = vand.u32 2147483648, %v3905_v30  ;;  %v960_v49 = vand.u32 2147483648, %v3907_v31 }
 0x16e   : > { %3420 = vrcp.f32 %v3905_v30  ;;  %vm3925_vm8 = vcmp.eq.f32.partialorder %v913_v32, 8.507059e+37  ;;  %v916_v53 = vor.u32 1.1754944e-38, %v915_v33  ;;  %v883_v54 = vand.u32 2147483647, %v3905_v30 }
 0x16f   : > { %3422 = vrcp.f32 %v3907_v31  ;;  %vm3931_vm9 = vcmp.eq.f32.partialorder %v898_v36, 8.507059e+37  ;;  %v958_v58 = vand.u32 2147483647, %v3907_v31  ;;  %v975_v59 = vand.u32 2147483648, %v3911_v34 }
 0x170   : > { %v3413_v47 = vpop.eup %3412  ;;  %3424 = vrcp.f32 %v3911_v34  ;;  %v901_v62 = vor.u32 1.1754944e-38, %v900_v38  ;;  %vm879_vm10 = vweird.f32 %v3905_v30  ;;  %v886_v1 = vor.u32 1.1754944e-38, %v885_v48 }
 0x171   : > { %v3415_v50 = vpop.eup %3414  ;;  %v905_v51 = vmul.f32 %v3413_v47, %v3897_v23  ;;  %3426 = vrcp.f32 %v3918_v46  ;;  %vm910_vm11 = vweird.f32 %v3413_v47  ;;  %vm954_vm12 = vweird.f32 %v3907_v31 }
 0x172   : > { %v3417_v55 = vpop.eup %3416  ;;  %v890_v56 = vmul.f32 %v3415_v50, %v3900_v26  ;;  %v961_v2 = vor.u32 1.1754944e-38, %v960_v49  ;;  %vm895_vm13 = vweird.f32 %v3415_v50  ;;  %vm3941_vm14 = vcmp.eq.f32.partialorder %v883_v54, 8.507059e+37  ;;  %vm911_vm4 = vmor %vm909_vm6, %vm910_vm11 }
 0x173   : > { %v3419_v60 = vpop.eup %3418  ;;  %v906_v61 = vsub.f32 1.0, %v905_v51  ;;  %v973_v9 = vand.u32 2147483647, %v3911_v34  ;;  %vm3948_vm2 = vcmp.eq.f32.partialorder %v958_v58, 8.507059e+37  ;;  %v976_v6 = vor.u32 1.1754944e-38, %v975_v59  ;;  %vm896_vm15 = vmor %vm894_vm7, %vm895_vm13 }
 0x174   : > { %v3421_v63 = vpop.eup %3420  ;;  %v891_v0 = vsub.f32 1.0, %v890_v56  ;;  %v943_v15 = vand.u32 2147483647, %v3918_v46  ;;  %v3960_v28 = vadd.f32 1.0, %v3417_v55 }
 0x175   : > { %v3423_v3 = vpop.eup %3422  ;;  %v907_v4 = vmul.f32 %v3413_v47, %v906_v61  ;;  %v875_v5 = vmul.f32 %v3421_v63, %v3905_v30  ;;  %vm880_vm3 = vweird.f32 %v3421_v63  ;;  %vm974_vm11 = vcmp.eq.f32.partialorder %v973_v9, 8.507059e+37 }
 0x176   : > { %v3425_v10 = vpop.eup %3424  ;;  %v892_v35 = vmul.f32 %v3415_v50, %v891_v0  ;;  %v950_v42 = vmul.f32 %v3423_v3, %v3907_v31  ;;  %vm955_vm5 = vweird.f32 %v3423_v3  ;;  %vm881_vm6 = vmor %vm879_vm10, %vm880_vm3  ;;  %3428 = vrcp.f32 %v3960_v28 }
 0x177   : > { %v908_v16 = vadd.f32 %v3413_v47, %v907_v4  ;;  %v876_v17 = vsub.f32 1.0, %v875_v5  ;;  %v965_v18 = vmul.f32 %v3425_v10, %v3911_v34  ;;  %vm970_vm0 = vweird.f32 %v3425_v10  ;;  %v3427_v24 = vpop.eup %3426  ;;  %vm956_vm7 = vmor %vm954_vm12, %vm955_vm5 }
 0x178   : > { %v893_v21 = vadd.f32 %v3415_v50, %v892_v35  ;;  %v951_v22 = vsub.f32 1.0, %v950_v42  ;;  %v935_v33 = vmul.f32 %v3427_v24, %v3918_v46  ;;  %vm940_vm10 = vweird.f32 %v3427_v24 }
 0x179   : > { %v912_v37 = vsel %vm911_vm4, %v3413_v47, %v908_v16  ;;  %v877_v27 = vmul.f32 %v3421_v63, %v876_v17  ;;  %v966_v7 = vsub.f32 1.0, %v965_v18  ;;  %vm939_vm12 = vweird.f32 %v3918_v46 }
 0x17a   : > { %v917_v29 = vsel %vm3925_vm8, %v916_v53, %v912_v37  ;;  %v897_v32 = vsel %vm896_vm15, %v3415_v50, %v893_v21  ;;  %v952_v23 = vmul.f32 %v3423_v3, %v951_v22  ;;  %v936_v51 = vsub.f32 1.0, %v935_v33 }
 0x17b   : > { %v996_v36 = vmul.f32 %v917_v29, %v3873_v11  ;;  %v902_v38 = vsel %vm3931_vm9, %v901_v62, %v897_v32  ;;  %v878_v47 = vadd.f32 %v3421_v63, %v877_v27  ;;  %v967_v48 = vmul.f32 %v3425_v10, %v966_v7 }
 0x17c   : > { %v995_v26 = vmul.f32 %v902_v38, %v3875_v12  ;;  %v953_v49 = vadd.f32 %v3423_v3, %v952_v23  ;;  %v945_v50 = vand.u32 2147483648, %v3918_v46  ;;  %v3978_v53 = vadd.f32 1.0, %v3419_v60  ;;  %v3429_v61 = vpop.eup %3428 }
 0x17d   : > { %1005 = vst.msk [vmem:[#allocation2 + $0x31] sm:$0xff] %vm540_vm1, %v996_v36  ;;  %v882_v52 = vsel %vm881_vm6, %v3421_v63, %v878_v47  ;;  %v968_v11 = vadd.f32 %v3425_v10, %v967_v48  ;;  %vm5378_vm8 = vweird.f32 %v3911_v34  ;;  %v937_v54 = vmul.f32 %v3427_v24, %v936_v51  ;;  %v1259_v47 = vld [vmem:[%s5337_s5 + $0x78] sm:$0xff]  ;;  %v1258_v48 = vld [vmem:[%s5337_s5 + $0x70] sm:$0xff] }
 0x17e   : > { %1004 = vst.msk [vmem:[#allocation2 + $0x21] sm:$0xff] %vm540_vm1, %v995_v26  ;;  %v887_v12 = vsel %vm3941_vm14, %v886_v1, %v882_v52  ;;  %v957_v30 = vsel %vm956_vm7, %v3423_v3, %v953_v49  ;;  %vm971_vm9 = vmor %vm5378_vm8, %vm970_vm0  ;;  %v946_v60 = vor.u32 1.1754944e-38, %v945_v50  ;;  %3430 = vrcp.f32 %v3978_v53  ;;  %1344 = vmatpush.msrb.mxu3 %v1259_v47  ;;  %v1257_v49 = vld [vmem:[%s5337_s5 + $0x68] sm:$0xff]  ;;  %v1011_v47 = vld [vmem:[#allocation2] sm:$0xff] }
 0x17f   : > { %v994_v31 = vmul.f32 %v887_v12, %v3877_v13  ;;  %v962_v55 = vsel %vm3948_vm2, %v961_v2, %v957_v30  ;;  %v972_v56 = vsel %vm971_vm9, %v3425_v10, %v968_v11  ;;  %v938_v59 = vadd.f32 %v3427_v24, %v937_v54  ;;  %vm941_vm0 = vmor %vm939_vm12, %vm940_vm10  ;;  %v1256_v54 = vld [vmem:[%s5337_s5 + $0x60] sm:$0xff] }
 0x180   : > { %v977_v57 = vsel %vm974_vm11, %v976_v6, %v972_v56  ;;  %v999_v58 = vmul.f32 %v962_v55, %v3879_v14  ;;  %vm944_vm13 = vcmp.eq.f32.partialorder %v943_v15, 8.507059e+37  ;;  %v920_v63 = vmul.f32 %v3429_v61, %v3960_v28  ;;  %1345 = vmatpush.msrb.mxu3 %v1258_v48  ;;  %v1254_v56 = vld [vmem:[%s5337_s5 + $0x50] sm:$0xff]  ;;  %v1315_v48 = vld [vmem:[%s5337_s5 + $0x238] sm:$0xff] }
 0x181   : > { %1003 = vst.msk [vmem:[#allocation2 + $0x11] sm:$0xff] %vm540_vm1, %v994_v31  ;;  %v1000_v34 = vmul.f32 %v977_v57, %v3881_v25  ;;  %v942_v13 = vsel %vm941_vm0, %v3427_v24, %v938_v59  ;;  %v928_v2 = vand.u32 2147483647, %v3960_v28  ;;  %v930_v3 = vand.u32 2147483648, %v3960_v28  ;;  %v1255_v31 = vld [vmem:[%s5337_s5 + $0x58] sm:$0xff] }
 0x182   : > { %1008 = vst.msk [vmem:[#allocation2 + $0x61] sm:$0xff] %vm540_vm1, %v999_v58  ;;  %v947_v62 = vsel %vm944_vm13, %v946_v60, %v942_v13  ;;  %v921_v0 = vsub.f32 1.0, %v920_v63  ;;  %vm925_vm14 = vweird.f32 %v3429_v61  ;;  %vm924_vm15 = vweird.f32 %v3960_v28  ;;  %1346 = vmatpush.msrb.mxu3 %v1257_v49 }
 0x183   : > { %1009 = vst.msk [vmem:[#allocation2 + $0x71] sm:$0xff] %vm540_vm1, %v1000_v34  ;;  %v998_v46 = vmul.f32 %v947_v62, %v3883_v41  ;;  %vm926_vm2 = vmor %vm924_vm15, %vm925_vm14  ;;  %vm929_vm3 = vcmp.eq.f32.partialorder %v928_v2, 8.507059e+37  ;;  %v931_v40 = vor.u32 1.1754944e-38, %v930_v3  ;;  %v990_v6 = vand.u32 2147483648, %v3978_v53  ;;  %v1253_v34 = vld [vmem:[%s5337_s5 + $0x48] sm:$0xff]  ;;  %v1075_v3 = vld [vmem:[#allocation2 + $0x91] sm:$0xff] }
 0x184   : > { %v3996_v14 = vld [vmem:[#allocation2 + $0x31] sm:$0xff]  ;;  %v3431_v1 = vpop.eup %3430  ;;  %v922_v41 = vmul.f32 %v3429_v61, %v921_v0  ;;  %v988_v17 = vand.u32 2147483647, %v3978_v53  ;;  %vm984_vm5 = vweird.f32 %v3978_v53  ;;  %1347 = vmatpush.msrb.mxu3 %v1256_v54  ;;  %vm5379_vm8 = vcmask 261120  }
 0x185   : > { %1098 = vrot.lane.b32.xlu2 %v3996_v14, %s3532_s17  ;;  %v4002_v25 = vld [vmem:[#allocation2 + $0x21] sm:$0xff]  ;;  %1007 = vst.msk [vmem:[#allocation2 + $0x51] sm:$0xff] %vm540_vm1, %v998_v46  ;;  %v980_v5 = vmul.f32 %v3431_v1, %v3978_v53  ;;  %vm985_vm4 = vweird.f32 %v3431_v1  ;;  %v991_v37 = vor.u32 1.1754944e-38, %v990_v6  ;;  %v4033_v7 = vld [vmem:[#allocation2 + $0x32] sm:$0xff]  ;;  %vm5380_vm9 = vmmov %vm5379_vm8 }
 0x186   : > { %1096 = vrot.lane.b32.xlu1 %v4002_v25, %s3532_s17  ;;  %v923_v10 = vadd.f32 %v3429_v61, %v922_v41  ;;  %vm986_vm6 = vmor %vm984_vm5, %vm985_vm4  ;;  %v4031_v27 = vld [vmem:[#allocation2 + $0x20] sm:$0xff]  ;;  %vm989_vm7 = vcmp.eq.f32.partialorder %v988_v17, 8.507059e+37  ;;  %v4092_v57 = vld [vmem:[#allocation2 + $0x30] sm:$0xff]  ;;  %1348 = vmatpush.msrb.mxu3 %v1255_v31 }
 0x187   : > { %v981_v35 = vsub.f32 1.0, %v980_v5  ;;  %v4035_v29 = vld [vmem:[#allocation2 + $0x22] sm:$0xff]  ;;  %v3114_v60 = vpack.i.bf16 %v4092_v57, %v3996_v14  ;;  %v1251_v5 = vld [vmem:[%s5337_s5 + $0x38] sm:$0xff]  ;;  %v1246_v17 = vld [vmem:[%s5337_s5 + $0x10] sm:$0xff] }
 0x188   : > { %v4009_v4 = vld [vmem:[#allocation2 + $0x11] sm:$0xff]  ;;  %v927_v15 = vsel %vm926_vm2, %v3429_v61, %v923_v10  ;;  %v3104_v33 = vpack.i.bf16 %v4002_v25, %v4035_v29  ;;  %1349 = vmatpush.msrb.mxu3 %v1254_v56  ;;  %v1252_v41 = vld [vmem:[%s5337_s5 + $0x40] sm:$0xff]  ;;  %vm5381_vm10 = vmmov %vm5379_vm8 }
 0x189   : > { %1094 = vrot.lane.b32.xlu0 %v4009_v4, %s3532_s17  ;;  %v4014_v8 = vld [vmem:[#allocation2 + $0x61] sm:$0xff]  ;;  %v982_v16 = vmul.f32 %v3431_v1, %v981_v35  ;;  %v932_v21 = vsel %vm929_vm3, %v931_v40, %v927_v15  ;;  %v4064_v51 = vld [vmem:[#allocation2 + $0x10] sm:$0xff]  ;;  %v1247_v40 = vld [vmem:[%s5337_s5 + $0x18] sm:$0xff] }
 0x18a   : > { %v4016_v9 = vld [vmem:[#allocation2 + $0x71] sm:$0xff]  ;;  %v997_v22 = vmul.f32 %v932_v21, %v3893_v19  ;;  %v3109_v19 = vpack.i.bf16 %v4033_v7, %v4031_v27  ;;  %v4076_v12 = vld [vmem:[#allocation2 + $0x60] sm:$0xff]  ;;  %1350 = vmatpush.msrb.mxu3 %v1253_v34  ;;  %v1249_v35 = vld [vmem:[%s5337_s5 + $0x28] sm:$0xff] }
 0x18b   : > { %v3094_v42 = vpack.i.bf16 %v4016_v9, %v4014_v8  ;;  %v983_v24 = vadd.f32 %v3431_v1, %v982_v16  ;;  %v4066_v50 = vld [vmem:[#allocation2 + $0x12] sm:$0xff]  ;;  %v4087_v55 = vld [vmem:[#allocation2 + $0x62] sm:$0xff]  ;;  %vm5382_vm11 = vmmov %vm5379_vm8 }
 0x18c   : > { %v4024_v18 = vld [vmem:[#allocation2 + $0x51] sm:$0xff]  ;;  %1006 = vst.msk [vmem:[#allocation2 + $0x41] sm:$0xff] %vm540_vm1, %v997_v22  ;;  %v3099_v53 = vpack.i.bf16 %v4064_v51, %v4066_v50  ;;  %v3134_v59 = vpack.i.bf16 %v4014_v8, %v4087_v55  ;;  %1351 = vmatpush.msrb.mxu3 %v1252_v41  ;;  %v1284_v41 = vld [vmem:[%s5337_s5 + $0x140] sm:$0xff]  ;;  %vm5383_vm12 = vmmov %vm5379_vm8 }
 0x18d   : > { %3095 = vrot.lane.b32.xlu2 %v3094_v42, %s3532_s17  ;;  %v987_v28 = vsel %vm986_vm6, %v3431_v1, %v983_v24  ;;  %v4047_v38 = vld [vmem:[#allocation2 + $0x52] sm:$0xff]  ;;  %v1248_v42 = vld [vmem:[%s5337_s5 + $0x20] sm:$0xff]  ;;  %vm5384_vm0 = vmmov %vm5379_vm8 }
 0x18e   : > { %1102 = vrot.lane.b32.xlu1 %v4024_v18, %s3532_s17  ;;  %v992_v32 = vsel %vm989_vm7, %v991_v37, %v987_v28  ;;  %v4079_v30 = vld [vmem:[#allocation2 + $0x72] sm:$0xff]  ;;  %1352 = vmatpush.msrb.mxu3 %v1251_v5  ;;  %v1245_v37 = vld [vmem:[%s5337_s5 + $0x8] sm:$0xff]  ;;  %v1244_v28 = vld [vmem:[%s5337_s5] sm:$0xff] }
 0x18f   : > { %v1001_v23 = vmul.f32 %v992_v32, %v3895_v20  ;;  %v3139_v58 = vpack.i.bf16 %v4079_v30, %v4076_v12  ;;  %v4110_v62 = vld [vmem:[#allocation2 + $0x50] sm:$0xff]  ;;  %v1275_v6 = vld [vmem:[%s5337_s5 + $0xf8] sm:$0xff]  ;;  %v1273_v32 = vld [vmem:[%s5337_s5 + $0xe8] sm:$0xff] }
 0x190   : > { %v3129_v0 = vpack.i.bf16 %v4110_v62, %v4024_v18  ;;  %v4122_v1 = vld [vmem:[#allocation2 + $0x70] sm:$0xff]  ;;  %v1291_v15 = vld [vmem:[%s5337_s5 + $0x178] sm:$0xff]  ;;  %1385 = vmatpush.msra.mxu1 %v1275_v6  ;;  %v1300_v5 = vld [vmem:[%s5337_s5 + $0x1c0] sm:$0xff] }
 0x191   : > { %1010 = vst.msk [vmem:[#allocation2 + $0x81] sm:$0xff] %vm540_vm1, %v1001_v23  ;;  %v3144_v2 = vpack.i.bf16 %v4122_v1, %v4016_v9  ;;  %v1250_v10 = vld [vmem:[%s5337_s5 + $0x30] sm:$0xff]  ;;  %v1307_v16 = vld [vmem:[%s5337_s5 + $0x1f8] sm:$0xff]  ;;  %1426 = vmatpush.msra.mxu2 %v1291_v15  ;;  %v1289_v23 = vld [vmem:[%s5337_s5 + $0x168] sm:$0xff] }
 0x192   : > { %1353 = vmatpush.msrb.mxu3 %v1250_v10  ;;  %v1274_v21 = vld [vmem:[%s5337_s5 + $0xf0] sm:$0xff]  ;;  %1467 = vmatpush.msrb.mxu0 %v1307_v16  ;;  %v1271_v54 = vld [vmem:[%s5337_s5 + $0xd8] sm:$0xff]  ;;  %v1265_v16 = vld [vmem:[%s5337_s5 + $0xa8] sm:$0xff] }
 0x193   : > { %v4045_v36 = vld [vmem:[#allocation2 + $0x41] sm:$0xff]  ;;  %v1290_v22 = vld [vmem:[%s5337_s5 + $0x170] sm:$0xff]  ;;  %1386 = vmatpush.msra.mxu1 %v1274_v21  ;;  %v1287_v31 = vld [vmem:[%s5337_s5 + $0x158] sm:$0xff] }
 0x194   : > { %1100 = vrot.lane.b32.xlu0 %v4045_v36, %s3532_s17  ;;  %v4051_v20 = vld [vmem:[#allocation2 + $0x40] sm:$0xff]  ;;  %1354 = vmatpush.msrb.mxu3 %v1249_v35  ;;  %v1306_v24 = vld [vmem:[%s5337_s5 + $0x1f0] sm:$0xff]  ;;  %v1303_v56 = vld [vmem:[%s5337_s5 + $0x1d8] sm:$0xff] }
 0x195   : > { %3110 = vrot.lane.b32.xlu2 %v3109_v19, %s3532_s17  ;;  %v4059_v26 = vld [vmem:[#allocation2 + $0x42] sm:$0xff]  ;;  %v3124_v52 = vpack.i.bf16 %v4047_v38, %v4051_v20  ;;  %1427 = vmatpush.msra.mxu2 %v1290_v22  ;;  %v1093_v19 = vpop.permute.xlu2 %1092  ;;  %v1302_v34 = vld [vmem:[%s5337_s5 + $0x1d0] sm:$0xff]  ;;  %v1267_v10 = vld [vmem:[%s5337_s5 + $0xb8] sm:$0xff] }
 0x196   : > { %3105 = vrot.lane.b32.xlu1 %v3104_v33, %s3532_s17  ;;  %v3119_v11 = vpack.i.bf16 %v4045_v36, %v4059_v26  ;;  %1355 = vmatpush.msrb.mxu3 %v1248_v42  ;;  %v1305_v33 = vld [vmem:[%s5337_s5 + $0x1e8] sm:$0xff]  ;;  %v1212_v49 = vsel %vm540_vm1, %v1011_v47, %v1093_v19  ;;  %v1283_v35 = vld [vmem:[%s5337_s5 + $0x138] sm:$0xff]  ;;  %v1282_v6 = vld [vmem:[%s5337_s5 + $0x130] sm:$0xff] }
 0x197   : > { %1468 = vmatpush.msrb.mxu0 %v1306_v24  ;;  %1387 = vmatpush.msra.mxu1 %v1273_v32  ;;  %v1299_v42 = vld [vmem:[%s5337_s5 + $0x1b8] sm:$0xff]  ;;  %v1298_v15 = vld [vmem:[%s5337_s5 + $0x1b0] sm:$0xff]  ;;  %v1297_v21 = vld [vmem:[%s5337_s5 + $0x1a8] sm:$0xff] }
 0x198   : > { %v4106_v13 = vld [vmem:[#allocation2 + $0x82] sm:$0xff]  ;;  %1356 = vmatpush.msrb.mxu3 %v1247_v40  ;;  %1428 = vmatpush.msra.mxu2 %v1289_v23  ;;  %v1266_v40 = vld [vmem:[%s5337_s5 + $0xb0] sm:$0xff]  ;;  %v1263_v32 = vld [vmem:[%s5337_s5 + $0x98] sm:$0xff] }
 0x199   : > { %v4108_v61 = vld [vmem:[#allocation2 + $0x81] sm:$0xff]  ;;  %1469 = vmatpush.msrb.mxu0 %v1305_v33  ;;  %v1279_v23 = vld [vmem:[%s5337_s5 + $0x118] sm:$0xff]  ;;  %v1262_v33 = vld [vmem:[%s5337_s5 + $0x90] sm:$0xff] }
 0x19a   : > { %v4112_v46 = vld [vmem:[#allocation2 + $0x80] sm:$0xff]  ;;  %v3149_v63 = vpack.i.bf16 %v4108_v61, %v4106_v13  ;;  %1357 = vmatpush.msrb.mxu3 %v1246_v17  ;;  %v1281_v17 = vld [vmem:[%s5337_s5 + $0x128] sm:$0xff]  ;;  %v1295_v19 = vld [vmem:[%s5337_s5 + $0x198] sm:$0xff] }
 0x19b   : > { %v1313_v22 = vld [vmem:[%s5337_s5 + $0x228] sm:$0xff]  ;;  %v1264_v24 = vld [vmem:[%s5337_s5 + $0xa0] sm:$0xff]  ;;  %v1278_v47 = vld [vmem:[%s5337_s5 + $0x110] sm:$0xff] }
 0x19c   : > { %3100 = vrot.lane.b32.xlu0 %v3099_v53, %s3532_s17  ;;  %1358 = vmatpush.msrb.mxu3 %v1245_v37  ;;  %v1304_v53 = vld [vmem:[%s5337_s5 + $0x1e0] sm:$0xff]  ;;  %vm5385_vm13 = vmmov %vm5384_vm0 }
 0x19d   : > { %3125 = vrot.lane.b32.xlu2 %v3124_v52, %s3532_s17  ;;  %v1272_v52 = vld [vmem:[%s5337_s5 + $0xe0] sm:$0xff]  ;;  %1470 = vmatpush.msrb.mxu0 %v1304_v53  ;;  %vm5386_vm14 = vmmov %vm5384_vm0 }
 0x19e   : > { %3120 = vrot.lane.b32.xlu1 %v3119_v11, %s3532_s17  ;;  %1359 = vmatpush.msrb.mxu3 %v1244_v28  ;;  %v1288_v11 = vld [vmem:[%s5337_s5 + $0x160] sm:$0xff]  ;;  %vm5387_vm15 = vmmov %vm5384_vm0 }
 0x19f   : > { %1360 = vmatmul.f32.vlgmr.msrb.gmra.mxu3 %v1212_v49  ;;  %1388 = vmatpush.msra.mxu1 %v1272_v52  ;;  %v1280_v37 = vld [vmem:[%s5337_s5 + $0x120] sm:$0xff]  ;;  %v1261_v49 = vld [vmem:[%s5337_s5 + $0x88] sm:$0xff]  ;;  %vm5388_vm2 = vmmov %vm5384_vm0 }
 0x1a0   : > { %1516 = vmatpush.msra.mxu3 %v1315_v48  ;;  %1429 = vmatpush.msra.mxu2 %v1288_v11  ;;  %v1296_v28 = vld [vmem:[%s5337_s5 + $0x1a0] sm:$0xff]  ;;  %v1294_v48 = vld [vmem:[%s5337_s5 + $0x190] sm:$0xff]  ;;  %v1277_v52 = vld [vmem:[%s5337_s5 + $0x108] sm:$0xff] }
 0x1a1   : > { %1389 = vmatpush.msra.mxu1 %v1271_v54  ;;  %1471 = vmatpush.msrb.mxu0 %v1303_v56  ;;  %v1293_v11 = vld [vmem:[%s5337_s5 + $0x188] sm:$0xff]  ;;  %v1312_v53 = vld [vmem:[%s5337_s5 + $0x220] sm:$0xff]  ;;  %vm5389_vm3 = vmmov %vm5384_vm0 }
 0x1a2   : > { %1430 = vmatpush.msra.mxu2 %v1287_v31  ;;  %v1260_v54 = vld [vmem:[%s5337_s5 + $0x80] sm:$0xff]  ;;  %vm5390_vm4 = vmmov %vm5384_vm0 }
 0x1a3   : > { %1472 = vmatpush.msrb.mxu0 %v1302_v34  ;;  %v1276_v31 = vld [vmem:[%s5337_s5 + $0x100] sm:$0xff]  ;;  %v1311_v34 = vld [vmem:[%s5337_s5 + $0x218] sm:$0xff]  ;;  %vm5391_vm5 = vmmov %vm5384_vm0 }
 0x1a4   : > { %3115 = vrot.lane.b32.xlu0 %v3114_v60, %s3532_s17  ;;  %v1269_v60 = vld [vmem:[%s5337_s5 + $0xc8] sm:$0xff]  ;;  %v1292_v56 = vld [vmem:[%s5337_s5 + $0x180] sm:$0xff]  ;;  %vm5392_vm6 = vmmov %vm5384_vm0 }
 0x1a5   : > { %3140 = vrot.lane.b32.xlu2 %v3139_v58, %s3532_s17  ;;  %v1270_v58 = vld [vmem:[%s5337_s5 + $0xd0] sm:$0xff]  ;;  %vm5393_vm7 = vmmov %vm5384_vm0 }
 0x1a6   : > { %3135 = vrot.lane.b32.xlu1 %v3134_v59, %s3532_s17  ;;  %v1286_v59 = vld [vmem:[%s5337_s5 + $0x150] sm:$0xff]  ;;  %1390 = vmatpush.msra.mxu1 %v1270_v58 }
 0x1a7   : > { %1431 = vmatpush.msra.mxu2 %v1286_v59 }
 0x1a8   : > { %1391 = vmatpush.msra.mxu1 %v1269_v60 }
 0x1ac   : > { %3130 = vrot.lane.b32.xlu0 %v3129_v0, %s3532_s17  ;;  %v1301_v0 = vld [vmem:[%s5337_s5 + $0x1c8] sm:$0xff] }
 0x1ad   : > { %1138 = vrot.lane.b32.xlu2 %v4112_v46, %s3532_s17  ;;  %1473 = vmatpush.msrb.mxu0 %v1301_v0 }
 0x1ae   : > { %3150 = vrot.lane.b32.xlu1 %v3149_v63, %s3532_s17  ;;  %v1285_v63 = vld [vmem:[%s5337_s5 + $0x148] sm:$0xff] }
 0x1af   : > { %1432 = vmatpush.msra.mxu2 %v1285_v63  ;;  %1474 = vmatpush.msrb.mxu0 %v1300_v5 }
 0x1b1   : > { %1433 = vmatpush.msra.mxu2 %v1284_v41  ;;  %1475 = vmatpush.msrb.mxu0 %v1299_v42 }
 0x1b3   : > { %1434 = vmatpush.msra.mxu2 %v1283_v35  ;;  %1476 = vmatpush.msrb.mxu0 %v1298_v15 }
 0x1b4   : > { %3145 = vrot.lane.b32.xlu0 %v3144_v2, %s3532_s17  ;;  %v1314_v2 = vld [vmem:[%s5337_s5 + $0x230] sm:$0xff] }
 0x1b5   : > { %1517 = vmatpush.msra.mxu3 %v1314_v2  ;;  %1435 = vmatpush.msra.mxu2 %v1282_v6  ;;  %v1310_v2 = vld [vmem:[%s5337_s5 + $0x210] sm:$0xff]  ;;  %v1308_v6 = vld [vmem:[%s5337_s5 + $0x200] sm:$0xff] }
 0x1b6   : > { %1477 = vmatpush.msrb.mxu0 %v1297_v21 }
 0x1b7   : > { %1436 = vmatpush.msra.mxu2 %v1281_v17  ;;  %1518 = vmatpush.msra.mxu3 %v1313_v22 }
 0x1b8   : > { %1478 = vmatpush.msrb.mxu0 %v1296_v28 }
 0x1b9   : > { %1437 = vmatpush.msra.mxu2 %v1280_v37  ;;  %1519 = vmatpush.msra.mxu3 %v1312_v53 }
 0x1ba   : > { %1479 = vmatpush.msrb.mxu0 %v1295_v19 }
 0x1bb   : > { %1438 = vmatpush.msra.mxu2 %v1279_v23  ;;  %1520 = vmatpush.msra.mxu3 %v1311_v34 }
 0x1bc   : > { %1202 = vrot.lane.b32.xlu0 %v1075_v3, %s3532_s17  ;;  %v1268_v3 = vld [vmem:[%s5337_s5 + $0xc0] sm:$0xff]  ;;  %1480 = vmatpush.msrb.mxu0 %v1294_v48 }
 0x1bd   : > { %1392 = vmatpush.msra.mxu1 %v1268_v3  ;;  %1439 = vmatpush.msra.mxu2 %v1278_v47 }
 0x1be   : > { %1481 = vmatpush.msrb.mxu0 %v1293_v11  ;;  %1521 = vmatpush.msra.mxu3 %v1310_v2 }
 0x1bf   : > { %1393 = vmatpush.msra.mxu1 %v1267_v10  ;;  %1440 = vmatpush.msra.mxu2 %v1277_v52 }
 0x1c0   : > { %1482 = vmatpush.msrb.mxu0 %v1292_v56 }
 0x1c1   : > { %1394 = vmatpush.msra.mxu1 %v1266_v40  ;;  %1441 = vmatpush.msra.mxu2 %v1276_v31 }
 0x1c3   : > { %1395 = vmatpush.msra.mxu1 %v1265_v16  ;;  %v4332_v16 = vld [vmem:[#allocation2 + $0x2] sm:$0xff] }
 0x1c5   : > { %1396 = vmatpush.msra.mxu1 %v1264_v24 }
 0x1c7   : > { %1397 = vmatpush.msra.mxu1 %v1263_v32 }
 0x1c9   : > { %1398 = vmatpush.msra.mxu1 %v1262_v33 }
 0x1cb   : > { %1399 = vmatpush.msra.mxu1 %v1261_v49 }
 0x1cd   : > { %1400 = vmatpush.msra.mxu1 %v1260_v54 }
 0x1df   : > { %v1099_v0 = vpop.permute.xlu2 %1098 }
 0x1e0   : > { %v1215_v40 = vsel %vm540_vm1, %v4092_v57, %v1099_v0 }
 0x1e7   : > { %v3096_v42 = vpop.permute.xlu2 %3095 }
 0x1e8   : > { %v3097_v52 = vunpack.i.l.bf16 %v3096_v42 }
 0x1ea   : > { %v1218_v31 = vsel %vm540_vm1, %v4076_v12, %v3097_v52 }
 0x1ef   : > { %v3111_v37 = vpop.permute.xlu2 %3110 }
 0x1f0   : > { %v3112_v28 = vunpack.i.l.bf16 %v3111_v37  ;;  %v3113_v11 = vunpack.i.h.bf16 %v3111_v37 }
 0x1f2   : > { %v1221_v47 = vsel %vm540_vm1, %v4066_v50, %v3112_v28  ;;  %v4388_v28 = vld [vmem:[#allocation2 + $0x90] sm:$0xff] }
 0x1f8   : > { %v1097_v58 = vpop.permute.xlu1 %1096 }
 0x1f9   : > { %v1214_v3 = vsel %vm540_vm1, %v4031_v27, %v1097_v58 }
 0x1fb   : > { %v1095_v59 = vpop.permute.xlu0 %1094 }
 0x1fc   : > { %v1213_v60 = vsel %vm540_vm1, %v4064_v51, %v1095_v59  ;;  %v1309_v51 = vld [vmem:[%s5337_s5 + $0x208] sm:$0xff]  ;;  %v3098_v59 = vunpack.i.h.bf16 %v3096_v42 }
 0x1fd   : > { %1363 = vmatmul.f32.gmra.mxu3 %v1213_v60 }
 0x1fe   : > { %1522 = vmatpush.msra.mxu3 %v1309_v51  ;;  %v1219_v0 = vsel %vm540_vm1, %v4122_v1, %v3098_v59  ;;  %v1603_v59 = vld [vmem:[%s5341_s9 + $0x10] sm:$0xff] }
 0x200   : > { %v1103_v63 = vpop.permute.xlu1 %1102  ;;  %1523 = vmatpush.msra.mxu3 %v1308_v6 }
 0x201   : > { %v1217_v33 = vsel %vm540_vm1, %v4110_v62, %v1103_v63 }
 0x205   : > { %1366 = vmatmul.f32.gmra.mxu3 %v1214_v3 }
 0x206   : > { %v1101_v10 = vpop.permute.xlu0 %1100 }
 0x207   : > { %v1216_v21 = vsel %vm540_vm1, %v4051_v20, %v1101_v10 }
 0x208   : > { %v3106_v41 = vpop.permute.xlu1 %3105 }
 0x209   : > { %v3108_v5 = vunpack.i.h.bf16 %v3106_v41  ;;  %v3107_v32 = vunpack.i.l.bf16 %v3106_v41 }
 0x20b   : > { %v1236_v35 = vsel %vm540_vm1, %v4031_v27, %v3108_v5  ;;  %v1229_v48 = vsel %vm540_vm1, %v4002_v25, %v3107_v32  ;;  %v1230_v25 = vsel %vm540_vm1, %v3996_v14, %v3113_v11 }
 0x20c   : > { %1483 = vmatmul.f32.vlgmr.msrb.gmra.mxu0 %v1236_v35 }
 0x20d   : > { %1369 = vmatmul.f32.gmra.mxu3 %v1215_v40 }
 0x20e   : > { %v3101_v15 = vpop.permute.xlu0 %3100 }
 0x20f   : > { %v3103_v27 = vunpack.i.h.bf16 %v3101_v15  ;;  %v3102_v17 = vunpack.i.l.bf16 %v3101_v15 }
 0x210   : > { %v3121_v49 = vpop.permute.xlu1 %3120 }
 0x211   : > { %v1220_v22 = vsel %vm540_vm1, %v4332_v16, %v3103_v27  ;;  %v1228_v24 = vsel %vm540_vm1, %v4009_v4, %v3102_v17  ;;  %v3123_v54 = vunpack.i.h.bf16 %v3121_v49  ;;  %v3122_v60 = vunpack.i.l.bf16 %v3121_v49 }
 0x212   : > { %1401 = vmatmul.f32.vlgmr.msra.gmra.mxu1 %v1220_v22  ;;  %1442 = vmatmul.f32.vlgmr.msra.gmra.mxu2 %v1228_v24 }
 0x213   : > { %v1238_v56 = vsel %vm540_vm1, %v4051_v20, %v3123_v54  ;;  %v1231_v14 = vsel %vm540_vm1, %v4045_v36, %v3122_v60 }
 0x215   : > { %1372 = vmatmul.f32.gmra.mxu3 %v1216_v21 }
 0x216   : > { %v3116_v23 = vpop.permute.xlu0 %3115 }
 0x217   : > { %v3117_v19 = vunpack.i.l.bf16 %v3116_v23  ;;  %v3118_v53 = vunpack.i.h.bf16 %v3116_v23 }
 0x218   : > { %v3136_v3 = vpop.permute.xlu1 %3135 }
 0x219   : > { %v1237_v4 = vsel %vm540_vm1, %v4092_v57, %v3117_v19  ;;  %v1222_v50 = vsel %vm540_vm1, %v4035_v29, %v3118_v53  ;;  %v3126_v57 = vpop.permute.xlu2 %3125  ;;  %v3138_v10 = vunpack.i.h.bf16 %v3136_v3  ;;  %v3137_v6 = vunpack.i.l.bf16 %v3136_v3 }
 0x21a   : > { %1404 = vmatmul.f32.gmra.mxu1 %v1221_v47  ;;  %1445 = vmatmul.f32.gmra.mxu2 %v1229_v48  ;;  %v3127_v34 = vunpack.i.l.bf16 %v3126_v57  ;;  %v3128_v41 = vunpack.i.h.bf16 %v3126_v57 }
 0x21b   : > { %1486 = vmatmul.f32.gmra.mxu0 %v1237_v4 }
 0x21c   : > { %v1223_v2 = vsel %vm540_vm1, %v4033_v7, %v3127_v34  ;;  %v1232_v51 = vsel %vm540_vm1, %v4024_v18, %v3128_v41  ;;  %v1233_v18 = vsel %vm540_vm1, %v4014_v8, %v3137_v6 }
 0x21d   : > { %1375 = vmatmul.f32.gmra.mxu3 %v1217_v33  ;;  %v4405_v33 = vpop.f32.mrf.mxu0 }
 0x21e   : > { %v3131_v58 = vpop.permute.xlu0 %3130 }
 0x21f   : > { %v3132_v63 = vunpack.i.l.bf16 %v3131_v58  ;;  %v3133_v5 = vunpack.i.h.bf16 %v3131_v58 }
 0x221   : > { %v1239_v20 = vsel %vm540_vm1, %v4110_v62, %v3132_v63  ;;  %v1224_v35 = vsel %vm540_vm1, %v4059_v26, %v3133_v5  ;;  %v3141_v36 = vpop.permute.xlu2 %3140  ;;  %v1240_v62 = vsel %vm540_vm1, %v4076_v12, %v3138_v10  ;;  %v3151_v12 = vpop.permute.xlu1 %3150 }
 0x222   : > { %1407 = vmatmul.f32.gmra.mxu1 %v1222_v50  ;;  %1448 = vmatmul.f32.gmra.mxu2 %v1230_v25  ;;  %v3142_v40 = vunpack.i.l.bf16 %v3141_v36  ;;  %v3143_v17 = vunpack.i.h.bf16 %v3141_v36  ;;  %v3153_v22 = vunpack.i.h.bf16 %v3151_v12  ;;  %v1361_v19 = vpop.f32.mrf.mxu3  ;;  %v1604_v50 = vld [vmem:[%s5341_s9 + $0x18] sm:$0xff]  ;;  %v3395_v36 = vld [vmem:[%s5338_s6] ss:$0 sm:$0xff] }
 0x223   : > { %1489 = vmatmul.f32.gmra.mxu0 %v1238_v56  ;;  %1643 = vmatpush.msrb.mxu2 %v1604_v50 }
 0x224   : > { %v1225_v27 = vsel %vm540_vm1, %v4047_v38, %v3142_v40  ;;  %v1234_v37 = vsel %vm540_vm1, %v4016_v9, %v3143_v17  ;;  %v1242_v8 = vsel %vm540_vm1, %v4112_v46, %v3153_v22  ;;  %v1083_v46 = vld [vmem:[#allocation2 + $0x92] sm:$0xff]  ;;  %1620 = vmatpush.msrb.mxu1 %v1604_v50  ;;  %v1362_v40 = vadd.f32 %v3395_v36, %v1361_v19 }
 0x225   : > { %1378 = vmatmul.f32.gmra.mxu3 %v1218_v31  ;;  %v4407_v47 = vpop.f32.mrf.mxu0  ;;  %1644 = vmatpush.msrb.mxu2 %v1603_v59 }
 0x226   : > { %v3146_v42 = vpop.permute.xlu0 %3145  ;;  %1621 = vmatpush.msrb.mxu1 %v1603_v59 }
 0x227   : > { %v3147_v15 = vunpack.i.l.bf16 %v3146_v42  ;;  %v3148_v21 = vunpack.i.h.bf16 %v3146_v42 }
 0x229   : > { %v1226_v24 = vsel %vm540_vm1, %v4087_v55, %v3148_v21  ;;  %v1139_v32 = vpop.permute.xlu2 %1138 }
 0x22a   : > { %1410 = vmatmul.f32.gmra.mxu1 %v1223_v2  ;;  %1451 = vmatmul.f32.gmra.mxu2 %v1231_v14  ;;  %v1227_v9 = vsel %vm540_vm1, %v4079_v30, %v1139_v32 }
 0x22b   : > { %1492 = vmatmul.f32.gmra.mxu0 %v1239_v20  ;;  %v1602_v20 = vld [vmem:[%s5341_s9 + $0x8] sm:$0xff] }
 0x22c   : > { %1645 = vmatpush.msrb.mxu2 %v1602_v20  ;;  %1622 = vmatpush.msrb.mxu1 %v1602_v20 }
 0x22d   : > { %1381 = vmatmul.f32.gmra.mxu3 %v1219_v0  ;;  %v4409_v4 = vpop.f32.mrf.mxu0 }
 0x232   : > { %1413 = vmatmul.f32.gmra.mxu1 %v1224_v35  ;;  %1454 = vmatmul.f32.gmra.mxu2 %v1232_v51 }
 0x233   : > { %1495 = vmatmul.f32.gmra.mxu0 %v1240_v62 }
 0x235   : > { %2999 = vmatmul.msk.f32.vlgmr.msra.gmra.mxu3 %vm540_vm1, %v4035_v29  ;;  %v1241_v29 = vsel %vm540_vm1, %v4122_v1, %v3147_v15  ;;  %v1203_v1 = vpop.permute.xlu0 %1202  ;;  %v4411_v52 = vpop.f32.mrf.mxu0 }
 0x236   : > { %v1243_v23 = vsel %vm540_vm1, %v4388_v28, %v1203_v1 }
 0x23a   : > { %1416 = vmatmul.f32.gmra.mxu1 %v1225_v27  ;;  %1457 = vmatmul.f32.gmra.mxu2 %v1233_v18 }
 0x23b   : > { %1498 = vmatmul.f32.gmra.mxu0 %v1241_v29 }
 0x23d   : > { %3000 = vmatmul.msk.f32.gmra.mxu3 %vm540_vm1, %v4033_v7  ;;  %v3152_v7 = vunpack.i.l.bf16 %v3151_v12 }
 0x242   : > { %1419 = vmatmul.f32.gmra.mxu1 %v1226_v24  ;;  %1460 = vmatmul.f32.gmra.mxu2 %v1234_v37 }
 0x243   : > { %1501 = vmatmul.f32.gmra.mxu0 %v1242_v8 }
 0x245   : > { %3001 = vmatmul.msk.f32.gmra.mxu3 %vm540_vm1, %v4059_v26  ;;  %v1235_v26 = vsel %vm540_vm1, %v4108_v61, %v3152_v7 }
 0x24a   : > { %1422 = vmatmul.f32.gmra.mxu1 %v1227_v9  ;;  %1463 = vmatmul.f32.gmra.mxu2 %v1235_v26 }
 0x24b   : > { %1504 = vmatmul.f32.gmra.mxu0 %v1243_v23 }
 0x24d   : > { %3002 = vmatmul.msk.f32.gmra.mxu3 %vm540_vm1, %v4047_v38 }
 0x255   : > { %3003 = vmatmul.msk.f32.gmra.mxu3 %vm540_vm1, %v4087_v55 }
 0x25d   : > { %3004 = vmatmul.msk.f32.gmra.mxu3 %vm540_vm1, %v4079_v30 }
 0x265   : > { %3005 = vmatmul.msk.f32.gmra.mxu3 %vm540_vm1, %v4106_v13 }
 0x26d   : > { %3006 = vmatmul.msk.f32.gmra.mxu3 %vm540_vm1, %v1083_v46 }
 0x280   : > { %v1364_v61 = vpop.f32.mrf.mxu3 }
 0x281   : > { %v1365_v62 = vadd.f32 %v3395_v36, %v1364_v61 }
 0x288   : > { %v1367_v38 = vpop.f32.mrf.mxu3 }
 0x289   : > { %v1484_v13 = vpop.f32.mrf.mxu0  ;;  %v1368_v15 = vadd.f32 %v3395_v36, %v1367_v38 }
 0x28f   : > { %v1402_v49 = vpop.f32.mrf.mxu1 }
 0x290   : > { %v1370_v48 = vpop.f32.mrf.mxu3  ;;  %v1403_v27 = vadd.f32 %v1402_v49, %v1362_v40 }
 0x291   : > { %v1371_v18 = vadd.f32 %v3395_v36, %v1370_v48 }
 0x295   : > { %v1443_v11 = vpop.f32.mrf.mxu2 }
 0x296   : > { %v1444_v21 = vadd.f32 %v1443_v11, %v1403_v27 }
 0x297   : > { %v1405_v54 = vpop.f32.mrf.mxu1 }
 0x298   : > { %v1373_v55 = vpop.f32.mrf.mxu3  ;;  %v1487_v57 = vpop.f32.mrf.mxu0  ;;  %v1406_v6 = vadd.f32 %v1405_v54, %v1365_v62  ;;  %v1485_v26 = vadd.f32 %v1484_v13, %v1444_v21 }
 0x299   : > { %v1374_v37 = vadd.f32 %v3395_v36, %v1373_v55  ;;  %v1601_v55 = vld [vmem:[%s5341_s9] sm:$0xff] }
 0x29a   : > { %1646 = vmatpush.msrb.mxu2 %v1601_v55  ;;  %1623 = vmatpush.msrb.mxu1 %v1601_v55 }
 0x29d   : > { %v1446_v31 = vpop.f32.mrf.mxu2 }
 0x29e   : > { %v1447_v29 = vadd.f32 %v1446_v31, %v1406_v6 }
 0x29f   : > { %v1408_v56 = vpop.f32.mrf.mxu1 }
 0x2a0   : > { %v1376_v30 = vpop.f32.mrf.mxu3  ;;  %v1490_v60 = vpop.f32.mrf.mxu0  ;;  %v1409_v17 = vadd.f32 %v1408_v56, %v1368_v15  ;;  %v1488_v32 = vadd.f32 %v1487_v57, %v1447_v29 }
 0x2a1   : > { %v1377_v23 = vadd.f32 %v3395_v36, %v1376_v30 }
 0x2a5   : > { %v1449_v58 = vpop.f32.mrf.mxu2 }
 0x2a6   : > { %v1450_v8 = vadd.f32 %v1449_v58, %v1409_v17 }
 0x2a7   : > { %v1411_v63 = vpop.f32.mrf.mxu1 }
 0x2a8   : > { %v1379_v53 = vpop.f32.mrf.mxu3  ;;  %v1493_v14 = vpop.f32.mrf.mxu0  ;;  %v1412_v22 = vadd.f32 %v1411_v63, %v1371_v18  ;;  %v1491_v49 = vadd.f32 %v1490_v60, %v1450_v8 }
 0x2a9   : > { %v1380_v61 = vadd.f32 %v3395_v36, %v1379_v53 }
 0x2ad   : > { %v1452_v0 = vpop.f32.mrf.mxu2 }
 0x2ae   : > { %v1453_v1 = vadd.f32 %v1452_v0, %v1412_v22 }
 0x2af   : > { %v1414_v3 = vpop.f32.mrf.mxu1 }
 0x2b0   : > { %v4416_v25 = vpop.f32.mrf.mxu3  ;;  %v1496_v10 = vpop.f32.mrf.mxu0  ;;  %v1415_v9 = vadd.f32 %v1414_v3, %v1374_v37  ;;  %v1494_v11 = vadd.f32 %v1493_v14, %v1453_v1 }
 0x2b1   : > { %v1383_v20 = vadd.f32 %v3395_v36, %v4416_v25 }
 0x2b5   : > { %v1455_v5 = vpop.f32.mrf.mxu2 }
 0x2b6   : > { %v1456_v38 = vadd.f32 %v1455_v5, %v1415_v9 }
 0x2b7   : > { %v1417_v51 = vpop.f32.mrf.mxu1 }
 0x2b8   : > { %v1525_v34 = vpop.f32.mrf.mxu3  ;;  %v1499_v24 = vpop.f32.mrf.mxu0  ;;  %v1418_v48 = vadd.f32 %v1417_v51, %v1377_v23  ;;  %v1497_v58 = vadd.f32 %v1496_v10, %v1456_v38 }
 0x2b9   : > { %v4429_v54 = vadd.f32 %v1525_v34, %v1485_v26 }
 0x2bb   : > { %v1571_v59 = vmul.f32 %v4429_v54, %v4429_v54  ;;  %v1549_v3 = vsel %vm5380_vm9, %v4429_v54, 0.0  ;;  %vm5395_vm9 = vmmov %vm5384_vm0 }
 0x2bd   : > { %v1458_v42 = vpop.f32.mrf.mxu2  ;;  %v1579_v62 = vsel %vm5383_vm12, %v1571_v59, 0.0 }
 0x2be   : > { %v1459_v50 = vadd.f32 %v1458_v42, %v1418_v48 }
 0x2bf   : > { %v1420_v7 = vpop.f32.mrf.mxu1 }
 0x2c0   : > { %v1528_v2 = vpop.f32.mrf.mxu3  ;;  %v1421_v57 = vadd.f32 %v1420_v7, %v1380_v61  ;;  %v1502_v34 = vpop.f32.mrf.mxu0  ;;  %v1500_v14 = vadd.f32 %v1499_v24, %v1459_v50 }
 0x2c1   : > { %v4427_v46 = vadd.f32 %v1528_v2, %v1488_v32 }
 0x2c3   : > { %v1572_v13 = vmul.f32 %v4427_v46, %v4427_v46  ;;  %v1550_v60 = vsel %vm5379_vm8, %v4427_v46, 0.0  ;;  %vm5394_vm8 = vmmov %vm5384_vm0 }
 0x2c4   : > { %v1551_v42 = vadd.f32 %v1550_v60, %v1549_v3 }
 0x2c5   : > { %v1461_v19 = vpop.f32.mrf.mxu2 }
 0x2c6   : > { %v1462_v53 = vadd.f32 %v1461_v19, %v1421_v57 }
 0x2c7   : > { %v1423_v63 = vpop.f32.mrf.mxu1 }
 0x2c8   : > { %v1531_v41 = vpop.f32.mrf.mxu3  ;;  %v1503_v51 = vadd.f32 %v1502_v34, %v1462_v53  ;;  %v1424_v40 = vadd.f32 %v1423_v63, %v1383_v20  ;;  %v1505_v8 = vpop.f32.mrf.mxu0 }
 0x2c9   : > { %v4434_v30 = vadd.f32 %v1531_v41, %v1491_v49  ;;  %v1580_v41 = vsel %vm5381_vm10, %v1572_v13, 0.0  ;;  %vm5396_vm10 = vmmov %vm5384_vm0 }
 0x2ca   : > { %v1581_v29 = vadd.f32 %v1580_v41, %v1579_v62 }
 0x2cb   : > { %v1573_v0 = vmul.f32 %v4434_v30, %v4434_v30  ;;  %v1552_v5 = vsel %vm5382_vm11, %v4434_v30, 0.0 }
 0x2cd   : > { %v1464_v6 = vpop.f32.mrf.mxu2  ;;  %v1582_v36 = vsel %vm5384_vm0, %v1573_v0, 0.0 }
 0x2ce   : > { %v1465_v17 = vadd.f32 %v1464_v6, %v1424_v40  ;;  %v1583_v37 = vadd.f32 %v1582_v36, %v1581_v29 }
 0x2d0   : > { %v1534_v35 = vpop.f32.mrf.mxu3  ;;  %v1506_v19 = vadd.f32 %v1505_v8, %v1465_v17  ;;  %v1653_v8 = vld [vmem:[%s5339_s7] sm:$0x1] }
 0x2d1   : > { %v4438_v56 = vadd.f32 %v1534_v35, %v1494_v11 }
 0x2d3   : > { %v1574_v10 = vmul.f32 %v4438_v56, %v4438_v56  ;;  %v1554_v15 = vsel %vm5385_vm13, %v4438_v56, 0.0 }
 0x2d5   : > { %v1584_v21 = vsel %vm5386_vm14, %v1574_v10, 0.0 }
 0x2d6   : > { %v1585_v9 = vadd.f32 %v1584_v21, %v1583_v37 }
 0x2d8   : > { %v1537_v12 = vpop.f32.mrf.mxu3 }
 0x2d9   : > { %v4446_v2 = vadd.f32 %v1537_v12, %v1497_v58  ;;  %v1553_v12 = vadd.f32 %v1552_v5, %v1551_v42 }
 0x2db   : > { %v1575_v27 = vmul.f32 %v4446_v2, %v4446_v2  ;;  %v1556_v22 = vsel %vm5387_vm15, %v4446_v2, 0.0  ;;  %v1555_v7 = vadd.f32 %v1554_v15, %v1553_v12 }
 0x2dd   : > { %v1586_v1 = vsel %vm5388_vm2, %v1575_v27, 0.0  ;;  %v1557_v26 = vadd.f32 %v1556_v22, %v1555_v7 }
 0x2de   : > { %v1587_v48 = vadd.f32 %v1586_v1, %v1585_v9 }
 0x2e0   : > { %v1540_v31 = vpop.f32.mrf.mxu3 }
 0x2e1   : > { %v4456_v35 = vadd.f32 %v1540_v31, %v1500_v14 }
 0x2e3   : > { %v1576_v24 = vmul.f32 %v4456_v35, %v4456_v35  ;;  %v1558_v32 = vsel %vm5389_vm3, %v4456_v35, 0.0 }
 0x2e4   : > { %v1559_v49 = vadd.f32 %v1558_v32, %v1557_v26 }
 0x2e5   : > { %v1588_v61 = vsel %vm5390_vm4, %v1576_v24, 0.0 }
 0x2e6   : > { %v1589_v50 = vadd.f32 %v1588_v61, %v1587_v48 }
 0x2e8   : > { %v1543_v25 = vpop.f32.mrf.mxu3 }
 0x2e9   : > { %v4464_v18 = vadd.f32 %v1543_v25, %v1503_v51 }
 0x2eb   : > { %v1577_v23 = vmul.f32 %v4464_v18, %v4464_v18  ;;  %v1560_v38 = vsel %vm5391_vm5, %v4464_v18, 0.0 }
 0x2ec   : > { %v1561_v57 = vadd.f32 %v1560_v38, %v1559_v49 }
 0x2ed   : > { %v1590_v31 = vsel %vm5392_vm6, %v1577_v23, 0.0  ;;  %v1666_v23 = vld [vmem:[%s5340_s8] sm:$0x1] }
 0x2ee   : > { %v1591_v58 = vadd.f32 %v1590_v31, %v1589_v50 }
 0x2f0   : > { %v1546_v11 = vpop.f32.mrf.mxu3 }
 0x2f1   : > { %v1547_v55 = vadd.f32 %v1546_v11, %v1506_v19 }
 0x2f3   : > { %v1562_v13 = vsel %vm5393_vm7, %v1547_v55, 0.0  ;;  %v1578_v53 = vmul.f32 %v1547_v55, %v1547_v55 }
 0x2f4   : > { %v1563_v59 = vadd.f32 %v1562_v13, %v1561_v57 }
 0x2f5   : > { %v1592_v34 = vsel %vm5394_vm8, %v1578_v53, 0.0 }
 0x2f6   : > { %v1564_v60 = vrot.slane %v1563_v59, 4  ;;  %v1593_v63 = vadd.f32 %v1592_v34, %v1591_v58 }
 0x2f8   : > { %v1565_v0 = vadd.f32 %v1564_v60, %v1563_v59  ;;  %v1594_v14 = vrot.slane %v1593_v63, 4 }
 0x2fa   : > { %v1566_v20 = vrot.slane %v1565_v0, 2  ;;  %v1595_v3 = vadd.f32 %v1594_v14, %v1593_v63 }
 0x2fc   : > { %v1567_v41 = vadd.f32 %v1566_v20, %v1565_v0  ;;  %v1596_v5 = vrot.slane %v1595_v3, 2 }
 0x2fe   : > { %v1568_v10 = vrot.slane %v1567_v41, 1  ;;  %v1597_v51 = vadd.f32 %v1596_v5, %v1595_v3 }
 0x300   : > { %v1569_v62 = vadd.f32 %v1568_v10, %v1567_v41  ;;  %v1598_v42 = vrot.slane %v1597_v51, 1 }
 0x302   : > { %v1570_v40 = vmul.f32 0.015625, %v1569_v62  ;;  %v1599_v6 = vadd.f32 %v1598_v42, %v1597_v51 }
 0x304   : > { %3007 = vmatmul.msk.f32.vlgmr.msrb.gmra.mxu1 %vm5395_vm9, %v1570_v40  ;;  %v1600_v25 = vmul.f32 0.015625, %v1599_v6 }
 0x306   : > { %3008 = vmatmul.msk.f32.vlgmr.msrb.gmra.mxu2 %vm5396_vm10, %v1600_v25 }
 0x381   : > { %v1625_v36 = vpop.f32.mrf.mxu1 }
 0x382   : > { %v1651_v15 = vmul.f32 %v1625_v36, %v1625_v36 }
 0x389   : > { %v1648_v27 = vpop.f32.mrf.mxu2 }
 0x38a   : > { %v1652_v29 = vsub.f32 %v1648_v27, %v1651_v15 }
 0x38c   : > { %v1654_v12 = vadd.f32 1e-06, %v1652_v29 }
 0x38e   : > { %3432 = vrsqrt.f32 %v1654_v12  ;;  %vm1661_vm12 = vweird.f32 %v1654_v12 }
 0x394   : > { %v3433_v17 = vpop.eup %3432 }
 0x395   : > { %v1656_v21 = vmul.f32 %v3433_v17, %v1654_v12  ;;  %vm1662_vm11 = vweird.f32 %v3433_v17 }
 0x396   : > { %vm1663_vm0 = vmor %vm1661_vm12, %vm1662_vm11 }
 0x397   : > { %v1657_v22 = vmul.f32 %v3433_v17, %v1656_v21 }
 0x399   : > { %v1658_v24 = vmul.f32 0.5, %v1657_v22 }
 0x39b   : > { %v1659_v37 = vsub.f32 1.5, %v1658_v24 }
 0x39d   : > { %v1660_v7 = vmul.f32 %v3433_v17, %v1659_v37 }
 0x39f   : > { %v1664_v1 = vsel %vm1663_vm0, %v3433_v17, %v1660_v7 }
 0x3a0   : > { %v1665_v32 = vmul.f32 %v1664_v1, %v1653_v8  ;;  %v2207_v1 = vld [vmem:[%s5342_s10 + $0x118] sm:$0xff] }
 0x3a1   : > { %2330 = vmatpush.msra.mxu2 %v2207_v1 }
 0x3a2   : > { %v1667_v9 = vmul.f32 %v1665_v32, %v1625_v36  ;;  %v1670_v26 = vperm.slane %v1665_v32, 0  ;;  %v2206_v32 = vld [vmem:[%s5342_s10 + $0x110] sm:$0xff] }
 0x3a3   : > { %2331 = vmatpush.msra.mxu2 %v2206_v32 }
 0x3a4   : > { %v1668_v19 = vsub.f32 %v1666_v23, %v1667_v9  ;;  %v1672_v61 = vmul.f32 %v1670_v26, %v4429_v54  ;;  %v1673_v38 = vmul.f32 %v1670_v26, %v4427_v46  ;;  %v1674_v48 = vmul.f32 %v1670_v26, %v4434_v30 }
 0x3a5   : > { %v1675_v49 = vmul.f32 %v1670_v26, %v4438_v56  ;;  %v1676_v31 = vmul.f32 %v1670_v26, %v4446_v2  ;;  %v1677_v50 = vmul.f32 %v1670_v26, %v4456_v35  ;;  %v1678_v54 = vmul.f32 %v1670_v26, %v4464_v18 }
 0x3a6   : > { %v1681_v11 = vperm.slane %v1668_v19, 0  ;;  %v1679_v56 = vmul.f32 %v1670_v26, %v1547_v55 }
 0x3a8   : > { %v4496_v57 = vadd.f32 %v1681_v11, %v1672_v61  ;;  %v4498_v13 = vadd.f32 %v1681_v11, %v1673_v38  ;;  %v4500_v53 = vadd.f32 %v1681_v11, %v1674_v48  ;;  %v4502_v58 = vadd.f32 %v1681_v11, %v1675_v49 }
 0x3a9   : > { %v4505_v46 = vadd.f32 %v1681_v11, %v1676_v31  ;;  %v4507_v30 = vadd.f32 %v1681_v11, %v1677_v50  ;;  %v4512_v34 = vadd.f32 %v1681_v11, %v1678_v54  ;;  %v4515_v63 = vadd.f32 %v1681_v11, %v1679_v56  ;;  %v2205_v11 = vld [vmem:[%s5342_s10 + $0x108] sm:$0xff] }
 0x3aa   : > { %v3009_v59 = vmul.f32 -1.442695, %v4496_v57  ;;  %v3010_v2 = vmul.f32 -1.442695, %v4498_v13  ;;  %v3011_v35 = vmul.f32 -1.442695, %v4500_v53  ;;  %2332 = vmatpush.msra.mxu2 %v2205_v11 }
 0x3ab   : > { %v3012_v60 = vmul.f32 -1.442695, %v4502_v58  ;;  %v3013_v18 = vmul.f32 -1.442695, %v4505_v46  ;;  %v3014_v0 = vmul.f32 -1.442695, %v4507_v30 }
 0x3ac   : > { %3434 = vpow2.f32 %v3009_v59  ;;  %v3015_v55 = vmul.f32 -1.442695, %v4512_v34  ;;  %v3016_v14 = vmul.f32 -1.442695, %v4515_v63 }
 0x3ad   : > { %3436 = vpow2.f32 %v3010_v2 }
 0x3ae   : > { %3438 = vpow2.f32 %v3011_v35 }
 0x3af   : > { %3440 = vpow2.f32 %v3012_v60 }
 0x3b0   : > { %3442 = vpow2.f32 %v3013_v18 }
 0x3b1   : > { %3444 = vpow2.f32 %v3014_v0  ;;  %v2204_v0 = vld [vmem:[%s5342_s10 + $0x100] sm:$0xff] }
 0x3b2   : > { %v3435_v20 = vpop.eup %3434  ;;  %3446 = vpow2.f32 %v3015_v55  ;;  %2333 = vmatpush.msra.mxu2 %v2204_v0 }
 0x3b3   : > { %v3437_v3 = vpop.eup %3436  ;;  %v4521_v41 = vadd.f32 1.0, %v3435_v20  ;;  %3448 = vpow2.f32 %v3016_v14 }
 0x3b4   : > { %v3439_v5 = vpop.eup %3438  ;;  %v4523_v10 = vadd.f32 1.0, %v3437_v3 }
 0x3b5   : > { %v3441_v51 = vpop.eup %3440  ;;  %v4525_v62 = vadd.f32 1.0, %v3439_v5  ;;  %3450 = vrcp.f32 %v4521_v41  ;;  %v1734_v36 = vand.u32 2147483648, %v4521_v41  ;;  %vm1728_vm13 = vweird.f32 %v4521_v41 }
 0x3b6   : > { %v3443_v42 = vpop.eup %3442  ;;  %v4528_v40 = vadd.f32 1.0, %v3441_v51  ;;  %3452 = vrcp.f32 %v4523_v10  ;;  %v1749_v27 = vand.u32 2147483648, %v4523_v10  ;;  %v1732_v21 = vand.u32 2147483647, %v4521_v41 }
 0x3b7   : > { %v3445_v6 = vpop.eup %3444  ;;  %v4531_v25 = vadd.f32 1.0, %v3443_v42  ;;  %3454 = vrcp.f32 %v4525_v62  ;;  %v4548_v37 = vor.u32 1.1754944e-38, %v1734_v36  ;;  %vm1743_vm14 = vweird.f32 %v4523_v10 }
 0x3b8   : > { %v3447_v15 = vpop.eup %3446  ;;  %v4536_v12 = vadd.f32 1.0, %v3445_v6  ;;  %3456 = vrcp.f32 %v4528_v40  ;;  %v1747_v8 = vand.u32 2147483647, %v4523_v10  ;;  %v1764_v7 = vand.u32 2147483648, %v4525_v62 }
 0x3b9   : > { %v3449_v29 = vpop.eup %3448  ;;  %3458 = vrcp.f32 %v4531_v25  ;;  %v4559_v23 = vadd.f32 1.0, %v3447_v15  ;;  %v4563_v26 = vor.u32 1.1754944e-38, %v1749_v27  ;;  %vm1758_vm15 = vweird.f32 %v4525_v62 }
 0x3ba   : > { %v1762_v19 = vand.u32 2147483647, %v4525_v62  ;;  %v4569_v38 = vadd.f32 1.0, %v3449_v29  ;;  %v1777_v49 = vand.u32 2147483647, %v4528_v40  ;;  %3460 = vrcp.f32 %v4536_v12 }
 0x3bb   : > { %v4539_v17 = vpop.eup %3450  ;;  %vm4577_vm3 = vcmp.eq.f32.partialorder %v1732_v21, 8.507059e+37  ;;  %vm1773_vm4 = vweird.f32 %v4528_v40  ;;  %v1779_v56 = vand.u32 2147483648, %v4528_v40  ;;  %vm4586_vm5 = vcmp.eq.f32.partialorder %v1747_v8, 8.507059e+37 }
 0x3bc   : > { %v4544_v22 = vpop.eup %3452  ;;  %v1724_v24 = vmul.f32 %v4539_v17, %v4521_v41  ;;  %vm1729_vm2 = vweird.f32 %v4539_v17  ;;  %v1765_v60 = vor.u32 1.1754944e-38, %v1764_v7  ;;  %vm1788_vm6 = vweird.f32 %v4531_v25 }
 0x3bd   : > { %v1739_v9 = vmul.f32 %v4544_v22, %v4523_v10  ;;  %v4567_v61 = vpop.eup %3454  ;;  %v1792_v18 = vand.u32 2147483647, %v4531_v25  ;;  %vm1744_vm7 = vweird.f32 %v4544_v22  ;;  %vm4597_vm8 = vcmp.eq.f32.partialorder %v1762_v19, 8.507059e+37  ;;  %vm4616_vm11 = vmor %vm1728_vm13, %vm1729_vm2 }
 0x3be   : > { %v1725_v48 = vsub.f32 1.0, %v1724_v24  ;;  %v1754_v54 = vmul.f32 %v4567_v61, %v4525_v62  ;;  %v3457_v59 = vpop.eup %3456  ;;  %vm4603_vm9 = vcmp.eq.f32.partialorder %v1777_v49, 8.507059e+37  ;;  %v1794_v36 = vand.u32 2147483648, %v4531_v25  ;;  %vm4632_vm0 = vmor %vm1743_vm14, %vm1744_vm7 }
 0x3bf   : > { %v1740_v50 = vsub.f32 1.0, %v1739_v9  ;;  %v3459_v55 = vpop.eup %3458  ;;  %v1769_v5 = vmul.f32 %v3457_v59, %v4528_v40  ;;  %vm1759_vm10 = vweird.f32 %v4567_v61  ;;  %v1780_v8 = vor.u32 1.1754944e-38, %v1779_v56 }
 0x3c0   : > { %v1726_v2 = vmul.f32 %v4539_v17, %v1725_v48  ;;  %v1755_v20 = vsub.f32 1.0, %v1754_v54  ;;  %v1784_v6 = vmul.f32 %v3459_v55, %v4531_v25  ;;  %v3461_v21 = vpop.eup %3460  ;;  %vm4620_vm12 = vcmp.eq.f32.partialorder %v1792_v18, 8.507059e+37  ;;  %vm4644_vm2 = vmor %vm1758_vm15, %vm1759_vm10 }
 0x3c1   : > { %v1741_v14 = vmul.f32 %v4544_v22, %v1740_v50  ;;  %v1770_v29 = vsub.f32 1.0, %v1769_v5  ;;  %3462 = vrcp.f32 %v4559_v23  ;;  %vm1774_vm13 = vweird.f32 %v3457_v59 }
 0x3c2   : > { %v1727_v51 = vadd.f32 %v4539_v17, %v1726_v2  ;;  %v1756_v27 = vmul.f32 %v4567_v61, %v1755_v20  ;;  %v1785_v7 = vsub.f32 1.0, %v1784_v6  ;;  %vm1789_vm14 = vweird.f32 %v3459_v55  ;;  %vm1775_vm15 = vmor %vm1773_vm4, %vm1774_vm13 }
 0x3c3   : > { %v1742_v15 = vadd.f32 %v4544_v22, %v1741_v14  ;;  %v1771_v19 = vmul.f32 %v3457_v59, %v1770_v29  ;;  %v1799_v49 = vmul.f32 %v3461_v21, %v4536_v12  ;;  %v1795_v54 = vor.u32 1.1754944e-38, %v1794_v36  ;;  %vm1790_vm7 = vmor %vm1788_vm6, %vm1789_vm14 }
 0x3c4   : > { %v1731_v32 = vsel %vm4616_vm11, %v4539_v17, %v1727_v51  ;;  %v1757_v9 = vadd.f32 %v4567_v61, %v1756_v27  ;;  %v1786_v10 = vmul.f32 %v3459_v55, %v1785_v7  ;;  %v1809_v18 = vand.u32 2147483648, %v4536_v12 }
 0x3c5   : > { %v1746_v48 = vsel %vm4632_vm0, %v4544_v22, %v1742_v15  ;;  %v1772_v50 = vadd.f32 %v3457_v59, %v1771_v19  ;;  %v1807_v22 = vand.u32 2147483647, %v4536_v12  ;;  %v1736_v62 = vsel %vm4577_vm3, %v4548_v37, %v1731_v32 }
 0x3c6   : > { %v1761_v11 = vsel %vm4644_vm2, %v4567_v61, %v1757_v9  ;;  %v1787_v56 = vadd.f32 %v3459_v55, %v1786_v10  ;;  %v1800_v2 = vsub.f32 1.0, %v1799_v49  ;;  %v1751_v0 = vsel %vm4586_vm5, %v4563_v26, %v1746_v48 }
 0x3c7   : > { %v1776_v61 = vsel %vm1775_vm15, %v3457_v59, %v1772_v50  ;;  %vm1804_vm10 = vweird.f32 %v3461_v21  ;;  %3464 = vrcp.f32 %v4569_v38  ;;  %v3463_v31 = vpop.eup %3462  ;;  %v1766_v40 = vsel %vm4597_vm8, %v1765_v60, %v1761_v11 }
 0x3c8   : > { %v1781_v37 = vsel %vm4603_vm9, %v1780_v8, %v1776_v61  ;;  %v1791_v14 = vsel %vm1790_vm7, %v3459_v55, %v1787_v56  ;;  %v1801_v20 = vmul.f32 %v3461_v21, %v1800_v2  ;;  %v1814_v26 = vmul.f32 %v3463_v31, %v4559_v23  ;;  %v4690_v8 = vld [vmem:[#allocation2 + $0x1] sm:$0xff] }
 0x3c9   : > { %v1796_v35 = vsel %vm4620_vm12, %v1795_v54, %v1791_v14  ;;  %vm1803_vm3 = vweird.f32 %v4536_v12  ;;  %v1843_v25 = vmul.f32 %v1736_v62, %v4496_v57  ;;  %v1844_v5 = vmul.f32 %v1751_v0, %v4498_v13 }
 0x3ca   : > { %v1802_v59 = vadd.f32 %v3461_v21, %v1801_v20  ;;  %vm1805_vm4 = vmor %vm1803_vm3, %vm1804_vm10  ;;  %v1810_v3 = vor.u32 1.1754944e-38, %v1809_v18  ;;  %v1815_v60 = vsub.f32 1.0, %v1814_v26  ;;  %v1845_v51 = vmul.f32 %v1766_v40, %v4500_v53  ;;  %v2187_v20 = vld [vmem:[%s5342_s10 + $0x78] sm:$0xff] }
 0x3cb   : > { %v1846_v55 = vmul.f32 %v1781_v37, %v4502_v58  ;;  %vm1808_vm5 = vcmp.eq.f32.partialorder %v1807_v22, 8.507059e+37  ;;  %v1824_v6 = vand.u32 2147483648, %v4559_v23  ;;  %v1847_v36 = vmul.f32 %v1796_v35, %v4505_v46  ;;  %2236 = vmatpush.msra.mxu0 %v2187_v20  ;;  %v2175_v20 = vld [vmem:[%s5342_s10 + $0x18] sm:$0xff] }
 0x3cc   : > { %v1806_v42 = vsel %vm1805_vm4, %v3461_v21, %v1802_v59  ;;  %vm5413_vm6 = vcmask 261120   ;;  %v1816_v57 = vmul.f32 %v3463_v31, %v1815_v60  ;;  %vm1819_vm8 = vweird.f32 %v3463_v31  ;;  %v2186_v60 = vld [vmem:[%s5342_s10 + $0x70] sm:$0xff] }
 0x3cd   : > { %1851 = vst.msk [vmem:[#allocation2 + $0x11] sm:$0xff] %vm5413_vm6, %v1843_v25  ;;  %v3465_v12 = vpop.eup %3464  ;;  %v1811_v15 = vsel %vm1808_vm5, %v1810_v3, %v1806_v42  ;;  %v1822_v13 = vand.u32 2147483647, %v4559_v23  ;;  %vm5414_vm9 = vmmov %vm5413_vm6  ;;  %vm1818_vm12 = vweird.f32 %v4559_v23  ;;  %v1825_v46 = vor.u32 1.1754944e-38, %v1824_v6  ;;  %2237 = vmatpush.msra.mxu0 %v2186_v60  ;;  %v2193_v60 = vld [vmem:[%s5342_s10 + $0xa8] sm:$0xff] }
 0x3ce   : > { %1852 = vst.msk [vmem:[#allocation2 + $0x21] sm:$0xff] %vm5414_vm9, %v1844_v5  ;;  %v1829_v53 = vmul.f32 %v3465_v12, %v4569_v38  ;;  %v1848_v58 = vmul.f32 %v1811_v15, %v4507_v30  ;;  %vm5415_vm11 = vmmov %vm5413_vm6  ;;  %v1817_v27 = vadd.f32 %v3463_v31, %v1816_v57  ;;  %v1839_v24 = vand.u32 2147483648, %v4569_v38 }
 0x3cf   : > { %1853 = vst.msk [vmem:[#allocation2 + $0x31] sm:$0xff] %vm5415_vm11, %v1845_v51  ;;  %vm5416_vm0 = vmmov %vm5413_vm6  ;;  %vm1823_vm14 = vcmp.eq.f32.partialorder %v1822_v13, 8.507059e+37  ;;  %vm1834_vm7 = vweird.f32 %v3465_v12  ;;  %v1837_v23 = vand.u32 2147483647, %v4569_v38  ;;  %vm1833_vm10 = vweird.f32 %v4569_v38  ;;  %v2185_v51 = vld [vmem:[%s5342_s10 + $0x68] sm:$0xff] }
 0x3d0   : > { %1854 = vst.msk [vmem:[#allocation2 + $0x41] sm:$0xff] %vm5416_vm0, %v1846_v55  ;;  %vm1820_vm13 = vmor %vm1818_vm12, %vm1819_vm8  ;;  %v1830_v29 = vsub.f32 1.0, %v1829_v53  ;;  %v1840_v49 = vor.u32 1.1754944e-38, %v1839_v24  ;;  %v2184_v55 = vld [vmem:[%s5342_s10 + $0x60] sm:$0xff]  ;;  %2238 = vmatpush.msra.mxu0 %v2185_v51  ;;  %v2179_v24 = vld [vmem:[%s5342_s10 + $0x38] sm:$0xff] }
 0x3d1   : > { %vm5417_vm2 = vmmov %vm5416_vm0  ;;  %v1821_v21 = vsel %vm1820_vm13, %v3463_v31, %v1817_v27  ;;  %vm1838_vm6 = vcmp.eq.f32.partialorder %v1837_v23, 8.507059e+37  ;;  %v2181_v27 = vld [vmem:[%s5342_s10 + $0x48] sm:$0xff] }
 0x3d2   : > { %1855 = vst.msk [vmem:[#allocation2 + $0x51] sm:$0xff] %vm5417_vm2, %v1847_v36  ;;  %vm5418_vm15 = vmmov %vm5416_vm0  ;;  %v1826_v30 = vsel %vm1823_vm14, %v1825_v46, %v1821_v21  ;;  %v1831_v7 = vmul.f32 %v3465_v12, %v1830_v29  ;;  %v2203_v36 = vld [vmem:[%s5342_s10 + $0xf8] sm:$0xff]  ;;  %2239 = vmatpush.msra.mxu0 %v2184_v55  ;;  %v2180_v46 = vld [vmem:[%s5342_s10 + $0x40] sm:$0xff]  ;;  %vm2139_vm14 = vcmask 785408  }
 0x3d3   : > { %1856 = vst.msk [vmem:[#allocation2 + $0x61] sm:$0xff] %vm5418_vm15, %v1848_v58  ;;  %v1849_v1 = vmul.f32 %v1826_v30, %v4512_v34  ;;  %vm1835_vm3 = vmor %vm1833_vm10, %vm1834_vm7  ;;  %2277 = vmatpush.msra.mxu1 %v2203_v36  ;;  %v2182_v58 = vld [vmem:[%s5342_s10 + $0x50] sm:$0xff]  ;;  %v2173_v51 = vld [vmem:[%s5342_s10 + $0x8] sm:$0xff] }
 0x3d4   : > { %v1899_v32 = vld [vmem:[#allocation2 + $0x12] sm:$0xff]  ;;  %v1832_v9 = vadd.f32 %v3465_v12, %v1831_v7  ;;  %vm5419_vm4 = vmmov %vm5416_vm0  ;;  %v2192_v55 = vld [vmem:[%s5342_s10 + $0xa0] sm:$0xff] }
 0x3d5   : > { %v4694_v41 = vld [vmem:[#allocation2 + $0x10] sm:$0xff]  ;;  %v1923_v19 = vld [vmem:[#allocation2 + $0x22] sm:$0xff]  ;;  %v3154_v17 = vpack.i.bf16 %v1899_v32, %v4690_v8  ;;  %1857 = vst.msk [vmem:[#allocation2 + $0x71] sm:$0xff] %vm5419_vm4, %v1849_v1  ;;  %vm5420_vm5 = vmmov %vm5416_vm0 }
 0x3d6   : > { %v4697_v48 = vld [vmem:[#allocation2 + $0x20] sm:$0xff]  ;;  %3017 = vmatmul.msk.f32.vlgmr.msra.gmra.mxu2 %vm5420_vm5, %v1923_v19  ;;  %v1836_v38 = vsel %vm1835_vm3, %v3465_v12, %v1832_v9  ;;  %v4712_v22 = vld [vmem:[#allocation2 + $0x11] sm:$0xff]  ;;  %vm5422_vm8 = vmmov %vm5416_vm0 }
 0x3d7   : > { %v4700_v10 = vld [vmem:[#allocation2 + $0x21] sm:$0xff]  ;;  %v3159_v34 = vpack.i.bf16 %v4697_v48, %v4332_v16  ;;  %3155 = vrot.lane.b32.xlu1 %v3154_v17, %s5421_s12  ;;  %v1841_v50 = vsel %vm1838_vm6, %v1840_v49, %v1836_v38  ;;  %v4715_v16 = vld [vmem:[#allocation2 + $0x31] sm:$0xff]  ;;  %v3169_v2 = vpack.i.bf16 %v1923_v19, %v4712_v22  ;;  %vm5423_vm9 = vmmov %vm5416_vm0 }
 0x3d8   : > { %v3164_v11 = vpack.i.bf16 %v4700_v10, %v4694_v41  ;;  %v1850_v54 = vmul.f32 %v1841_v50, %v4515_v63  ;;  %v4717_v62 = vld [vmem:[#allocation2 + $0x30] sm:$0xff]  ;;  %v3179_v18 = vpack.i.bf16 %v4715_v16, %v4697_v48  ;;  %v4727_v63 = vld [vmem:[#allocation2 + $0x41] sm:$0xff]  ;;  %vm5424_vm11 = vmmov %vm5416_vm0 }
 0x3d9   : > { %3160 = vrot.lane.b32.xlu2 %v3159_v34, %s3532_s17  ;;  %v1924_v56 = vld [vmem:[#allocation2 + $0x32] sm:$0xff]  ;;  %v3174_v0 = vpack.i.bf16 %v4717_v62, %v1899_v32  ;;  %v4729_v61 = vld [vmem:[#allocation2 + $0x40] sm:$0xff]  ;;  %v3194_v37 = vpack.i.bf16 %v4727_v63, %v4717_v62  ;;  %vm5425_vm12 = vmmov %vm5416_vm0 }
 0x3da   : > { %3165 = vrot.lane.b32.xlu0 %v3164_v11, %s5356_s23  ;;  %1858 = vst.msk [vmem:[#allocation2 + $0x81] sm:$0xff] %vm5422_vm8, %v1850_v54  ;;  %v1925_v31 = vld [vmem:[#allocation2 + $0x42] sm:$0xff]  ;;  %v3184_v40 = vpack.i.bf16 %v1924_v56, %v4700_v10  ;;  %v3189_v14 = vpack.i.bf16 %v4729_v61, %v1923_v19  ;;  %v4742_v35 = vld [vmem:[#allocation2 + $0x51] sm:$0xff]  ;;  %vm5426_vm13 = vmmov %vm5416_vm0 }
 0x3db   : > { %v4744_v26 = vld [vmem:[#allocation2 + $0x50] sm:$0xff]  ;;  %v3199_v25 = vpack.i.bf16 %v1925_v31, %v4715_v16  ;;  %v3209_v5 = vpack.i.bf16 %v4742_v35, %v4729_v61  ;;  %v4763_v42 = vld [vmem:[#allocation2 + $0x61] sm:$0xff]  ;;  %v2183_v12 = vld [vmem:[%s5342_s10 + $0x58] sm:$0xff] }
 0x3dc   : > { %v1926_v59 = vld [vmem:[#allocation2 + $0x52] sm:$0xff]  ;;  %v3204_v3 = vpack.i.bf16 %v4744_v26, %v1924_v56  ;;  %v4765_v6 = vld [vmem:[#allocation2 + $0x60] sm:$0xff]  ;;  %v3224_v13 = vpack.i.bf16 %v4763_v42, %v4744_v26  ;;  %2240 = vmatpush.msra.mxu0 %v2183_v12  ;;  %vm5427_vm2 = vmmov %vm5416_vm0 }
 0x3dd   : > { %v1927_v15 = vld [vmem:[#allocation2 + $0x62] sm:$0xff]  ;;  %v3214_v57 = vpack.i.bf16 %v1926_v59, %v4727_v63  ;;  %v3219_v53 = vpack.i.bf16 %v4765_v6, %v1925_v31  ;;  %v4790_v29 = vld [vmem:[#allocation2 + $0x71] sm:$0xff]  ;;  %vm5428_vm15 = vmmov %vm5416_vm0 }
 0x3de   : > { %3018 = vmatmul.msk.f32.gmra.mxu2 %vm5423_vm9, %v1924_v56  ;;  %2241 = vmatpush.msra.mxu0 %v2182_v58  ;;  %v4792_v21 = vld [vmem:[#allocation2 + $0x70] sm:$0xff]  ;;  %v3229_v7 = vpack.i.bf16 %v1927_v15, %v4742_v35  ;;  %v3239_v23 = vpack.i.bf16 %v4790_v29, %v4765_v6  ;;  %v2191_v36 = vld [vmem:[%s5342_s10 + $0x98] sm:$0xff]  ;;  %vm5429_vm7 = vmmov %vm5416_vm0 }
 0x3df   : > { %3170 = vrot.lane.b32.xlu1 %v3169_v2, %s5421_s12  ;;  %v1928_v30 = vld [vmem:[#allocation2 + $0x72] sm:$0xff]  ;;  %v3234_v1 = vpack.i.bf16 %v4792_v21, %v1926_v59  ;;  %vm5430_vm10 = vmmov %vm5416_vm0 }
 0x3e0   : > { %2242 = vmatpush.msra.mxu0 %v2181_v27  ;;  %v3244_v17 = vpack.i.bf16 %v1928_v30, %v4763_v42  ;;  %v4814_v11 = vld [vmem:[#allocation2 + $0x91] sm:$0xff]  ;;  %v3264_v54 = vpack.i.bf16 %v4388_v28, %v1928_v30  ;;  %v2177_v28 = vld [vmem:[%s5342_s10 + $0x28] sm:$0xff]  ;;  %v4888_v27 = vld [vmem:[#allocation2] sm:$0xff] }
 0x3e1   : > { %3175 = vrot.lane.b32.xlu2 %v3174_v0, %s3532_s17  ;;  %v4805_v32 = vld [vmem:[#allocation2 + $0x81] sm:$0xff]  ;;  %v2202_v56 = vld [vmem:[%s5342_s10 + $0xf0] sm:$0xff]  ;;  %vm5431_vm3 = vmmov %vm5416_vm0 }
 0x3e2   : > { %3180 = vrot.lane.b32.xlu0 %v3179_v18, %s5356_s23  ;;  %2243 = vmatpush.msra.mxu0 %v2180_v46  ;;  %v1913_v9 = vld [vmem:[#allocation2 + $0x80] sm:$0xff]  ;;  %v3254_v49 = vpack.i.bf16 %v4805_v32, %v4792_v21  ;;  %v2178_v2 = vld [vmem:[%s5342_s10 + $0x30] sm:$0xff]  ;;  %v2201_v18 = vld [vmem:[%s5342_s10 + $0xe8] sm:$0xff] }
 0x3e3   : > { %v1929_v19 = vld [vmem:[#allocation2 + $0x82] sm:$0xff]  ;;  %v3249_v34 = vpack.i.bf16 %v1913_v9, %v1927_v15  ;;  %v3269_v50 = vpack.i.bf16 %v4814_v11, %v1913_v9  ;;  %2278 = vmatpush.msra.mxu1 %v2202_v56  ;;  %v2190_v12 = vld [vmem:[%s5342_s10 + $0x90] sm:$0xff]  ;;  %vm5432_vm4 = vmmov %vm5416_vm0 }
 0x3e4   : > { %2244 = vmatpush.msra.mxu0 %v2179_v24  ;;  %v3259_v38 = vpack.i.bf16 %v1929_v19, %v4790_v29  ;;  %v2200_v0 = vld [vmem:[%s5342_s10 + $0xe0] sm:$0xff]  ;;  %vm5433_vm5 = vmmov %vm5416_vm0 }
 0x3e5   : > { %2279 = vmatpush.msra.mxu1 %v2201_v18  ;;  %vm5434_vm6 = vmmov %vm5416_vm0 }
 0x3e6   : > { %3019 = vmatmul.msk.f32.gmra.mxu2 %vm5424_vm11, %v1925_v31  ;;  %2245 = vmatpush.msra.mxu0 %v2178_v2  ;;  %v2199_v31 = vld [vmem:[%s5342_s10 + $0xd8] sm:$0xff]  ;;  %vm5435_vm8 = vmmov %vm5416_vm0 }
 0x3e7   : > { %3185 = vrot.lane.b32.xlu1 %v3184_v40, %s5421_s12  ;;  %2280 = vmatpush.msra.mxu1 %v2200_v0  ;;  %v2198_v40 = vld [vmem:[%s5342_s10 + $0xd0] sm:$0xff]  ;;  %vm5436_vm9 = vmmov %vm5416_vm0 }
 0x3e8   : > { %2246 = vmatpush.msra.mxu0 %v2177_v28  ;;  %vm5437_vm11 = vmmov %vm5416_vm0 }
 0x3e9   : > { %3190 = vrot.lane.b32.xlu2 %v3189_v14, %s3532_s17  ;;  %2281 = vmatpush.msra.mxu1 %v2199_v31  ;;  %v2197_v14 = vld [vmem:[%s5342_s10 + $0xc8] sm:$0xff] }
 0x3ea   : > { %3195 = vrot.lane.b32.xlu0 %v3194_v37, %s5356_s23  ;;  %v2176_v37 = vld [vmem:[%s5342_s10 + $0x20] sm:$0xff] }
 0x3eb   : > { %2282 = vmatpush.msra.mxu1 %v2198_v40  ;;  %2247 = vmatpush.msra.mxu0 %v2176_v37 }
 0x3ed   : > { %2283 = vmatpush.msra.mxu1 %v2197_v14  ;;  %2248 = vmatpush.msra.mxu0 %v2175_v20 }
 0x3ee   : > { %3020 = vmatmul.msk.f32.gmra.mxu2 %vm5425_vm12, %v1926_v59  ;;  %v2196_v59 = vld [vmem:[%s5342_s10 + $0xc0] sm:$0xff]  ;;  %vm5438_vm12 = vmmov %vm5416_vm0 }
 0x3ef   : > { %3200 = vrot.lane.b32.xlu1 %v3199_v25, %s5421_s12  ;;  %v2195_v25 = vld [vmem:[%s5342_s10 + $0xb8] sm:$0xff]  ;;  %2284 = vmatpush.msra.mxu1 %v2196_v59 }
 0x3f1   : > { %3205 = vrot.lane.b32.xlu2 %v3204_v3, %s3532_s17  ;;  %2285 = vmatpush.msra.mxu1 %v2195_v25  ;;  %v2174_v3 = vld [vmem:[%s5342_s10 + $0x10] sm:$0xff] }
 0x3f2   : > { %3210 = vrot.lane.b32.xlu0 %v3209_v5, %s5356_s23  ;;  %v2194_v5 = vld [vmem:[%s5342_s10 + $0xb0] sm:$0xff]  ;;  %2249 = vmatpush.msra.mxu0 %v2174_v3 }
 0x3f3   : > { %2286 = vmatpush.msra.mxu1 %v2194_v5 }
 0x3f4   : > { %2250 = vmatpush.msra.mxu0 %v2173_v51 }
 0x3f5   : > { %2287 = vmatpush.msra.mxu1 %v2193_v60 }
 0x3f6   : > { %3021 = vmatmul.msk.f32.gmra.mxu2 %vm5416_vm0, %v1927_v15  ;;  %v2172_v15 = vld [vmem:[%s5342_s10] sm:$0xff] }
 0x3f7   : > { %3215 = vrot.lane.b32.xlu1 %v3214_v57, %s5421_s12  ;;  %2288 = vmatpush.msra.mxu1 %v2192_v55  ;;  %v2189_v57 = vld [vmem:[%s5342_s10 + $0x88] sm:$0xff] }
 0x3f8   : > { %2251 = vmatpush.msra.mxu0 %v2172_v15 }
 0x3f9   : > { %3220 = vrot.lane.b32.xlu2 %v3219_v53, %s3532_s17  ;;  %2289 = vmatpush.msra.mxu1 %v2191_v36 }
 0x3fa   : > { %3225 = vrot.lane.b32.xlu0 %v3224_v13, %s5356_s23  ;;  %v2188_v13 = vld [vmem:[%s5342_s10 + $0x80] sm:$0xff] }
 0x3fb   : > { %2290 = vmatpush.msra.mxu1 %v2190_v12 }
 0x3fd   : > { %2291 = vmatpush.msra.mxu1 %v2189_v57 }
 0x3fe   : > { %3022 = vmatmul.msk.f32.gmra.mxu2 %vm5426_vm13, %v1928_v30  ;;  %vm5439_vm13 = vmmov %vm5416_vm0 }
 0x3ff   : > { %3230 = vrot.lane.b32.xlu1 %v3229_v7, %s5421_s12  ;;  %2292 = vmatpush.msra.mxu1 %v2188_v13 }
 0x401   : > { %3235 = vrot.lane.b32.xlu2 %v3234_v1, %s3532_s17 }
 0x402   : > { %3240 = vrot.lane.b32.xlu0 %v3239_v23, %s5356_s23 }
 0x406   : > { %3023 = vmatmul.msk.f32.gmra.mxu2 %vm5427_vm2, %v1929_v19  ;;  %vm5440_vm2 = vmmov %vm5416_vm0 }
 0x407   : > { %3245 = vrot.lane.b32.xlu1 %v3244_v17, %s5421_s12 }
 0x409   : > { %3250 = vrot.lane.b32.xlu2 %v3249_v34, %s3532_s17 }
 0x40a   : > { %3255 = vrot.lane.b32.xlu0 %v3254_v49, %s5356_s23 }
 0x40f   : > { %3260 = vrot.lane.b32.xlu1 %v3259_v38, %s5421_s12 }
 0x411   : > { %3265 = vrot.lane.b32.xlu2 %v3264_v54, %s3532_s17 }
 0x412   : > { %3270 = vrot.lane.b32.xlu0 %v3269_v50, %s5356_s23 }
 0x433   : > { %v3161_v53 = vpop.permute.xlu2 %3160 }
 0x434   : > { %v3163_v23 = vunpack.i.h.bf16 %v3161_v53  ;;  %v3162_v1 = vunpack.i.l.bf16 %v3161_v53 }
 0x43b   : > { %v3176_v58 = vpop.permute.xlu2 %3175 }
 0x43c   : > { %v3178_v31 = vunpack.i.h.bf16 %v3176_v58  ;;  %v3177_v40 = vunpack.i.l.bf16 %v3176_v58 }
 0x443   : > { %v3191_v50 = vpop.permute.xlu2 %3190 }
 0x444   : > { %v3193_v15 = vunpack.i.h.bf16 %v3191_v50 }
 0x449   : > { %v3156_v46 = vpop.permute.xlu1 %3155 }
 0x44a   : > { %v3158_v24 = vunpack.i.h.bf16 %v3156_v46  ;;  %v3157_v30 = vunpack.i.l.bf16 %v3156_v46 }
 0x44b   : > { %v3206_v60 = vpop.permute.xlu2 %3205 }
 0x44c   : > { %v3166_v7 = vpop.permute.xlu0 %3165  ;;  %v2123_v9 = vsel %vm5428_vm15, %v4888_v27, %v3157_v30  ;;  %v2148_v19 = vsel %vm5429_vm7, %v4712_v22, %v3158_v24  ;;  %vm5441_vm15 = vmmov %vm5416_vm0 }
 0x44d   : > { %v3168_v17 = vunpack.i.h.bf16 %v3166_v7  ;;  %v3167_v49 = vunpack.i.l.bf16 %v3166_v7  ;;  %v2131_v34 = vsel %vm540_vm1, %v2123_v9, %v3162_v1  ;;  %v2156_v38 = vsel %vm540_vm1, %v2148_v19, %v3163_v23  ;;  %vm5442_vm7 = vmmov %vm5416_vm0 }
 0x44f   : > { %v2140_v54 = vsel %vm2139_vm14, %v2131_v34, %v3167_v49  ;;  %v2164_v56 = vsel %vm2139_vm14, %v2156_v38, %v3168_v17  ;;  %v3208_v17 = vunpack.i.h.bf16 %v3206_v60  ;;  %v4914_v49 = vld [vmem:[#allocation2 + $0x92] sm:$0xff] }
 0x450   : > { %2252 = vmatmul.f32.vlgmr.msra.gmra.mxu0 %v2140_v54  ;;  %2293 = vmatmul.f32.vlgmr.msra.gmra.mxu1 %v2164_v56 }
 0x451   : > { %v3171_v2 = vpop.permute.xlu1 %3170  ;;  %3024 = vmatmul.msk.f32.gmra.mxu2 %vm5436_vm9, %v4914_v49  ;;  %vm5450_vm9 = vmmov %vm5416_vm0 }
 0x452   : > { %v3173_v28 = vunpack.i.h.bf16 %v3171_v2  ;;  %v3172_v0 = vunpack.i.l.bf16 %v3171_v2 }
 0x453   : > { %v3221_v23 = vpop.permute.xlu2 %3220 }
 0x454   : > { %v3181_v18 = vpop.permute.xlu0 %3180  ;;  %v2124_v14 = vsel %vm5430_vm10, %v4694_v41, %v3172_v0  ;;  %v2149_v20 = vsel %vm5431_vm3, %v4700_v10, %v3173_v28  ;;  %v3192_v41 = vunpack.i.l.bf16 %v3191_v50  ;;  %vm5443_vm10 = vmmov %vm5416_vm0 }
 0x455   : > { %v3183_v22 = vunpack.i.h.bf16 %v3181_v18  ;;  %v3182_v37 = vunpack.i.l.bf16 %v3181_v18  ;;  %v2132_v59 = vsel %vm540_vm1, %v2124_v14, %v3177_v40  ;;  %v2157_v25 = vsel %vm540_vm1, %v2149_v20, %v3178_v31  ;;  %vm5444_vm3 = vmmov %vm5416_vm0 }
 0x456   : > { %v3223_v40 = vunpack.i.h.bf16 %v3221_v23 }
 0x457   : > { %v2141_v5 = vsel %vm2139_vm14, %v2132_v59, %v3182_v37  ;;  %v2165_v3 = vsel %vm2139_vm14, %v2157_v25, %v3183_v22  ;;  %v3222_v22 = vunpack.i.l.bf16 %v3221_v23 }
 0x458   : > { %2255 = vmatmul.f32.gmra.mxu0 %v2141_v5  ;;  %2296 = vmatmul.f32.gmra.mxu1 %v2165_v3 }
 0x459   : > { %v3186_v51 = vpop.permute.xlu1 %3185 }
 0x45a   : > { %v3188_v36 = vunpack.i.h.bf16 %v3186_v51  ;;  %v3187_v12 = vunpack.i.l.bf16 %v3186_v51 }
 0x45c   : > { %v3196_v55 = vpop.permute.xlu0 %3195  ;;  %v2125_v10 = vsel %vm5432_vm4, %v4697_v48, %v3187_v12  ;;  %v2150_v53 = vsel %vm5433_vm5, %v4715_v16, %v3188_v36  ;;  %v3207_v48 = vunpack.i.l.bf16 %v3206_v60  ;;  %vm5445_vm4 = vmmov %vm5416_vm0 }
 0x45d   : > { %v3198_v57 = vunpack.i.h.bf16 %v3196_v55  ;;  %v3197_v13 = vunpack.i.l.bf16 %v3196_v55  ;;  %v2133_v58 = vsel %vm540_vm1, %v2125_v10, %v3192_v41  ;;  %v2158_v46 = vsel %vm540_vm1, %v2150_v53, %v3193_v15  ;;  %vm5446_vm5 = vmmov %vm5416_vm0 }
 0x45f   : > { %v2142_v24 = vsel %vm2139_vm14, %v2133_v58, %v3197_v13  ;;  %v2166_v30 = vsel %vm2139_vm14, %v2158_v46, %v3198_v57 }
 0x460   : > { %2258 = vmatmul.f32.gmra.mxu0 %v2142_v24  ;;  %2299 = vmatmul.f32.gmra.mxu1 %v2166_v30 }
 0x461   : > { %v3201_v7 = vpop.permute.xlu1 %3200 }
 0x462   : > { %v3203_v9 = vunpack.i.h.bf16 %v3201_v7  ;;  %v3202_v19 = vunpack.i.l.bf16 %v3201_v7 }
 0x464   : > { %v3211_v1 = vpop.permute.xlu0 %3210  ;;  %v2126_v38 = vsel %vm5434_vm6, %v4717_v62, %v3202_v19  ;;  %v2151_v50 = vsel %vm5435_vm8, %v4727_v63, %v3203_v9  ;;  %v3236_v63 = vpop.permute.xlu2 %3235  ;;  %vm5447_vm6 = vmmov %vm5416_vm0 }
 0x465   : > { %v3213_v16 = vunpack.i.h.bf16 %v3211_v1  ;;  %v3212_v34 = vunpack.i.l.bf16 %v3211_v1  ;;  %v2134_v54 = vsel %vm540_vm1, %v2126_v38, %v3207_v48  ;;  %v2159_v56 = vsel %vm540_vm1, %v2151_v50, %v3208_v17  ;;  %vm5449_vm8 = vmmov %vm5416_vm0 }
 0x466   : > { %v3238_v15 = vunpack.i.h.bf16 %v3236_v63  ;;  %v3237_v41 = vunpack.i.l.bf16 %v3236_v63 }
 0x467   : > { %v2143_v2 = vsel %vm2139_vm14, %v2134_v54, %v3212_v34  ;;  %v2167_v18 = vsel %vm2139_vm14, %v2159_v56, %v3213_v16 }
 0x468   : > { %2261 = vmatmul.f32.gmra.mxu0 %v2143_v2  ;;  %2302 = vmatmul.f32.gmra.mxu1 %v2167_v18 }
 0x469   : > { %v3216_v28 = vpop.permute.xlu1 %3215 }
 0x46a   : > { %v3218_v31 = vunpack.i.h.bf16 %v3216_v28  ;;  %v3217_v62 = vunpack.i.l.bf16 %v3216_v28 }
 0x46c   : > { %v3226_v0 = vpop.permute.xlu0 %3225  ;;  %v2127_v20 = vsel %vm5437_vm11, %v4729_v61, %v3217_v62  ;;  %v2152_v59 = vsel %vm5438_vm12, %v4742_v35, %v3218_v31  ;;  %v3251_v58 = vpop.permute.xlu2 %3250  ;;  %vm5451_vm11 = vmmov %vm5416_vm0 }
 0x46d   : > { %v3228_v37 = vunpack.i.h.bf16 %v3226_v0  ;;  %v3227_v14 = vunpack.i.l.bf16 %v3226_v0  ;;  %v2135_v25 = vsel %vm540_vm1, %v2127_v20, %v3222_v22  ;;  %v2160_v5 = vsel %vm540_vm1, %v2152_v59, %v3223_v40  ;;  %v2335_v20 = vpop.f32.mrf.mxu2  ;;  %v2722_v59 = vld [vmem:[%s5346_s14 + $0x118] sm:$0xff]  ;;  %vm5452_vm12 = vmmov %vm5416_vm0 }
 0x46e   : > { %v3253_v9 = vunpack.i.h.bf16 %v3251_v58  ;;  %2845 = vmatpush.msrb.mxu0 %v2722_v59 }
 0x46f   : > { %v2144_v3 = vsel %vm2139_vm14, %v2135_v25, %v3227_v14  ;;  %v2168_v60 = vsel %vm2139_vm14, %v2160_v5, %v3228_v37  ;;  %v4970_v25 = vld [vmem:[%s5343_s11] ss:$0 sm:$0xff] }
 0x470   : > { %2264 = vmatmul.f32.gmra.mxu0 %v2144_v3  ;;  %2305 = vmatmul.f32.gmra.mxu1 %v2168_v60 }
 0x471   : > { %v3231_v51 = vpop.permute.xlu1 %3230 }
 0x472   : > { %v3233_v36 = vunpack.i.h.bf16 %v3231_v51  ;;  %v3232_v12 = vunpack.i.l.bf16 %v3231_v51  ;;  %v4975_v51 = vld [vmem:[%s5345_s13] ss:$0 sm:$0xff] }
 0x474   : > { %v3241_v55 = vpop.permute.xlu0 %3240  ;;  %v2128_v35 = vsel %vm5416_vm0, %v4744_v26, %v3232_v12  ;;  %v2153_v13 = vsel %vm5439_vm13, %v4763_v42, %v3233_v36  ;;  %v3252_v26 = vunpack.i.l.bf16 %v3251_v58  ;;  %v3266_v54 = vpop.permute.xlu2 %3265  ;;  %v2719_v36 = vld [vmem:[%s5346_s14 + $0x100] sm:$0xff]  ;;  %v676_v58 = vadd.f32 %v4975_v51, %v4407_v47  ;;  %vm5453_vm13 = vmmov %vm5416_vm0 }
 0x475   : > { %v3243_v61 = vunpack.i.h.bf16 %v3241_v55  ;;  %v3242_v57 = vunpack.i.l.bf16 %v3241_v55  ;;  %v2136_v10 = vsel %vm540_vm1, %v2128_v35, %v3237_v41  ;;  %v2161_v53 = vsel %vm540_vm1, %v2153_v13, %v3238_v15  ;;  %v2338_v5 = vpop.f32.mrf.mxu2  ;;  %v2391_v47 = vld [vmem:[#allocation2 + $0x2] sm:$0xff] }
 0x476   : > { %v3268_v0 = vunpack.i.h.bf16 %v3266_v54  ;;  %v673_v15 = vadd.f32 %v4975_v51, %v4405_v33 }
 0x477   : > { %v2145_v46 = vsel %vm2139_vm14, %v2136_v10, %v3242_v57  ;;  %v2169_v24 = vsel %vm2139_vm14, %v2161_v53, %v3243_v61 }
 0x478   : > { %2267 = vmatmul.f32.gmra.mxu0 %v2145_v46  ;;  %2308 = vmatmul.f32.gmra.mxu1 %v2169_v24 }
 0x479   : > { %v3246_v30 = vpop.permute.xlu1 %3245 }
 0x47a   : > { %v3248_v23 = vunpack.i.h.bf16 %v3246_v30  ;;  %v3247_v1 = vunpack.i.l.bf16 %v3246_v30 }
 0x47c   : > { %v3256_v7 = vpop.permute.xlu0 %3255  ;;  %v2129_v42 = vsel %vm5440_vm2, %v4765_v6, %v3247_v1  ;;  %v2154_v48 = vsel %vm5441_vm15, %v4790_v29, %v3248_v23  ;;  %v3267_v6 = vunpack.i.l.bf16 %v3266_v54  ;;  %vm5454_vm2 = vmmov %vm5416_vm0 }
 0x47d   : > { %v3258_v19 = vunpack.i.h.bf16 %v3256_v7  ;;  %v3257_v17 = vunpack.i.l.bf16 %v3256_v7  ;;  %v2137_v16 = vsel %vm540_vm1, %v2129_v42, %v3252_v26  ;;  %v2162_v34 = vsel %vm540_vm1, %v2154_v48, %v3253_v9  ;;  %v2341_v13 = vpop.f32.mrf.mxu2  ;;  %vm5455_vm15 = vmmov %vm5416_vm0 }
 0x47f   : > { %v2146_v38 = vsel %vm2139_vm14, %v2137_v16, %v3257_v17  ;;  %v2170_v50 = vsel %vm2139_vm14, %v2162_v34, %v3258_v19  ;;  %v679_v19 = vadd.f32 %v4975_v51, %v4409_v4 }
 0x480   : > { %2270 = vmatmul.f32.gmra.mxu0 %v2146_v38  ;;  %2311 = vmatmul.f32.gmra.mxu1 %v2170_v50 }
 0x481   : > { %v3261_v56 = vpop.permute.xlu1 %3260 }
 0x482   : > { %v3263_v18 = vunpack.i.h.bf16 %v3261_v56  ;;  %v3262_v28 = vunpack.i.l.bf16 %v3261_v56 }
 0x484   : > { %v3271_v2 = vpop.permute.xlu0 %3270  ;;  %v2130_v29 = vsel %vm5442_vm7, %v4792_v21, %v3262_v28  ;;  %v2155_v40 = vsel %vm5443_vm10, %v4805_v32, %v3263_v18  ;;  %v2721_v21 = vld [vmem:[%s5346_s14 + $0x110] sm:$0xff]  ;;  %v2720_v32 = vld [vmem:[%s5346_s14 + $0x108] sm:$0xff]  ;;  %vm5456_vm7 = vmmov %vm5416_vm0 }
 0x485   : > { %v3273_v31 = vunpack.i.h.bf16 %v3271_v2  ;;  %v3272_v62 = vunpack.i.l.bf16 %v3271_v2  ;;  %v2138_v22 = vsel %vm540_vm1, %v2130_v29, %v3267_v6  ;;  %v2163_v63 = vsel %vm540_vm1, %v2155_v40, %v3268_v0  ;;  %2846 = vmatpush.msrb.mxu0 %v2721_v21  ;;  %v2344_v9 = vpop.f32.mrf.mxu2  ;;  %vm5457_vm10 = vmmov %vm5416_vm0 }
 0x486   : > { %v682_v0 = vadd.f32 %v4975_v51, %v4411_v52 }
 0x487   : > { %v2147_v37 = vsel %vm2139_vm14, %v2138_v22, %v3272_v62  ;;  %v2171_v14 = vsel %vm2139_vm14, %v2163_v63, %v3273_v31  ;;  %2847 = vmatpush.msrb.mxu0 %v2720_v32  ;;  %v685_v32 = vadd.f32 %v4975_v51, %v3832_v39 }
 0x488   : > { %2273 = vmatmul.f32.gmra.mxu0 %v2147_v37  ;;  %2314 = vmatmul.f32.gmra.mxu1 %v2171_v14 }
 0x489   : > { %2848 = vmatpush.msrb.mxu0 %v2719_v36 }
 0x48d   : > { %v2347_v6 = vpop.f32.mrf.mxu2 }
 0x4cd   : > { %v2253_v3 = vpop.f32.mrf.mxu0  ;;  %v2294_v60 = vpop.f32.mrf.mxu1 }
 0x4ce   : > { %v2254_v55 = vadd.f32 %v4970_v25, %v2253_v3  ;;  %v2350_v3 = vpop.f32.mrf.mxu2 }
 0x4d0   : > { %v2295_v12 = vadd.f32 %v2294_v60, %v2254_v55 }
 0x4d2   : > { %v2336_v41 = vadd.f32 %v2335_v20, %v2295_v12 }
 0x4d4   : > { %v2359_v61 = vadd.f32 %v2336_v41, %v673_v15 }
 0x4d5   : > { %v2256_v57 = vpop.f32.mrf.mxu0  ;;  %v2297_v35 = vpop.f32.mrf.mxu1 }
 0x4d6   : > { %2367 = vst.msk [vmem:[#allocation2 + $0x11] sm:$0xff] %vm5444_vm3, %v2359_v61  ;;  %v2257_v10 = vadd.f32 %v4970_v25, %v2256_v57  ;;  %vm5458_vm3 = vmmov %vm5416_vm0 }
 0x4d8   : > { %v2298_v53 = vadd.f32 %v2297_v35, %v2257_v10  ;;  %v2702_v10 = vld [vmem:[%s5346_s14 + $0x78] sm:$0xff] }
 0x4d9   : > { %2751 = vmatpush.msrb.mxu3 %v2702_v10  ;;  %v2694_v10 = vld [vmem:[%s5346_s14 + $0x38] sm:$0xff] }
 0x4da   : > { %v2339_v46 = vadd.f32 %v2338_v5, %v2298_v53  ;;  %v2718_v53 = vld [vmem:[%s5346_s14 + $0xf8] sm:$0xff] }
 0x4db   : > { %2792 = vmatpush.msrb.mxu2 %v2718_v53  ;;  %v2710_v53 = vld [vmem:[%s5346_s14 + $0xb8] sm:$0xff] }
 0x4dc   : > { %v2360_v24 = vadd.f32 %v2339_v46, %v676_v58  ;;  %v688_v58 = vadd.f32 %v4975_v51, %v3834_v43 }
 0x4dd   : > { %v2259_v30 = vpop.f32.mrf.mxu0  ;;  %v2300_v7 = vpop.f32.mrf.mxu1  ;;  %v2415_v23 = vld [vmem:[#allocation2 + $0x12] sm:$0xff] }
 0x4de   : > { %2368 = vst.msk [vmem:[#allocation2 + $0x21] sm:$0xff] %vm5445_vm4, %v2360_v24  ;;  %v2260_v33 = vadd.f32 %v4970_v25, %v2259_v30  ;;  %v3274_v1 = vpack.i.bf16 %v2415_v23, %v4690_v8  ;;  %v4993_v48 = vld [vmem:[#allocation2 + $0x10] sm:$0xff]  ;;  %vm5459_vm4 = vmmov %vm5416_vm0 }
 0x4df   : > { %v5005_v2 = vld [vmem:[#allocation2 + $0x11] sm:$0xff] }
 0x4e0   : > { %v2301_v26 = vadd.f32 %v2300_v7, %v2260_v33  ;;  %3275 = vrot.lane.b32.xlu1 %v3274_v1, %s5421_s12 }
 0x4e2   : > { %v2342_v17 = vadd.f32 %v2341_v13, %v2301_v26 }
 0x4e4   : > { %v2361_v42 = vadd.f32 %v2342_v17, %v679_v19  ;;  %v2353_v19 = vpop.f32.mrf.mxu2 }
 0x4e5   : > { %v2262_v16 = vpop.f32.mrf.mxu0  ;;  %v2303_v34 = vpop.f32.mrf.mxu1  ;;  %v2439_v38 = vld [vmem:[#allocation2 + $0x22] sm:$0xff] }
 0x4e6   : > { %v4995_v50 = vld [vmem:[#allocation2 + $0x20] sm:$0xff]  ;;  %2369 = vst.msk [vmem:[#allocation2 + $0x31] sm:$0xff] %vm5446_vm5, %v2361_v42  ;;  %v2263_v8 = vadd.f32 %v4970_v25, %v2262_v16  ;;  %3025 = vmatmul.msk.f32.vlgmr.msrb.gmra.mxu0 %vm5447_vm6, %v2439_v38  ;;  %v3289_v18 = vpack.i.bf16 %v2439_v38, %v5005_v2  ;;  %v2701_v42 = vld [vmem:[%s5346_s14 + $0x70] sm:$0xff]  ;;  %vm5460_vm5 = vmmov %vm5416_vm0 }
 0x4e7   : > { %v4997_v54 = vld [vmem:[#allocation2 + $0x21] sm:$0xff]  ;;  %v3279_v4 = vpack.i.bf16 %v4995_v50, %v2391_v47  ;;  %v2717_v16 = vld [vmem:[%s5346_s14 + $0xf0] sm:$0xff]  ;;  %2752 = vmatpush.msrb.mxu3 %v2701_v42  ;;  %vm5461_vm6 = vmmov %vm5416_vm0 }
 0x4e8   : > { %v3284_v56 = vpack.i.bf16 %v4997_v54, %v4993_v48  ;;  %v2304_v28 = vadd.f32 %v2303_v34, %v2263_v8  ;;  %3290 = vrot.lane.b32.xlu1 %v3289_v18, %s5421_s12  ;;  %v2700_v34 = vld [vmem:[%s5346_s14 + $0x68] sm:$0xff]  ;;  %v691_v8 = vadd.f32 %v4975_v51, %v3836_v44  ;;  %2793 = vmatpush.msrb.mxu2 %v2717_v16  ;;  %v2715_v18 = vld [vmem:[%s5346_s14 + $0xe0] sm:$0xff]  ;;  %v2690_v16 = vld [vmem:[%s5346_s14 + $0x18] sm:$0xff] }
 0x4e9   : > { %3280 = vrot.lane.b32.xlu2 %v3279_v4, %s3532_s17  ;;  %2753 = vmatpush.msrb.mxu3 %v2700_v34  ;;  %v2707_v42 = vld [vmem:[%s5346_s14 + $0xa0] sm:$0xff]  ;;  %v2706_v34 = vld [vmem:[%s5346_s14 + $0x98] sm:$0xff] }
 0x4ea   : > { %3285 = vrot.lane.b32.xlu0 %v3284_v56, %s5448_s1  ;;  %v2345_v31 = vadd.f32 %v2344_v9, %v2304_v28  ;;  %v2699_v56 = vld [vmem:[%s5346_s14 + $0x60] sm:$0xff] }
 0x4eb   : > { %2754 = vmatpush.msrb.mxu3 %v2699_v56  ;;  %v2704_v56 = vld [vmem:[%s5346_s14 + $0x88] sm:$0xff] }
 0x4ec   : > { %v2362_v62 = vadd.f32 %v2345_v31, %v682_v0  ;;  %v2698_v0 = vld [vmem:[%s5346_s14 + $0x58] sm:$0xff] }
 0x4ed   : > { %v2265_v29 = vpop.f32.mrf.mxu0  ;;  %v2306_v40 = vpop.f32.mrf.mxu1  ;;  %v2440_v22 = vld [vmem:[#allocation2 + $0x32] sm:$0xff]  ;;  %2755 = vmatpush.msrb.mxu3 %v2698_v0 }
 0x4ee   : > { %v5013_v63 = vld [vmem:[#allocation2 + $0x31] sm:$0xff]  ;;  %2370 = vst.msk [vmem:[#allocation2 + $0x41] sm:$0xff] %vm5449_vm8, %v2362_v62  ;;  %v2266_v14 = vadd.f32 %v4970_v25, %v2265_v29  ;;  %3026 = vmatmul.msk.f32.gmra.mxu0 %vm5450_vm9, %v2440_v22  ;;  %v3304_v59 = vpack.i.bf16 %v2440_v22, %v4997_v54  ;;  %vm5462_vm8 = vmmov %vm5416_vm0 }
 0x4ef   : > { %v5015_v37 = vld [vmem:[#allocation2 + $0x30] sm:$0xff]  ;;  %v3299_v20 = vpack.i.bf16 %v5013_v63, %v4995_v50  ;;  %vm5463_vm9 = vmmov %vm5416_vm0 }
 0x4f0   : > { %v3294_v52 = vpack.i.bf16 %v5015_v37, %v2415_v23  ;;  %v2307_v21 = vadd.f32 %v2306_v40, %v2266_v14  ;;  %3305 = vrot.lane.b32.xlu1 %v3304_v59, %s5421_s12  ;;  %v2714_v14 = vld [vmem:[%s5346_s14 + $0xd8] sm:$0xff]  ;;  %v2356_v59 = vpop.f32.mrf.mxu2 }
 0x4f2   : > { %3300 = vrot.lane.b32.xlu0 %v3299_v20, %s5448_s1  ;;  %3295 = vrot.lane.b32.xlu2 %v3294_v52, %s3532_s17  ;;  %v2348_v5 = vadd.f32 %v2347_v6, %v2307_v21 }
 0x4f4   : > { %v2363_v60 = vadd.f32 %v2348_v5, %v685_v32  ;;  %v2713_v32 = vld [vmem:[%s5346_s14 + $0xd0] sm:$0xff]  ;;  %v2696_v5 = vld [vmem:[%s5346_s14 + $0x48] sm:$0xff] }
 0x4f5   : > { %v2268_v55 = vpop.f32.mrf.mxu0  ;;  %v2309_v36 = vpop.f32.mrf.mxu1  ;;  %v5029_v12 = vld [vmem:[#allocation2 + $0x42] sm:$0xff] }
 0x4f6   : > { %v5031_v15 = vld [vmem:[#allocation2 + $0x41] sm:$0xff]  ;;  %2371 = vst.msk [vmem:[#allocation2 + $0x51] sm:$0xff] %vm5451_vm11, %v2363_v60  ;;  %v2269_v61 = vadd.f32 %v4970_v25, %v2268_v55  ;;  %3027 = vmatmul.msk.f32.gmra.mxu0 %vm5452_vm12, %v5029_v12  ;;  %v3319_v35 = vpack.i.bf16 %v5029_v12, %v5013_v63  ;;  %vm5464_vm11 = vmmov %vm5416_vm0 }
 0x4f7   : > { %v5033_v41 = vld [vmem:[#allocation2 + $0x40] sm:$0xff]  ;;  %v3314_v39 = vpack.i.bf16 %v5031_v15, %v5015_v37  ;;  %v2712_v55 = vld [vmem:[%s5346_s14 + $0xc8] sm:$0xff]  ;;  %vm5465_vm12 = vmmov %vm5416_vm0 }
 0x4f8   : > { %v3309_v57 = vpack.i.bf16 %v5033_v41, %v2439_v38  ;;  %v2310_v13 = vadd.f32 %v2309_v36, %v2269_v61  ;;  %3320 = vrot.lane.b32.xlu1 %v3319_v35, %s5421_s12  ;;  %v2716_v38 = vld [vmem:[%s5346_s14 + $0xe8] sm:$0xff]  ;;  %v2695_v36 = vld [vmem:[%s5346_s14 + $0x40] sm:$0xff] }
 0x4f9   : > { %2794 = vmatpush.msrb.mxu2 %v2716_v38  ;;  %v2711_v61 = vld [vmem:[%s5346_s14 + $0xc0] sm:$0xff]  ;;  %v2689_v38 = vld [vmem:[%s5346_s14 + $0x10] sm:$0xff] }
 0x4fa   : > { %3315 = vrot.lane.b32.xlu0 %v3314_v39, %s5448_s1  ;;  %3310 = vrot.lane.b32.xlu2 %v3309_v57, %s3532_s17  ;;  %v2351_v46 = vadd.f32 %v2350_v3, %v2310_v13  ;;  %v694_v3 = vadd.f32 %v4975_v51, %v3838_v45 }
 0x4fb   : > { %2795 = vmatpush.msrb.mxu2 %v2715_v18  ;;  %v2687_v18 = vld [vmem:[%s5346_s14] sm:$0xff] }
 0x4fc   : > { %v2364_v24 = vadd.f32 %v2351_v46, %v688_v58  ;;  %v2693_v58 = vld [vmem:[%s5346_s14 + $0x30] sm:$0xff] }
 0x4fd   : > { %v2271_v30 = vpop.f32.mrf.mxu0  ;;  %v2312_v7 = vpop.f32.mrf.mxu1  ;;  %v5055_v23 = vld [vmem:[#allocation2 + $0x52] sm:$0xff]  ;;  %2796 = vmatpush.msrb.mxu2 %v2714_v14 }
 0x4fe   : > { %v5057_v33 = vld [vmem:[#allocation2 + $0x51] sm:$0xff]  ;;  %2372 = vst.msk [vmem:[#allocation2 + $0x61] sm:$0xff] %vm5416_vm0, %v2364_v24  ;;  %v2272_v9 = vadd.f32 %v4970_v25, %v2271_v30  ;;  %3028 = vmatmul.msk.f32.gmra.mxu0 %vm5453_vm13, %v5055_v23  ;;  %v3334_v17 = vpack.i.bf16 %v5055_v23, %v5031_v15  ;;  %vm5466_vm13 = vmmov %vm5416_vm0 }
 0x4ff   : > { %v5059_v1 = vld [vmem:[#allocation2 + $0x50] sm:$0xff]  ;;  %v3329_v43 = vpack.i.bf16 %v5057_v33, %v5033_v41  ;;  %2797 = vmatpush.msrb.mxu2 %v2713_v32 }
 0x500   : > { %v3324_v26 = vpack.i.bf16 %v5059_v1, %v2440_v22  ;;  %v2313_v47 = vadd.f32 %v2312_v7, %v2272_v9  ;;  %3335 = vrot.lane.b32.xlu1 %v3334_v17, %s5421_s12  ;;  %v2709_v17 = vld [vmem:[%s5346_s14 + $0xb0] sm:$0xff] }
 0x501   : > { %2798 = vmatpush.msrb.mxu2 %v2712_v55 }
 0x502   : > { %3330 = vrot.lane.b32.xlu0 %v3329_v43, %s5448_s1  ;;  %3325 = vrot.lane.b32.xlu2 %v3324_v26, %s3532_s17  ;;  %v2354_v4 = vadd.f32 %v2353_v19, %v2313_v47  ;;  %v2430_v43 = vld [vmem:[#allocation2 + $0x90] sm:$0xff]  ;;  %v2692_v47 = vld [vmem:[%s5346_s14 + $0x28] sm:$0xff] }
 0x503   : > { %2799 = vmatpush.msrb.mxu2 %v2711_v61 }
 0x504   : > { %v2365_v28 = vadd.f32 %v2354_v4, %v691_v8  ;;  %v2705_v8 = vld [vmem:[%s5346_s14 + $0x90] sm:$0xff]  ;;  %v2688_v4 = vld [vmem:[%s5346_s14 + $0x8] sm:$0xff] }
 0x505   : > { %v2274_v6 = vpop.f32.mrf.mxu0  ;;  %v2443_v31 = vld [vmem:[#allocation2 + $0x62] sm:$0xff]  ;;  %v2315_v20 = vpop.f32.mrf.mxu1  ;;  %2800 = vmatpush.msrb.mxu2 %v2710_v53 }
 0x506   : > { %v5096_v44 = vld [vmem:[#allocation2 + $0x61] sm:$0xff]  ;;  %2373 = vst.msk [vmem:[#allocation2 + $0x71] sm:$0xff] %vm5454_vm2, %v2365_v28  ;;  %v2275_v29 = vadd.f32 %v4970_v25, %v2274_v6  ;;  %3029 = vmatmul.msk.f32.gmra.mxu0 %vm5455_vm15, %v2443_v31  ;;  %v3349_v52 = vpack.i.bf16 %v2443_v31, %v5057_v33  ;;  %v2697_v25 = vld [vmem:[%s5346_s14 + $0x50] sm:$0xff]  ;;  %vm5467_vm2 = vmmov %vm5416_vm0 }
 0x507   : > { %v5098_v62 = vld [vmem:[#allocation2 + $0x60] sm:$0xff]  ;;  %v3344_v40 = vpack.i.bf16 %v5096_v44, %v5059_v1  ;;  %2756 = vmatpush.msrb.mxu3 %v2697_v25  ;;  %2801 = vmatpush.msrb.mxu2 %v2709_v17  ;;  %vm5468_vm15 = vmmov %vm5416_vm0 }
 0x508   : > { %v3339_v22 = vpack.i.bf16 %v5098_v62, %v5029_v12  ;;  %v2316_v21 = vadd.f32 %v2315_v20, %v2275_v29  ;;  %3350 = vrot.lane.b32.xlu1 %v3349_v52, %s5421_s12  ;;  %v2703_v28 = vld [vmem:[%s5346_s14 + $0x80] sm:$0xff] }
 0x509   : > { %2757 = vmatpush.msrb.mxu3 %v2696_v5 }
 0x50a   : > { %3345 = vrot.lane.b32.xlu0 %v3344_v40, %s5448_s1  ;;  %3340 = vrot.lane.b32.xlu2 %v3339_v22, %s3532_s17  ;;  %v2357_v60 = vadd.f32 %v2356_v59, %v2316_v21 }
 0x50b   : > { %2758 = vmatpush.msrb.mxu3 %v2695_v36 }
 0x50c   : > { %v2366_v12 = vadd.f32 %v2357_v60, %v694_v3 }
 0x50d   : > { %v2444_v39 = vld [vmem:[#allocation2 + $0x72] sm:$0xff]  ;;  %2759 = vmatpush.msrb.mxu3 %v2694_v10 }
 0x50e   : > { %v5134_v57 = vld [vmem:[#allocation2 + $0x71] sm:$0xff]  ;;  %2374 = vst.msk [vmem:[#allocation2 + $0x81] sm:$0xff] %vm5456_vm7, %v2366_v12  ;;  %3030 = vmatmul.msk.f32.gmra.mxu0 %vm5457_vm10, %v2444_v39  ;;  %v3364_v13 = vpack.i.bf16 %v2444_v39, %v5096_v44  ;;  %v3384_v19 = vpack.i.bf16 %v2430_v43, %v2444_v39  ;;  %vm5469_vm7 = vmmov %vm5416_vm0 }
 0x50f   : > { %v5136_v45 = vld [vmem:[#allocation2 + $0x70] sm:$0xff]  ;;  %v3359_v51 = vpack.i.bf16 %v5134_v57, %v5098_v62  ;;  %2760 = vmatpush.msrb.mxu3 %v2693_v58  ;;  %vm5470_vm10 = vmmov %vm5416_vm0 }
 0x510   : > { %v3354_v35 = vpack.i.bf16 %v5136_v45, %v5055_v23  ;;  %3365 = vrot.lane.b32.xlu1 %v3364_v13, %s5421_s12 }
 0x511   : > { %2761 = vmatpush.msrb.mxu3 %v2692_v47 }
 0x512   : > { %3360 = vrot.lane.b32.xlu0 %v3359_v51, %s5448_s1  ;;  %3355 = vrot.lane.b32.xlu2 %v3354_v35, %s3532_s17 }
 0x515   : > { %v2445_v46 = vld [vmem:[#allocation2 + $0x82] sm:$0xff] }
 0x516   : > { %v5157_v24 = vld [vmem:[#allocation2 + $0x81] sm:$0xff]  ;;  %3031 = vmatmul.msk.f32.gmra.mxu0 %vm5458_vm3, %v2445_v46  ;;  %v3379_v9 = vpack.i.bf16 %v2445_v46, %v5134_v57  ;;  %vm5471_vm3 = vmmov %vm5416_vm0 }
 0x517   : > { %v2429_v30 = vld [vmem:[#allocation2 + $0x80] sm:$0xff]  ;;  %v3374_v7 = vpack.i.bf16 %v5157_v24, %v5136_v45 }
 0x518   : > { %v3369_v23 = vpack.i.bf16 %v2429_v30, %v2443_v31  ;;  %3380 = vrot.lane.b32.xlu1 %v3379_v9, %s5421_s12  ;;  %v3389_v26 = vpack.i.bf16 %v4814_v11, %v2429_v30  ;;  %v2708_v11 = vld [vmem:[%s5346_s14 + $0xa8] sm:$0xff]  ;;  %s527_s12 = sand.u32 1, %s3520_s22  }
 0x519   : > { %2802 = vmatpush.msrb.mxu2 %v2708_v11  ;;  %s2976_s18 = sshll.u32 %s527_s12, 6  ;;  %s2883_s25 = scalar_lea.sflag [#allocation4], %s527_s12 }
 0x51a   : > { %3375 = vrot.lane.b32.xlu0 %v3374_v7, %s5448_s1  ;;  %3370 = vrot.lane.b32.xlu2 %v3369_v23, %s3532_s17  ;;  %s5280_s19 = scalar_lea.vmem [#allocation3], %s2976_s18 }
 0x51b   : > { %2803 = vmatpush.msrb.mxu2 %v2707_v42  ;;  %s2895_s23 = sshll.u32 %s5280_s19, 4  ;;  %s2896_s23 = int_to_ptr.vmem [resolvable:$true] %s2895_s23 }
 0x51d   : > { %2804 = vmatpush.msrb.mxu2 %v2706_v34 }
 0x51e   : > { %3032 = vmatmul.msk.f32.gmra.mxu0 %vm5459_vm4, %v4914_v49  ;;  %v2691_v49 = vld [vmem:[%s5346_s14 + $0x20] sm:$0xff]  ;;  %vm5472_vm4 = vmmov %vm5416_vm0 }
 0x51f   : > { %2762 = vmatpush.msrb.mxu3 %v2691_v49  ;;  %2805 = vmatpush.msrb.mxu2 %v2705_v8 }
 0x521   : > { %2763 = vmatpush.msrb.mxu3 %v2690_v16  ;;  %2806 = vmatpush.msrb.mxu2 %v2704_v56 }
 0x522   : > { %3390 = vrot.lane.b32.xlu0 %v3389_v26, %s5448_s1  ;;  %3385 = vrot.lane.b32.xlu2 %v3384_v19, %s3532_s17 }
 0x523   : > { %2764 = vmatpush.msrb.mxu3 %v2689_v38  ;;  %2807 = vmatpush.msrb.mxu2 %v2703_v28 }
 0x525   : > { %2765 = vmatpush.msrb.mxu3 %v2688_v4 }
 0x527   : > { %2766 = vmatpush.msrb.mxu3 %v2687_v18 }
 0x543   : > { %v3281_v0 = vpop.permute.xlu2 %3280 }
 0x544   : > { %v3283_v20 = vunpack.i.h.bf16 %v3281_v0  ;;  %v3282_v52 = vunpack.i.l.bf16 %v3281_v0 }
 0x54c   : > { %v3296_v31 = vpop.permute.xlu2 %3295 }
 0x54d   : > { %v3298_v39 = vunpack.i.h.bf16 %v3296_v31  ;;  %v3297_v51 = vunpack.i.l.bf16 %v3296_v31 }
 0x552   : > { %v3276_v6 = vpop.permute.xlu1 %3275 }
 0x553   : > { %v3278_v29 = vunpack.i.h.bf16 %v3276_v6  ;;  %v3277_v40 = vunpack.i.l.bf16 %v3276_v6 }
 0x554   : > { %v3311_v60 = vpop.permute.xlu2 %3310 }
 0x555   : > { %v2639_v22 = vsel %vm5460_vm5, %v4888_v27, %v3277_v40  ;;  %v2663_v14 = vsel %vm5461_vm6, %v5005_v2, %v3278_v29  ;;  %v3313_v26 = vunpack.i.h.bf16 %v3311_v60  ;;  %v3312_v19 = vunpack.i.l.bf16 %v3311_v60  ;;  %vm5473_vm5 = vmmov %vm5416_vm0 }
 0x556   : > { %v2647_v5 = vsel %vm540_vm1, %v2639_v22, %v3282_v52  ;;  %v2671_v3 = vsel %vm540_vm1, %v2663_v14, %v3283_v20  ;;  %vm5474_vm6 = vmmov %vm5416_vm0 }
 0x55a   : > { %v3291_v32 = vpop.permute.xlu1 %3290 }
 0x55b   : > { %v3293_v55 = vunpack.i.h.bf16 %v3291_v32  ;;  %v3292_v36 = vunpack.i.l.bf16 %v3291_v32 }
 0x55c   : > { %v3286_v59 = vpop.permute.xlu0 %3285 }
 0x55d   : > { %v3288_v25 = vunpack.i.h.bf16 %v3286_v59  ;;  %v3287_v21 = vunpack.i.l.bf16 %v3286_v59  ;;  %v2640_v2 = vsel %vm5462_vm8, %v4993_v48, %v3292_v36  ;;  %v2664_v61 = vsel %vm5463_vm9, %v4997_v54, %v3293_v55  ;;  %v3326_v48 = vpop.permute.xlu2 %3325  ;;  %vm5477_vm8 = vmmov %vm5416_vm0 }
 0x55e   : > { %v2648_v58 = vsel %vm540_vm1, %v2640_v2, %v3297_v51  ;;  %v2672_v46 = vsel %vm540_vm1, %v2664_v61, %v3298_v39  ;;  %v3328_v18 = vunpack.i.h.bf16 %v3326_v48  ;;  %v3327_v28 = vunpack.i.l.bf16 %v3326_v48  ;;  %vm5478_vm9 = vmmov %vm5416_vm0 }
 0x55f   : > { %v2655_v12 = vsel %vm2139_vm14, %v2647_v5, %v3287_v21  ;;  %v2679_v27 = vsel %vm2139_vm14, %v2671_v3, %v3288_v25 }
 0x560   : > { %2767 = vmatmul.f32.vlgmr.msrb.gmra.mxu3 %v2655_v12  ;;  %2808 = vmatmul.f32.vlgmr.msrb.gmra.mxu2 %v2679_v27 }
 0x562   : > { %v3306_v53 = vpop.permute.xlu1 %3305 }
 0x563   : > { %v3308_v30 = vunpack.i.h.bf16 %v3306_v53  ;;  %v3307_v7 = vunpack.i.l.bf16 %v3306_v53 }
 0x564   : > { %v3301_v35 = vpop.permute.xlu0 %3300 }
 0x565   : > { %v3303_v13 = vunpack.i.h.bf16 %v3301_v35  ;;  %v3302_v10 = vunpack.i.l.bf16 %v3301_v35  ;;  %v2641_v54 = vsel %vm5464_vm11, %v4995_v50, %v3307_v7  ;;  %v2665_v43 = vsel %vm5465_vm12, %v5013_v63, %v3308_v30  ;;  %v3341_v50 = vpop.permute.xlu2 %3340  ;;  %vm5479_vm11 = vmmov %vm5416_vm0 }
 0x566   : > { %v2649_v42 = vsel %vm540_vm1, %v2641_v54, %v3312_v19  ;;  %v2673_v16 = vsel %vm540_vm1, %v2665_v43, %v3313_v26  ;;  %v3343_v25 = vunpack.i.h.bf16 %v3341_v50  ;;  %v3342_v21 = vunpack.i.l.bf16 %v3341_v50  ;;  %vm5480_vm12 = vmmov %vm5416_vm0 }
 0x567   : > { %v2656_v23 = vsel %vm2139_vm14, %v2648_v58, %v3302_v10  ;;  %v2680_v9 = vsel %vm2139_vm14, %v2672_v46, %v3303_v13 }
 0x568   : > { %2770 = vmatmul.f32.gmra.mxu3 %v2656_v23  ;;  %2811 = vmatmul.f32.gmra.mxu2 %v2680_v9 }
 0x56a   : > { %v3321_v49 = vpop.permute.xlu1 %3320 }
 0x56b   : > { %v3323_v34 = vunpack.i.h.bf16 %v3321_v49  ;;  %v3322_v38 = vunpack.i.l.bf16 %v3321_v49 }
 0x56c   : > { %v3316_v17 = vpop.permute.xlu0 %3315 }
 0x56d   : > { %v3318_v47 = vunpack.i.h.bf16 %v3316_v17  ;;  %v3317_v11 = vunpack.i.l.bf16 %v3316_v17  ;;  %v2642_v63 = vsel %vm5416_vm0, %v5015_v37, %v3322_v38  ;;  %v2666_v56 = vsel %vm5466_vm13, %v5031_v15, %v3323_v34  ;;  %v3356_v5 = vpop.permute.xlu2 %3355  ;;  %vm5481_vm13 = vmmov %vm5416_vm0 }
 0x56e   : > { %v2650_v40 = vsel %vm540_vm1, %v2642_v63, %v3327_v28  ;;  %v2674_v22 = vsel %vm540_vm1, %v2666_v56, %v3328_v18  ;;  %v3358_v51 = vunpack.i.h.bf16 %v3356_v5  ;;  %v3357_v35 = vunpack.i.l.bf16 %v3356_v5 }
 0x56f   : > { %v2657_v8 = vsel %vm2139_vm14, %v2649_v42, %v3317_v11  ;;  %v2681_v4 = vsel %vm2139_vm14, %v2673_v16, %v3318_v47 }
 0x570   : > { %2773 = vmatmul.f32.gmra.mxu3 %v2657_v8  ;;  %2814 = vmatmul.f32.gmra.mxu2 %v2681_v4 }
 0x572   : > { %v3336_v29 = vpop.permute.xlu1 %3335 }
 0x573   : > { %v3338_v14 = vunpack.i.h.bf16 %v3336_v29  ;;  %v3337_v20 = vunpack.i.l.bf16 %v3336_v29 }
 0x574   : > { %v3331_v0 = vpop.permute.xlu0 %3330 }
 0x575   : > { %v3333_v6 = vunpack.i.h.bf16 %v3331_v0  ;;  %v3332_v31 = vunpack.i.l.bf16 %v3331_v0  ;;  %v2643_v37 = vsel %vm5467_vm2, %v5033_v41, %v3337_v20  ;;  %v2667_v15 = vsel %vm5468_vm15, %v5057_v33, %v3338_v14  ;;  %v3371_v7 = vpop.permute.xlu2 %3370 }
 0x576   : > { %v2651_v36 = vsel %vm540_vm1, %v2643_v37, %v3342_v21  ;;  %v2675_v12 = vsel %vm540_vm1, %v2667_v15, %v3343_v25  ;;  %v3373_v43 = vunpack.i.h.bf16 %v3371_v7  ;;  %v3372_v26 = vunpack.i.l.bf16 %v3371_v7 }
 0x577   : > { %v2658_v52 = vsel %vm2139_vm14, %v2650_v40, %v3332_v31  ;;  %v2682_v59 = vsel %vm2139_vm14, %v2674_v22, %v3333_v6 }
 0x578   : > { %2776 = vmatmul.f32.gmra.mxu3 %v2658_v52  ;;  %2817 = vmatmul.f32.gmra.mxu2 %v2682_v59 }
 0x57a   : > { %v3351_v55 = vpop.permute.xlu1 %3350 }
 0x57b   : > { %v3353_v27 = vunpack.i.h.bf16 %v3351_v55  ;;  %v3352_v2 = vunpack.i.l.bf16 %v3351_v55 }
 0x57c   : > { %v3346_v32 = vpop.permute.xlu0 %3345 }
 0x57d   : > { %v3348_v3 = vunpack.i.h.bf16 %v3346_v32  ;;  %v3347_v60 = vunpack.i.l.bf16 %v3346_v32  ;;  %v2644_v33 = vsel %vm5469_vm7, %v5059_v1, %v3352_v2  ;;  %v2668_v39 = vsel %vm5470_vm10, %v5096_v44, %v3353_v27 }
 0x57e   : > { %v2652_v46 = vsel %vm540_vm1, %v2644_v33, %v3357_v35  ;;  %v2676_v30 = vsel %vm540_vm1, %v2668_v39, %v3358_v51 }
 0x57f   : > { %v2659_v61 = vsel %vm2139_vm14, %v2651_v36, %v3347_v60  ;;  %v2683_v41 = vsel %vm2139_vm14, %v2675_v12, %v3348_v3 }
 0x580   : > { %2779 = vmatmul.f32.gmra.mxu3 %v2659_v61  ;;  %2820 = vmatmul.f32.gmra.mxu2 %v2683_v41 }
 0x582   : > { %v3366_v58 = vpop.permute.xlu1 %3365 }
 0x583   : > { %v3368_v23 = vunpack.i.h.bf16 %v3366_v58  ;;  %v3367_v9 = vunpack.i.l.bf16 %v3366_v58 }
 0x584   : > { %v3361_v13 = vpop.permute.xlu0 %3360 }
 0x585   : > { %v3363_v10 = vunpack.i.h.bf16 %v3361_v13  ;;  %v3362_v53 = vunpack.i.l.bf16 %v3361_v13  ;;  %v2645_v44 = vsel %vm5471_vm3, %v5098_v62, %v3367_v9  ;;  %v2669_v54 = vsel %vm5472_vm4, %v5134_v57, %v3368_v23  ;;  %v3386_v62 = vpop.permute.xlu2 %3385 }
 0x586   : > { %v2653_v49 = vsel %vm540_vm1, %v2645_v44, %v3372_v26  ;;  %v2677_v42 = vsel %vm540_vm1, %v2669_v54, %v3373_v43  ;;  %v3388_v50 = vunpack.i.h.bf16 %v3386_v62  ;;  %v3387_v63 = vunpack.i.l.bf16 %v3386_v62 }
 0x587   : > { %v2660_v48 = vsel %vm2139_vm14, %v2652_v46, %v3362_v53  ;;  %v2684_v1 = vsel %vm2139_vm14, %v2676_v30, %v3363_v10 }
 0x588   : > { %2782 = vmatmul.f32.gmra.mxu3 %v2660_v48  ;;  %2823 = vmatmul.f32.gmra.mxu2 %v2684_v1 }
 0x58a   : > { %v3381_v11 = vpop.permute.xlu1 %3380 }
 0x58b   : > { %v3383_v16 = vunpack.i.h.bf16 %v3381_v11  ;;  %v3382_v34 = vunpack.i.l.bf16 %v3381_v11 }
 0x58c   : > { %v3376_v19 = vpop.permute.xlu0 %3375 }
 0x58d   : > { %v3378_v17 = vunpack.i.h.bf16 %v3376_v19  ;;  %v3377_v47 = vunpack.i.l.bf16 %v3376_v19  ;;  %v2670_v57 = vsel %vm5473_vm5, %v5157_v24, %v3383_v16  ;;  %v2646_v4 = vsel %vm5474_vm6, %v5136_v45, %v3382_v34  ;;  %v2850_v24 = vpop.f32.mrf.mxu0  ;;  %v3397_v45 = vld [vmem:[%s5347_s15] ss:$0 sm:$0xff] }
 0x58e   : > { %v2654_v0 = vsel %vm540_vm1, %v2646_v4, %v3387_v63  ;;  %v2678_v6 = vsel %vm540_vm1, %v2670_v57, %v3388_v50  ;;  %vm5475_vm1 = vmmov %vm5416_vm0 }
 0x58f   : > { %v2661_v38 = vsel %vm2139_vm14, %v2653_v49, %v3377_v47  ;;  %v2685_v8 = vsel %vm2139_vm14, %v2677_v42, %v3378_v17 }
 0x590   : > { %2785 = vmatmul.f32.gmra.mxu3 %v2661_v38  ;;  %2826 = vmatmul.f32.gmra.mxu2 %v2685_v8 }
 0x594   : > { %v3391_v56 = vpop.permute.xlu0 %3390 }
 0x595   : > { %v3393_v18 = vunpack.i.h.bf16 %v3391_v56  ;;  %v3392_v28 = vunpack.i.l.bf16 %v3391_v56  ;;  %v2853_v40 = vpop.f32.mrf.mxu0 }
 0x597   : > { %v2662_v31 = vsel %vm2139_vm14, %v2654_v0, %v3392_v28  ;;  %v2686_v29 = vsel %vm2139_vm14, %v2678_v6, %v3393_v18  ;;  %vm5476_vm14 = vmmov %vm5416_vm0 }
 0x598   : > { %2788 = vmatmul.f32.gmra.mxu3 %v2662_v31  ;;  %2829 = vmatmul.f32.gmra.mxu2 %v2686_v29 }
 0x59d   : > { %v2856_v25 = vpop.f32.mrf.mxu0 }
 0x5a5   : > { %v2859_v36 = vpop.f32.mrf.mxu0 }
 0x5ad   : > { %v2862_v39 = vpop.f32.mrf.mxu0 }
 0x5b5   : > { %v2865_v46 = vpop.f32.mrf.mxu0 }
 0x5bd   : > { %v2868_v43 = vpop.f32.mrf.mxu0 }
 0x5c5   : > { %v2871_v49 = vpop.f32.mrf.mxu0 }
 0x5e3   : > { %v2768_v22 = vpop.f32.mrf.mxu3  ;;  %v2809_v14 = vpop.f32.mrf.mxu2 }
 0x5e4   : > { %v2769_v20 = vadd.f32 %v3397_v45, %v2768_v22 }
 0x5e6   : > { %v2810_v52 = vadd.f32 %v2809_v14, %v2769_v20 }
 0x5e8   : > { %v2851_v59 = vadd.f32 %v2850_v24, %v2810_v52 }
 0x5ea   : > { %2874 = vst.msk [vmem:[%s5280_s19] sm:$0xff] %vm5475_vm1, %v2851_v59 }
 0x5eb   : > { %v2771_v37 = vpop.f32.mrf.mxu3  ;;  %v2812_v15 = vpop.f32.mrf.mxu2 }
 0x5ec   : > { %v2772_v21 = vadd.f32 %v3397_v45, %v2771_v37 }
 0x5ee   : > { %v2813_v32 = vadd.f32 %v2812_v15, %v2772_v21 }
 0x5f0   : > { %v2854_v5 = vadd.f32 %v2853_v40, %v2813_v32 }
 0x5f2   : > { %2875 = vst.msk [vmem:[%s5280_s19 + $0x8] sm:$0xff] %vm5476_vm14, %v2854_v5 }
 0x5f3   : > { %v2774_v3 = vpop.f32.mrf.mxu3  ;;  %v2815_v60 = vpop.f32.mrf.mxu2 }
 0x5f4   : > { %v2775_v55 = vadd.f32 %v3397_v45, %v2774_v3 }
 0x5f6   : > { %v2816_v12 = vadd.f32 %v2815_v60, %v2775_v55 }
 0x5f8   : > { %v2857_v27 = vadd.f32 %v2856_v25, %v2816_v12 }
 0x5fa   : > { %2876 = vst.msk [vmem:[%s5280_s19 + $0x10] sm:$0xff] %vm5477_vm8, %v2857_v27 }
 0x5fb   : > { %v2777_v2 = vpop.f32.mrf.mxu3  ;;  %v2818_v61 = vpop.f32.mrf.mxu2 }
 0x5fc   : > { %v2778_v41 = vadd.f32 %v3397_v45, %v2777_v2 }
 0x5fe   : > { %v2819_v33 = vadd.f32 %v2818_v61, %v2778_v41 }
 0x600   : > { %v2860_v51 = vadd.f32 %v2859_v36, %v2819_v33 }
 0x602   : > { %2877 = vst.msk [vmem:[%s5280_s19 + $0x18] sm:$0xff] %vm5478_vm9, %v2860_v51 }
 0x603   : > { %v2780_v35 = vpop.f32.mrf.mxu3  ;;  %v2821_v13 = vpop.f32.mrf.mxu2 }
 0x604   : > { %v2781_v10 = vadd.f32 %v3397_v45, %v2780_v35 }
 0x606   : > { %v2822_v53 = vadd.f32 %v2821_v13, %v2781_v10 }
 0x608   : > { %v2863_v58 = vadd.f32 %v2862_v39, %v2822_v53 }
 0x60a   : > { %2878 = vst.msk [vmem:[%s5280_s19 + $0x20] sm:$0xff] %vm5479_vm11, %v2863_v58 }
 0x60b   : > { %v2783_v30 = vpop.f32.mrf.mxu3  ;;  %v2824_v7 = vpop.f32.mrf.mxu2 }
 0x60c   : > { %v2784_v23 = vadd.f32 %v3397_v45, %v2783_v30 }
 0x60e   : > { %v2825_v9 = vadd.f32 %v2824_v7, %v2784_v23 }
 0x610   : > { %v2866_v48 = vadd.f32 %v2865_v46, %v2825_v9 }
 0x612   : > { %2879 = vst.msk [vmem:[%s5280_s19 + $0x28] sm:$0xff] %vm5480_vm12, %v2866_v48 }
 0x613   : > { %v2786_v1 = vpop.f32.mrf.mxu3  ;;  %v2827_v44 = vpop.f32.mrf.mxu2 }
 0x614   : > { %v2787_v54 = vadd.f32 %v3397_v45, %v2786_v1 }
 0x616   : > { %v2828_v26 = vadd.f32 %v2827_v44, %v2787_v54 }
 0x618   : > { %v2869_v19 = vadd.f32 %v2868_v43, %v2828_v26 }
 0x61a   : > { %2880 = vst.msk [vmem:[%s5280_s19 + $0x30] sm:$0xff] %vm5416_vm0, %v2869_v19 }
 0x61b   : > { %v2789_v17 = vpop.f32.mrf.mxu3  ;;  %v2830_v11 = vpop.f32.mrf.mxu2 }
 0x61c   : > { %v2790_v47 = vadd.f32 %v3397_v45, %v2789_v17 }
 0x61e   : > { %v2831_v42 = vadd.f32 %v2830_v11, %v2790_v47 }
 0x620   : > { %v2872_v16 = vadd.f32 %v2871_v49, %v2831_v42 }
 0x622   : > { %2881 = vst.msk [vmem:[%s5280_s19 + $0x38] sm:$0xff] %vm5481_vm13, %v2872_v16 }
 0x623   : > { %3493 = shalt.err (!%p3490_p3)
}
 0x624   : > { %s3534_s12 = smov 128   ;;  %s3535_s19 = smov 8  }
 0x625   : > { %3049 = dma.vmem_to_hbm [thread:$0]  (%p3659_p5), %s2896_s23, 1024, %s2898_s20, %s2883_s25, %s3534_s12, %s3534_s12, %s3535_s19  }
 0x626 PF: > { %p3055_p4 = scmp.ge.s32.totalorder %s3528_s24, 2  ;;  %s2912_s29 = sand.u32 1, %s3516_s21  }
 0x627   : > { %s2913_s18 = scalar_lea.sflag [#allocation4], %s2912_s29 }
 0x628   : > { %p3052_p7 = pnand %p3055_p4, %p3663_p6 }
 0x62a   : > { %p3053_p8 = pneg %p3052_p7 }
 0x62c   : > { %3511 = dma.done.wait (%p3053_p8), %s2913_s18, 1024  }
 0x62d   : > { %3513 = vsyncadd (%p3053_p8), %s2913_s18, 4294966272  ;;  %s5483_s24 = sld [smem:[#allocation7_spill]]  ;;  %s5486_s21 = smov %s3520_s22 }
 0x62e   : > { %s5484_s26 = sld [smem:[#allocation6_spill]] }
 0x62f   : > { %s5485_s23 = sld [smem:[#allocation8_spill]] }
 0x633   : > { %p26_p9 = scmp.ge.s32.totalorder %s5483_s24, 4  }
 0x634   : > { %s5487_s22 = smov %s5484_s26 }
 0x635   :  { %28 = sbr.rel (!%p26_p9) target bundleno = 7 (0x7), region = 124 }
 0x63a   :  { %2919 = vsyncpa [#allocation4], 1 }
 0x63b   :  { %2921 = vsyncpa [#allocation4 + $0x1], 1 }

</bundles_post_ra>
